<compile_context>
chip_gen: v6e
topology: v6e:2x2x1
jax: 0.10.0
libtpu: 0.0.40
codegen_flags: <defaults>
</compile_context>

<pallas_src>
import math

import jax
import jax.numpy as jnp
from jax.experimental import pallas as pl
from jax.experimental.pallas import tpu as pltpu

# ----------------------------- model config ---------------------------------
VOCAB = 50
D_MODEL = 32
HEADS = 4
D_K = D_MODEL // HEADS
D_FF = 2048          # PyTorch FeedForward default
N_LAYERS = 2
EPS = 1e-6
NEG_INF = -1e9
MAX_SEQ_LEN = 200
ROWS_PER_LAYER = 9   # a1 b1 bq bk bv bo a2 b2 bf2 in the packed (., D) slab


# --------------------------- shared math (jnp) -------------------------------
def _layer_norm(x, alpha, bias, d):
    # PyTorch Norm: alpha * (x - mean) / (x.std(unbiased) + eps) + bias
    mean = jnp.mean(x, axis=-1, keepdims=True)
    xc = x - mean
    var = jnp.sum(xc * xc, axis=-1, keepdims=True) / (d - 1)  # unbiased std
    std = jnp.sqrt(var)
    return alpha * xc / (std + EPS) + bias


# ------------------------------ fused Pallas kernel ---------------------------
def make_encoder_kernel(B, S, D, n_layers):
    """Single kernel: scale+PE, n_layers pre-norm encoder layers, final norm."""
    sqrt_d = math.sqrt(D)

    def kernel(emb_ref, pe_ref, bias_ref, vec_ref, wqkv_ref, wo_ref,
               w1_ref, bf1_ref, w2_ref, out_ref):
        # Additive pad-mask bias, broadcast ONCE for the whole kernel.
        bias = jnp.broadcast_to(bias_ref[...], (B, S, S))        # (B, S, S)

        # Embedding scale + positional encoding (PE broadcast over batch).
        x = (emb_ref[...].reshape(B, S, D) * sqrt_d
             + pe_ref[...]).reshape(B * S, D)                     # (B*S, D) f32

        for l in range(n_layers):
            r = ROWS_PER_LAYER * l
            a1 = vec_ref[r + 0:r + 1, :]
            b1 = vec_ref[r + 1:r + 2, :]
            bq = vec_ref[r + 2:r + 3, :]          # 1/sqrt(d_k) pre-folded
            bk = vec_ref[r + 3:r + 4, :]
            bv = vec_ref[r + 4:r + 5, :]
            bo = vec_ref[r + 5:r + 6, :]
            a2 = vec_ref[r + 6:r + 7, :]
            b2 = vec_ref[r + 7:r + 8, :]
            bf2 = vec_ref[r + 8:r + 9, :]

            # ---------------- self-attention sub-block (pre-norm) ------------
            x2 = _layer_norm(x, a1, b1, D)
            qkv = jnp.dot(x2, wqkv_ref[l],
                          preferred_element_type=jnp.float32)    # (B*S, 3D)
            q = (qkv[:, 0 * D:1 * D] + bq).reshape(B, S, D)
            k = (qkv[:, 1 * D:2 * D] + bk).reshape(B, S, D)
            v = (qkv[:, 2 * D:3 * D] + bv).reshape(B, S, D)

            heads = []
            for h in range(HEADS):
                c0 = h * D_K
                qh = q[:, :, c0:c0 + D_K]
                kh = k[:, :, c0:c0 + D_K]
                vh = v[:, :, c0:c0 + D_K]
                s = jnp.einsum('bqd,bkd->bqk', qh, kh,
                               preferred_element_type=jnp.float32) + bias
                m = jnp.max(s, axis=-1, keepdims=True)
                e = jnp.exp(s - m)
                p = e * pl.reciprocal(jnp.sum(e, axis=-1, keepdims=True),
                                      approx=True)
                heads.append(jnp.einsum('bqk,bkd->bqd', p, vh,
                                        preferred_element_type=jnp.float32))
            o = jnp.concatenate(heads, axis=-1).reshape(B * S, D)

            x = x + jnp.dot(o, wo_ref[l],
                            preferred_element_type=jnp.float32) + bo

            # ---------------- feed-forward sub-block (pre-norm) --------------
            # bf16 MXU operands, f32 accumulation; bias+ReLU kept in bf16 to
            # halve vreg pressure of the (B*S, D_FF) intermediate.
            x2 = _layer_norm(x, a2, b2, D)
            h1 = jnp.dot(x2.astype(jnp.bfloat16), w1_ref[l],
                         preferred_element_type=jnp.float32).astype(jnp.bfloat16)
            h1 = jnp.maximum(h1 + bf1_ref[l:l + 1, :], 0)
            ff = jnp.dot(h1, w2_ref[l],
                         preferred_element_type=jnp.float32) + bf2
            x = x + ff

        na = vec_ref[ROWS_PER_LAYER * n_layers + 0:ROWS_PER_LAYER * n_layers + 1, :]
        nb = vec_ref[ROWS_PER_LAYER * n_layers + 1:ROWS_PER_LAYER * n_layers + 2, :]
        out_ref[...] = _layer_norm(x, na, nb, D)

    return kernel


# ------------------------------ wrapper ---------------------------------------
def _vmem_spec():
    return pl.BlockSpec(memory_space=pltpu.MemorySpace.VMEM)


def pack_params(params):
    """One-time (init-time) packing: fold 1/sqrt(d_k), fuse QKV, stack slabs."""
    scale = 1.0 / math.sqrt(D_K)
    vec_rows, wqkv, wo, w1, bf1, w2 = [], [], [], [], [], []
    for lp in params["layers"]:
        vec_rows += [lp["a1"], lp["b1"], lp["bq"] * scale, lp["bk"], lp["bv"],
                     lp["bo"], lp["a2"], lp["b2"], lp["bf2"]]
        wqkv.append(jnp.concatenate([lp["wq"] * scale, lp["wk"], lp["wv"]],
                                    axis=1))
        wo.append(lp["wo"])
        w1.append(lp["w1"].astype(jnp.bfloat16))
        bf1.append(lp["bf1"].astype(jnp.bfloat16))
        w2.append(lp["w2"].astype(jnp.bfloat16))
    vec_rows += [params["norm_a"], params["norm_b"]]
    return {
        "embed": params["embed"],
        "pe": params["pe"],
        "vec32": jnp.concatenate(vec_rows, axis=0),   # (9L+2, D)  f32
        "wqkv": jnp.stack(wqkv),                      # (L, D, 3D) f32
        "wo": jnp.stack(wo),                          # (L, D, D)  f32
        "w1": jnp.stack(w1),                          # (L, D, D_FF) bf16
        "bf1": jnp.concatenate(bf1, axis=0),          # (L, D_FF)  bf16
        "w2": jnp.stack(w2),                          # (L, D_FF, D) bf16
        "n_layers": len(params["layers"]),
    }


def encoder_forward(src, mask, packed):
    """Full Encoder.forward: embed gather (XLA) -> one fused Pallas kernel."""
    B, S = src.shape
    n_layers = packed["n_layers"]

    emb = jnp.take(packed["embed"], src.reshape(-1), axis=0)      # (B*S, D)
    pe = packed["pe"][:S]                                         # (S, D)
    mask_bias = (mask.astype(jnp.float32) - 1.0) * 1e9            # (B, 1, S)

    args = [emb.astype(jnp.float32), pe, mask_bias,
            packed["vec32"], packed["wqkv"], packed["wo"],
            packed["w1"], packed["bf1"], packed["w2"]]

    kernel = make_encoder_kernel(B, S, D_MODEL, n_layers)
    out_flat = pl.pallas_call(
        kernel,
        out_shape=jax.ShapeDtypeStruct((B * S, D_MODEL), jnp.float32),
        in_specs=[_vmem_spec() for _ in args],
        out_specs=_vmem_spec(),
    )(*args)
    return out_flat.reshape(B, S, D_MODEL)


def positional_encoding(max_len, d_model):
    # Replicates the tutorial's PositionalEncoder buffer exactly:
    # pe[pos, 2j]   = sin(pos / 10000 ** ((2*(2j))   / d_model))
    # pe[pos, 2j+1] = cos(pos / 10000 ** ((2*(2j+1)) / d_model))
    pos = jnp.arange(max_len, dtype=jnp.float32)[:, None]
    i_even = jnp.arange(0, d_model, 2, dtype=jnp.float32)
    even = jnp.sin(pos / (10000.0 ** ((2.0 * i_even) / d_model)))
    odd = jnp.cos(pos / (10000.0 ** ((2.0 * (i_even + 1.0)) / d_model)))
    pe = jnp.stack([even, odd], axis=-1).reshape(max_len, d_model)
    return pe.astype(jnp.float32)


# -------------------------- pure-JAX reference --------------------------------
def encoder_layer_ref(x, mask, p):
    B, S, D = x.shape
    x2 = _layer_norm(x, p["a1"], p["b1"], D)
    q = x2 @ p["wq"] + p["bq"]
    k = x2 @ p["wk"] + p["bk"]
    v = x2 @ p["wv"] + p["bv"]

    def split(t):
        return t.reshape(B, S, HEADS, D_K).transpose(0, 2, 1, 3)

    qh, kh, vh = split(q), split(k), split(v)
    scores = jnp.einsum("bhqd,bhkd->bhqk", qh, kh) / math.sqrt(D_K)
    scores = jnp.where(mask[:, None, :, :] == 0, NEG_INF, scores)
    attn = jax.nn.softmax(scores, axis=-1)
    o = jnp.einsum("bhqk,bhkd->bhqd", attn, vh).transpose(0, 2, 1, 3).reshape(B, S, D)
    x = x + (o @ p["wo"] + p["bo"])
    x2 = _layer_norm(x, p["a2"], p["b2"], D)
    ff = jnp.maximum(x2 @ p["w1"] + p["bf1"], 0.0) @ p["w2"] + p["bf2"]
    return x + ff


def encoder_forward_ref(src, mask, params):
    emb = jnp.take(params["embed"], src, axis=0)
    S = src.shape[1]
    x = emb * math.sqrt(D_MODEL) + params["pe"][:S][None, :, :]
    x = x.astype(jnp.float32)
    for lp in params["layers"]:
        x = encoder_layer_ref(x, mask, lp)
    return _layer_norm(x, params["norm_a"], params["norm_b"], D_MODEL)


# ------------------------------ parameters ------------------------------------
def init_params(key):
    keys = iter(jax.random.split(key, 2 + 6 * N_LAYERS))

    def dense(k, fan_in, fan_out):
        return (jax.random.normal(k, (fan_in, fan_out), jnp.float32) * 0.05)

    params = {
        "embed": jax.random.normal(next(keys), (VOCAB, D_MODEL), jnp.float32),
        "pe": positional_encoding(MAX_SEQ_LEN, D_MODEL),
        "norm_a": jnp.ones((1, D_MODEL), jnp.float32),
        "norm_b": jnp.zeros((1, D_MODEL), jnp.float32),
        "layers": [],
    }
    for _ in range(N_LAYERS):
        lp = {
            "a1": jnp.ones((1, D_MODEL), jnp.float32),
            "b1": jnp.zeros((1, D_MODEL), jnp.float32),
            "wq": dense(next(keys), D_MODEL, D_MODEL),
            "bq": jnp.zeros((1, D_MODEL), jnp.float32),
            "wk": dense(next(keys), D_MODEL, D_MODEL),
            "bk": jnp.zeros((1, D_MODEL), jnp.float32),
            "wv": dense(next(keys), D_MODEL, D_MODEL),
            "bv": jnp.zeros((1, D_MODEL), jnp.float32),
            "wo": dense(next(keys), D_MODEL, D_MODEL),
            "bo": jnp.zeros((1, D_MODEL), jnp.float32),
            "a2": jnp.ones((1, D_MODEL), jnp.float32),
            "b2": jnp.zeros((1, D_MODEL), jnp.float32),
            "w1": dense(next(keys), D_MODEL, D_FF),
            "bf1": jnp.zeros((1, D_FF), jnp.float32),
            "w2": dense(next(keys), D_FF, D_MODEL),
            "bf2": jnp.zeros((1, D_MODEL), jnp.float32),
        }
        params["layers"].append(lp)
    return params


# --------------------------------- main ----------------------------------------
if __name__ == "__main__":
    key = jax.random.PRNGKey(0)
    k_src, k_par = jax.random.split(key)

    B, S = 2, 8
    src = jax.random.randint(k_src, (B, S), 1, VOCAB, dtype=jnp.int32)
    src = src.at[1, -2:].set(0)                       # pad a couple of positions
    mask = (src != 0).astype(jnp.int32)[:, None, :]   # (B, 1, S), 1=keep 0=pad

    params = init_params(k_par)
    packed = pack_params(params)                      # one-time packing

    out = encoder_forward(src, mask, packed)
    out = jax.block_until_ready(out)

    assert out.shape == (B, S, D_MODEL), out.shape
    assert bool(jnp.all(jnp.isfinite(out)))

    ref = encoder_forward_ref(src, mask, params)
    max_err = float(jnp.max(jnp.abs(out - ref)))
    if max_err > 5e-2:
        raise AssertionError(f"Pallas output mismatch vs reference, max_err={max_err}")

    print("KERNEL_OK")
</pallas_src>

<mosaic_0001>
module attributes {stable_mosaic.version = 11 : i64} {
  func.func @kernel(%arg0: memref<16x32xf32, #tpu.memory_space<vmem>>, %arg1: memref<8x32xf32, #tpu.memory_space<vmem>>, %arg2: memref<2x1x8xf32, #tpu.memory_space<vmem>>, %arg3: memref<20x32xf32, #tpu.memory_space<vmem>>, %arg4: memref<2x32x96xf32, #tpu.memory_space<vmem>>, %arg5: memref<2x32x32xf32, #tpu.memory_space<vmem>>, %arg6: memref<2x32x2048xbf16, #tpu.memory_space<vmem>>, %arg7: memref<2x2048xbf16, #tpu.memory_space<vmem>>, %arg8: memref<2x2048x32xbf16, #tpu.memory_space<vmem>>, %arg9: memref<16x32xf32, #tpu.memory_space<vmem>>) attributes {dimension_semantics = [], scalar_prefetch = 0 : i64, scratch_operands = 0 : i64, tpu.core_type = #tpu.core_type<tc>} {
    %c0 = arith.constant 0 : index
    %c0_0 = arith.constant 0 : index
    %c0_1 = arith.constant 0 : index
    %0 = vector.load %arg2[%c0, %c0_0, %c0_1] : memref<2x1x8xf32, #tpu.memory_space<vmem>>, vector<2x1x8xf32>
    %1 = vector.shape_cast %0 : vector<2x1x8xf32> to vector<2x1x8xf32>
    %2 = vector.broadcast %1 : vector<2x1x8xf32> to vector<2x8x8xf32>
    %c0_2 = arith.constant 0 : index
    %c0_3 = arith.constant 0 : index
    %3 = vector.load %arg0[%c0_2, %c0_3] : memref<16x32xf32, #tpu.memory_space<vmem>>, vector<16x32xf32>
    %4 = vector.shape_cast %3 : vector<16x32xf32> to vector<2x8x32xf32>
    %cst = arith.constant 5.65685415 : f32
    %5 = vector.broadcast %cst : f32 to vector<2x8x32xf32>
    %6 = arith.mulf %4, %5 : vector<2x8x32xf32>
    %c0_4 = arith.constant 0 : index
    %c0_5 = arith.constant 0 : index
    %7 = vector.load %arg1[%c0_4, %c0_5] : memref<8x32xf32, #tpu.memory_space<vmem>>, vector<8x32xf32>
    %8 = vector.shape_cast %7 : vector<8x32xf32> to vector<1x8x32xf32>
    %9 = vector.broadcast %8 : vector<1x8x32xf32> to vector<2x8x32xf32>
    %10 = arith.addf %6, %9 : vector<2x8x32xf32>
    %11 = vector.shape_cast %10 : vector<2x8x32xf32> to vector<16x32xf32>
    %c0_6 = arith.constant 0 : index
    %c0_7 = arith.constant 0 : index
    %12 = vector.load %arg3[%c0_6, %c0_7] : memref<20x32xf32, #tpu.memory_space<vmem>>, vector<1x32xf32>
    %c1 = arith.constant 1 : index
    %c0_8 = arith.constant 0 : index
    %13 = vector.load %arg3[%c1, %c0_8] : memref<20x32xf32, #tpu.memory_space<vmem>>, vector<1x32xf32>
    %c2 = arith.constant 2 : index
    %c0_9 = arith.constant 0 : index
    %14 = vector.load %arg3[%c2, %c0_9] : memref<20x32xf32, #tpu.memory_space<vmem>>, vector<1x32xf32>
    %c3 = arith.constant 3 : index
    %c0_10 = arith.constant 0 : index
    %15 = vector.load %arg3[%c3, %c0_10] : memref<20x32xf32, #tpu.memory_space<vmem>>, vector<1x32xf32>
    %c4 = arith.constant 4 : index
    %c0_11 = arith.constant 0 : index
    %16 = vector.load %arg3[%c4, %c0_11] : memref<20x32xf32, #tpu.memory_space<vmem>>, vector<1x32xf32>
    %c5 = arith.constant 5 : index
    %c0_12 = arith.constant 0 : index
    %17 = vector.load %arg3[%c5, %c0_12] : memref<20x32xf32, #tpu.memory_space<vmem>>, vector<1x32xf32>
    %c6 = arith.constant 6 : index
    %c0_13 = arith.constant 0 : index
    %18 = vector.load %arg3[%c6, %c0_13] : memref<20x32xf32, #tpu.memory_space<vmem>>, vector<1x32xf32>
    %c7 = arith.constant 7 : index
    %c0_14 = arith.constant 0 : index
    %19 = vector.load %arg3[%c7, %c0_14] : memref<20x32xf32, #tpu.memory_space<vmem>>, vector<1x32xf32>
    %c8 = arith.constant 8 : index
    %c0_15 = arith.constant 0 : index
    %20 = vector.load %arg3[%c8, %c0_15] : memref<20x32xf32, #tpu.memory_space<vmem>>, vector<1x32xf32>
    %cst_16 = arith.constant dense<0.000000e+00> : vector<16xf32>
    %21 = vector.multi_reduction <add>, %11, %cst_16 [1] : vector<16x32xf32> to vector<16xf32>
    %22 = vector.shape_cast %21 : vector<16xf32> to vector<16x1xf32>
    %cst_17 = arith.constant 3.200000e+01 : f32
    %23 = vector.broadcast %cst_17 : f32 to vector<16x1xf32>
    %24 = arith.divf %22, %23 : vector<16x1xf32>
    %25 = vector.broadcast %24 : vector<16x1xf32> to vector<16x32xf32>
    %26 = arith.subf %11, %25 : vector<16x32xf32>
    %27 = arith.mulf %26, %26 : vector<16x32xf32>
    %cst_18 = arith.constant dense<0.000000e+00> : vector<16xf32>
    %28 = vector.multi_reduction <add>, %27, %cst_18 [1] : vector<16x32xf32> to vector<16xf32>
    %29 = vector.shape_cast %28 : vector<16xf32> to vector<16x1xf32>
    %cst_19 = arith.constant 3.100000e+01 : f32
    %30 = vector.broadcast %cst_19 : f32 to vector<16x1xf32>
    %31 = arith.divf %29, %30 : vector<16x1xf32>
    %32 = math.sqrt %31 : vector<16x1xf32>
    %33 = vector.broadcast %12 : vector<1x32xf32> to vector<16x32xf32>
    %34 = arith.mulf %33, %26 : vector<16x32xf32>
    %cst_20 = arith.constant 9.99999997E-7 : f32
    %35 = vector.broadcast %cst_20 : f32 to vector<16x1xf32>
    %36 = arith.addf %32, %35 : vector<16x1xf32>
    %37 = vector.broadcast %36 : vector<16x1xf32> to vector<16x32xf32>
    %38 = arith.divf %34, %37 : vector<16x32xf32>
    %39 = vector.broadcast %13 : vector<1x32xf32> to vector<16x32xf32>
    %40 = arith.addf %38, %39 : vector<16x32xf32>
    %c0_21 = arith.constant 0 : index
    %c0_22 = arith.constant 0 : index
    %c0_23 = arith.constant 0 : index
    %41 = vector.load %arg4[%c0_21, %c0_22, %c0_23] : memref<2x32x96xf32, #tpu.memory_space<vmem>>, vector<1x32x96xf32>
    %42 = vector.shape_cast %41 : vector<1x32x96xf32> to vector<32x96xf32>
    %cst_24 = arith.constant dense<0.000000e+00> : vector<16x96xf32>
    %43 = tpu.matmul %40, %42, %cst_24 {dimension_numbers = #tpu.dot_dimension_numbers<[1], [0], [0], [1], [0, 0, 1, 1], [], []>} : vector<16x32xf32>, vector<32x96xf32>, vector<16x96xf32> -> vector<16x96xf32>
    %44 = vector.extract_strided_slice %43 {offsets = [0, 0], sizes = [16, 32], strides = [1, 1]} : vector<16x96xf32> to vector<16x32xf32>
    %45 = vector.broadcast %14 : vector<1x32xf32> to vector<16x32xf32>
    %46 = arith.addf %44, %45 : vector<16x32xf32>
    %47 = vector.shape_cast %46 : vector<16x32xf32> to vector<2x8x32xf32>
    %48 = vector.extract_strided_slice %43 {offsets = [0, 32], sizes = [16, 32], strides = [1, 1]} : vector<16x96xf32> to vector<16x32xf32>
    %49 = vector.broadcast %15 : vector<1x32xf32> to vector<16x32xf32>
    %50 = arith.addf %48, %49 : vector<16x32xf32>
    %51 = vector.shape_cast %50 : vector<16x32xf32> to vector<2x8x32xf32>
    %52 = vector.extract_strided_slice %43 {offsets = [0, 64], sizes = [16, 32], strides = [1, 1]} : vector<16x96xf32> to vector<16x32xf32>
    %53 = vector.broadcast %16 : vector<1x32xf32> to vector<16x32xf32>
    %54 = arith.addf %52, %53 : vector<16x32xf32>
    %55 = vector.shape_cast %54 : vector<16x32xf32> to vector<2x8x32xf32>
    %56 = vector.extract_strided_slice %47 {offsets = [0, 0, 0], sizes = [2, 8, 8], strides = [1, 1, 1]} : vector<2x8x32xf32> to vector<2x8x8xf32>
    %57 = vector.extract_strided_slice %51 {offsets = [0, 0, 0], sizes = [2, 8, 8], strides = [1, 1, 1]} : vector<2x8x32xf32> to vector<2x8x8xf32>
    %58 = vector.extract_strided_slice %55 {offsets = [0, 0, 0], sizes = [2, 8, 8], strides = [1, 1, 1]} : vector<2x8x32xf32> to vector<2x8x8xf32>
    "tpu.trace_start"() <{level = 10 : i32, message = "bqd,bkd->bqk"}> : () -> ()
    %cst_25 = arith.constant dense<0.000000e+00> : vector<2x8x8xf32>
    %59 = tpu.matmul %56, %57, %cst_25 {dimension_numbers = #tpu.dot_dimension_numbers<[2], [2], [1], [1], [0, 0, 0, 1, 1, 1], [0], [0]>} : vector<2x8x8xf32>, vector<2x8x8xf32>, vector<2x8x8xf32> -> vector<2x8x8xf32>
    "tpu.trace_stop"() : () -> ()
    %60 = arith.addf %59, %2 : vector<2x8x8xf32>
    %cst_26 = arith.constant dense<0xFF800000> : vector<2x8xf32>
    %61 = vector.multi_reduction <maximumf>, %60, %cst_26 [2] : vector<2x8x8xf32> to vector<2x8xf32>
    %62 = vector.shape_cast %61 : vector<2x8xf32> to vector<2x8x1xf32>
    %63 = vector.broadcast %62 : vector<2x8x1xf32> to vector<2x8x8xf32>
    %64 = arith.subf %60, %63 : vector<2x8x8xf32>
    %65 = math.exp %64 : vector<2x8x8xf32>
    %cst_27 = arith.constant dense<0.000000e+00> : vector<2x8xf32>
    %66 = vector.multi_reduction <add>, %65, %cst_27 [2] : vector<2x8x8xf32> to vector<2x8xf32>
    %67 = vector.shape_cast %66 : vector<2x8xf32> to vector<2x8x1xf32>
    %68 = tpu.reciprocal %67 {approx = true} : vector<2x8x1xf32> -> vector<2x8x1xf32>
    %69 = vector.broadcast %68 : vector<2x8x1xf32> to vector<2x8x8xf32>
    %70 = arith.mulf %65, %69 : vector<2x8x8xf32>
    "tpu.trace_start"() <{level = 10 : i32, message = "bqk,bkd->bqd"}> : () -> ()
    %cst_28 = arith.constant dense<0.000000e+00> : vector<2x8x8xf32>
    %71 = tpu.matmul %70, %58, %cst_28 {dimension_numbers = #tpu.dot_dimension_numbers<[2], [1], [1], [2], [0, 0, 0, 1, 1, 2], [0], [0]>} : vector<2x8x8xf32>, vector<2x8x8xf32>, vector<2x8x8xf32> -> vector<2x8x8xf32>
    "tpu.trace_stop"() : () -> ()
    %72 = vector.extract_strided_slice %47 {offsets = [0, 0, 8], sizes = [2, 8, 8], strides = [1, 1, 1]} : vector<2x8x32xf32> to vector<2x8x8xf32>
    %73 = vector.extract_strided_slice %51 {offsets = [0, 0, 8], sizes = [2, 8, 8], strides = [1, 1, 1]} : vector<2x8x32xf32> to vector<2x8x8xf32>
    %74 = vector.extract_strided_slice %55 {offsets = [0, 0, 8], sizes = [2, 8, 8], strides = [1, 1, 1]} : vector<2x8x32xf32> to vector<2x8x8xf32>
    "tpu.trace_start"() <{level = 10 : i32, message = "bqd,bkd->bqk"}> : () -> ()
    %cst_29 = arith.constant dense<0.000000e+00> : vector<2x8x8xf32>
    %75 = tpu.matmul %72, %73, %cst_29 {dimension_numbers = #tpu.dot_dimension_numbers<[2], [2], [1], [1], [0, 0, 0, 1, 1, 1], [0], [0]>} : vector<2x8x8xf32>, vector<2x8x8xf32>, vector<2x8x8xf32> -> vector<2x8x8xf32>
    "tpu.trace_stop"() : () -> ()
    %76 = arith.addf %75, %2 : vector<2x8x8xf32>
    %cst_30 = arith.constant dense<0xFF800000> : vector<2x8xf32>
    %77 = vector.multi_reduction <maximumf>, %76, %cst_30 [2] : vector<2x8x8xf32> to vector<2x8xf32>
    %78 = vector.shape_cast %77 : vector<2x8xf32> to vector<2x8x1xf32>
    %79 = vector.broadcast %78 : vector<2x8x1xf32> to vector<2x8x8xf32>
    %80 = arith.subf %76, %79 : vector<2x8x8xf32>
    %81 = math.exp %80 : vector<2x8x8xf32>
    %cst_31 = arith.constant dense<0.000000e+00> : vector<2x8xf32>
    %82 = vector.multi_reduction <add>, %81, %cst_31 [2] : vector<2x8x8xf32> to vector<2x8xf32>
    %83 = vector.shape_cast %82 : vector<2x8xf32> to vector<2x8x1xf32>
    %84 = tpu.reciprocal %83 {approx = true} : vector<2x8x1xf32> -> vector<2x8x1xf32>
    %85 = vector.broadcast %84 : vector<2x8x1xf32> to vector<2x8x8xf32>
    %86 = arith.mulf %81, %85 : vector<2x8x8xf32>
    "tpu.trace_start"() <{level = 10 : i32, message = "bqk,bkd->bqd"}> : () -> ()
    %cst_32 = arith.constant dense<0.000000e+00> : vector<2x8x8xf32>
    %87 = tpu.matmul %86, %74, %cst_32 {dimension_numbers = #tpu.dot_dimension_numbers<[2], [1], [1], [2], [0, 0, 0, 1, 1, 2], [0], [0]>} : vector<2x8x8xf32>, vector<2x8x8xf32>, vector<2x8x8xf32> -> vector<2x8x8xf32>
    "tpu.trace_stop"() : () -> ()
    %88 = vector.extract_strided_slice %47 {offsets = [0, 0, 16], sizes = [2, 8, 8], strides = [1, 1, 1]} : vector<2x8x32xf32> to vector<2x8x8xf32>
    %89 = vector.extract_strided_slice %51 {offsets = [0, 0, 16], sizes = [2, 8, 8], strides = [1, 1, 1]} : vector<2x8x32xf32> to vector<2x8x8xf32>
    %90 = vector.extract_strided_slice %55 {offsets = [0, 0, 16], sizes = [2, 8, 8], strides = [1, 1, 1]} : vector<2x8x32xf32> to vector<2x8x8xf32>
    "tpu.trace_start"() <{level = 10 : i32, message = "bqd,bkd->bqk"}> : () -> ()
    %cst_33 = arith.constant dense<0.000000e+00> : vector<2x8x8xf32>
    %91 = tpu.matmul %88, %89, %cst_33 {dimension_numbers = #tpu.dot_dimension_numbers<[2], [2], [1], [1], [0, 0, 0, 1, 1, 1], [0], [0]>} : vector<2x8x8xf32>, vector<2x8x8xf32>, vector<2x8x8xf32> -> vector<2x8x8xf32>
    "tpu.trace_stop"() : () -> ()
    %92 = arith.addf %91, %2 : vector<2x8x8xf32>
    %cst_34 = arith.constant dense<0xFF800000> : vector<2x8xf32>
    %93 = vector.multi_reduction <maximumf>, %92, %cst_34 [2] : vector<2x8x8xf32> to vector<2x8xf32>
    %94 = vector.shape_cast %93 : vector<2x8xf32> to vector<2x8x1xf32>
    %95 = vector.broadcast %94 : vector<2x8x1xf32> to vector<2x8x8xf32>
    %96 = arith.subf %92, %95 : vector<2x8x8xf32>
    %97 = math.exp %96 : vector<2x8x8xf32>
    %cst_35 = arith.constant dense<0.000000e+00> : vector<2x8xf32>
    %98 = vector.multi_reduction <add>, %97, %cst_35 [2] : vector<2x8x8xf32> to vector<2x8xf32>
    %99 = vector.shape_cast %98 : vector<2x8xf32> to vector<2x8x1xf32>
    %100 = tpu.reciprocal %99 {approx = true} : vector<2x8x1xf32> -> vector<2x8x1xf32>
    %101 = vector.broadcast %100 : vector<2x8x1xf32> to vector<2x8x8xf32>
    %102 = arith.mulf %97, %101 : vector<2x8x8xf32>
    "tpu.trace_start"() <{level = 10 : i32, message = "bqk,bkd->bqd"}> : () -> ()
    %cst_36 = arith.constant dense<0.000000e+00> : vector<2x8x8xf32>
    %103 = tpu.matmul %102, %90, %cst_36 {dimension_numbers = #tpu.dot_dimension_numbers<[2], [1], [1], [2], [0, 0, 0, 1, 1, 2], [0], [0]>} : vector<2x8x8xf32>, vector<2x8x8xf32>, vector<2x8x8xf32> -> vector<2x8x8xf32>
    "tpu.trace_stop"() : () -> ()
    %104 = vector.extract_strided_slice %47 {offsets = [0, 0, 24], sizes = [2, 8, 8], strides = [1, 1, 1]} : vector<2x8x32xf32> to vector<2x8x8xf32>
    %105 = vector.extract_strided_slice %51 {offsets = [0, 0, 24], sizes = [2, 8, 8], strides = [1, 1, 1]} : vector<2x8x32xf32> to vector<2x8x8xf32>
    %106 = vector.extract_strided_slice %55 {offsets = [0, 0, 24], sizes = [2, 8, 8], strides = [1, 1, 1]} : vector<2x8x32xf32> to vector<2x8x8xf32>
    "tpu.trace_start"() <{level = 10 : i32, message = "bqd,bkd->bqk"}> : () -> ()
    %cst_37 = arith.constant dense<0.000000e+00> : vector<2x8x8xf32>
    %107 = tpu.matmul %104, %105, %cst_37 {dimension_numbers = #tpu.dot_dimension_numbers<[2], [2], [1], [1], [0, 0, 0, 1, 1, 1], [0], [0]>} : vector<2x8x8xf32>, vector<2x8x8xf32>, vector<2x8x8xf32> -> vector<2x8x8xf32>
    "tpu.trace_stop"() : () -> ()
    %108 = arith.addf %107, %2 : vector<2x8x8xf32>
    %cst_38 = arith.constant dense<0xFF800000> : vector<2x8xf32>
    %109 = vector.multi_reduction <maximumf>, %108, %cst_38 [2] : vector<2x8x8xf32> to vector<2x8xf32>
    %110 = vector.shape_cast %109 : vector<2x8xf32> to vector<2x8x1xf32>
    %111 = vector.broadcast %110 : vector<2x8x1xf32> to vector<2x8x8xf32>
    %112 = arith.subf %108, %111 : vector<2x8x8xf32>
    %113 = math.exp %112 : vector<2x8x8xf32>
    %cst_39 = arith.constant dense<0.000000e+00> : vector<2x8xf32>
    %114 = vector.multi_reduction <add>, %113, %cst_39 [2] : vector<2x8x8xf32> to vector<2x8xf32>
    %115 = vector.shape_cast %114 : vector<2x8xf32> to vector<2x8x1xf32>
    %116 = tpu.reciprocal %115 {approx = true} : vector<2x8x1xf32> -> vector<2x8x1xf32>
    %117 = vector.broadcast %116 : vector<2x8x1xf32> to vector<2x8x8xf32>
    %118 = arith.mulf %113, %117 : vector<2x8x8xf32>
    "tpu.trace_start"() <{level = 10 : i32, message = "bqk,bkd->bqd"}> : () -> ()
    %cst_40 = arith.constant dense<0.000000e+00> : vector<2x8x8xf32>
    %119 = tpu.matmul %118, %106, %cst_40 {dimension_numbers = #tpu.dot_dimension_numbers<[2], [1], [1], [2], [0, 0, 0, 1, 1, 2], [0], [0]>} : vector<2x8x8xf32>, vector<2x8x8xf32>, vector<2x8x8xf32> -> vector<2x8x8xf32>
    "tpu.trace_stop"() : () -> ()
    %120 = tpu.concatenate %71, %87, %103, %119 in 2 : vector<2x8x8xf32>, vector<2x8x8xf32>, vector<2x8x8xf32>, vector<2x8x8xf32> -> vector<2x8x32xf32>
    %121 = vector.shape_cast %120 : vector<2x8x32xf32> to vector<16x32xf32>
    %c0_41 = arith.constant 0 : index
    %c0_42 = arith.constant 0 : index
    %c0_43 = arith.constant 0 : index
    %122 = vector.load %arg5[%c0_41, %c0_42, %c0_43] : memref<2x32x32xf32, #tpu.memory_space<vmem>>, vector<1x32x32xf32>
    %123 = vector.shape_cast %122 : vector<1x32x32xf32> to vector<32x32xf32>
    %cst_44 = arith.constant dense<0.000000e+00> : vector<16x32xf32>
    %124 = tpu.matmul %121, %123, %cst_44 {dimension_numbers = #tpu.dot_dimension_numbers<[1], [0], [0], [1], [0, 0, 1, 1], [], []>} : vector<16x32xf32>, vector<32x32xf32>, vector<16x32xf32> -> vector<16x32xf32>
    %125 = arith.addf %11, %124 : vector<16x32xf32>
    %126 = vector.broadcast %17 : vector<1x32xf32> to vector<16x32xf32>
    %127 = arith.addf %125, %126 : vector<16x32xf32>
    %cst_45 = arith.constant dense<0.000000e+00> : vector<16xf32>
    %128 = vector.multi_reduction <add>, %127, %cst_45 [1] : vector<16x32xf32> to vector<16xf32>
    %129 = vector.shape_cast %128 : vector<16xf32> to vector<16x1xf32>
    %cst_46 = arith.constant 3.200000e+01 : f32
    %130 = vector.broadcast %cst_46 : f32 to vector<16x1xf32>
    %131 = arith.divf %129, %130 : vector<16x1xf32>
    %132 = vector.broadcast %131 : vector<16x1xf32> to vector<16x32xf32>
    %133 = arith.subf %127, %132 : vector<16x32xf32>
    %134 = arith.mulf %133, %133 : vector<16x32xf32>
    %cst_47 = arith.constant dense<0.000000e+00> : vector<16xf32>
    %135 = vector.multi_reduction <add>, %134, %cst_47 [1] : vector<16x32xf32> to vector<16xf32>
    %136 = vector.shape_cast %135 : vector<16xf32> to vector<16x1xf32>
    %cst_48 = arith.constant 3.100000e+01 : f32
    %137 = vector.broadcast %cst_48 : f32 to vector<16x1xf32>
    %138 = arith.divf %136, %137 : vector<16x1xf32>
    %139 = math.sqrt %138 : vector<16x1xf32>
    %140 = vector.broadcast %18 : vector<1x32xf32> to vector<16x32xf32>
    %141 = arith.mulf %140, %133 : vector<16x32xf32>
    %cst_49 = arith.constant 9.99999997E-7 : f32
    %142 = vector.broadcast %cst_49 : f32 to vector<16x1xf32>
    %143 = arith.addf %139, %142 : vector<16x1xf32>
    %144 = vector.broadcast %143 : vector<16x1xf32> to vector<16x32xf32>
    %145 = arith.divf %141, %144 : vector<16x32xf32>
    %146 = vector.broadcast %19 : vector<1x32xf32> to vector<16x32xf32>
    %147 = arith.addf %145, %146 : vector<16x32xf32>
    %148 = arith.truncf %147 : vector<16x32xf32> to vector<16x32xbf16>
    %c0_50 = arith.constant 0 : index
    %c0_51 = arith.constant 0 : index
    %c0_52 = arith.constant 0 : index
    %149 = vector.load %arg6[%c0_50, %c0_51, %c0_52] : memref<2x32x2048xbf16, #tpu.memory_space<vmem>>, vector<1x32x2048xbf16>
    %150 = vector.shape_cast %149 : vector<1x32x2048xbf16> to vector<32x2048xbf16>
    %cst_53 = arith.constant dense<0.000000e+00> : vector<16x2048xf32>
    %151 = tpu.matmul %148, %150, %cst_53 {dimension_numbers = #tpu.dot_dimension_numbers<[1], [0], [0], [1], [0, 0, 1, 1], [], []>} : vector<16x32xbf16>, vector<32x2048xbf16>, vector<16x2048xf32> -> vector<16x2048xf32>
    %152 = arith.truncf %151 : vector<16x2048xf32> to vector<16x2048xbf16>
    %c0_54 = arith.constant 0 : index
    %c0_55 = arith.constant 0 : index
    %153 = vector.load %arg7[%c0_54, %c0_55] : memref<2x2048xbf16, #tpu.memory_space<vmem>>, vector<1x2048xbf16>
    %154 = vector.broadcast %153 : vector<1x2048xbf16> to vector<16x2048xbf16>
    %155 = arith.addf %152, %154 : vector<16x2048xbf16>
    %cst_56 = arith.constant 0.000000e+00 : bf16
    %156 = vector.broadcast %cst_56 : bf16 to vector<16x2048xbf16>
    %157 = arith.maximumf %155, %156 : vector<16x2048xbf16>
    %c0_57 = arith.constant 0 : index
    %c0_58 = arith.constant 0 : index
    %c0_59 = arith.constant 0 : index
    %158 = vector.load %arg8[%c0_57, %c0_58, %c0_59] : memref<2x2048x32xbf16, #tpu.memory_space<vmem>>, vector<1x2048x32xbf16>
    %159 = vector.shape_cast %158 : vector<1x2048x32xbf16> to vector<2048x32xbf16>
    %cst_60 = arith.constant dense<0.000000e+00> : vector<16x32xf32>
    %160 = tpu.matmul %157, %159, %cst_60 {dimension_numbers = #tpu.dot_dimension_numbers<[1], [0], [0], [1], [0, 0, 1, 1], [], []>} : vector<16x2048xbf16>, vector<2048x32xbf16>, vector<16x32xf32> -> vector<16x32xf32>
    %161 = vector.broadcast %20 : vector<1x32xf32> to vector<16x32xf32>
    %162 = arith.addf %160, %161 : vector<16x32xf32>
    %163 = arith.addf %127, %162 : vector<16x32xf32>
    %c9 = arith.constant 9 : index
    %c0_61 = arith.constant 0 : index
    %164 = vector.load %arg3[%c9, %c0_61] : memref<20x32xf32, #tpu.memory_space<vmem>>, vector<1x32xf32>
    %c10 = arith.constant 10 : index
    %c0_62 = arith.constant 0 : index
    %165 = vector.load %arg3[%c10, %c0_62] : memref<20x32xf32, #tpu.memory_space<vmem>>, vector<1x32xf32>
    %c11 = arith.constant 11 : index
    %c0_63 = arith.constant 0 : index
    %166 = vector.load %arg3[%c11, %c0_63] : memref<20x32xf32, #tpu.memory_space<vmem>>, vector<1x32xf32>
    %c12 = arith.constant 12 : index
    %c0_64 = arith.constant 0 : index
    %167 = vector.load %arg3[%c12, %c0_64] : memref<20x32xf32, #tpu.memory_space<vmem>>, vector<1x32xf32>
    %c13 = arith.constant 13 : index
    %c0_65 = arith.constant 0 : index
    %168 = vector.load %arg3[%c13, %c0_65] : memref<20x32xf32, #tpu.memory_space<vmem>>, vector<1x32xf32>
    %c14 = arith.constant 14 : index
    %c0_66 = arith.constant 0 : index
    %169 = vector.load %arg3[%c14, %c0_66] : memref<20x32xf32, #tpu.memory_space<vmem>>, vector<1x32xf32>
    %c15 = arith.constant 15 : index
    %c0_67 = arith.constant 0 : index
    %170 = vector.load %arg3[%c15, %c0_67] : memref<20x32xf32, #tpu.memory_space<vmem>>, vector<1x32xf32>
    %c16 = arith.constant 16 : index
    %c0_68 = arith.constant 0 : index
    %171 = vector.load %arg3[%c16, %c0_68] : memref<20x32xf32, #tpu.memory_space<vmem>>, vector<1x32xf32>
    %c17 = arith.constant 17 : index
    %c0_69 = arith.constant 0 : index
    %172 = vector.load %arg3[%c17, %c0_69] : memref<20x32xf32, #tpu.memory_space<vmem>>, vector<1x32xf32>
    %cst_70 = arith.constant dense<0.000000e+00> : vector<16xf32>
    %173 = vector.multi_reduction <add>, %163, %cst_70 [1] : vector<16x32xf32> to vector<16xf32>
    %174 = vector.shape_cast %173 : vector<16xf32> to vector<16x1xf32>
    %cst_71 = arith.constant 3.200000e+01 : f32
    %175 = vector.broadcast %cst_71 : f32 to vector<16x1xf32>
    %176 = arith.divf %174, %175 : vector<16x1xf32>
    %177 = vector.broadcast %176 : vector<16x1xf32> to vector<16x32xf32>
    %178 = arith.subf %163, %177 : vector<16x32xf32>
    %179 = arith.mulf %178, %178 : vector<16x32xf32>
    %cst_72 = arith.constant dense<0.000000e+00> : vector<16xf32>
    %180 = vector.multi_reduction <add>, %179, %cst_72 [1] : vector<16x32xf32> to vector<16xf32>
    %181 = vector.shape_cast %180 : vector<16xf32> to vector<16x1xf32>
    %cst_73 = arith.constant 3.100000e+01 : f32
    %182 = vector.broadcast %cst_73 : f32 to vector<16x1xf32>
    %183 = arith.divf %181, %182 : vector<16x1xf32>
    %184 = math.sqrt %183 : vector<16x1xf32>
    %185 = vector.broadcast %164 : vector<1x32xf32> to vector<16x32xf32>
    %186 = arith.mulf %185, %178 : vector<16x32xf32>
    %cst_74 = arith.constant 9.99999997E-7 : f32
    %187 = vector.broadcast %cst_74 : f32 to vector<16x1xf32>
    %188 = arith.addf %184, %187 : vector<16x1xf32>
    %189 = vector.broadcast %188 : vector<16x1xf32> to vector<16x32xf32>
    %190 = arith.divf %186, %189 : vector<16x32xf32>
    %191 = vector.broadcast %165 : vector<1x32xf32> to vector<16x32xf32>
    %192 = arith.addf %190, %191 : vector<16x32xf32>
    %c1_75 = arith.constant 1 : index
    %c0_76 = arith.constant 0 : index
    %c0_77 = arith.constant 0 : index
    %193 = vector.load %arg4[%c1_75, %c0_76, %c0_77] : memref<2x32x96xf32, #tpu.memory_space<vmem>>, vector<1x32x96xf32>
    %194 = vector.shape_cast %193 : vector<1x32x96xf32> to vector<32x96xf32>
    %cst_78 = arith.constant dense<0.000000e+00> : vector<16x96xf32>
    %195 = tpu.matmul %192, %194, %cst_78 {dimension_numbers = #tpu.dot_dimension_numbers<[1], [0], [0], [1], [0, 0, 1, 1], [], []>} : vector<16x32xf32>, vector<32x96xf32>, vector<16x96xf32> -> vector<16x96xf32>
    %196 = vector.extract_strided_slice %195 {offsets = [0, 0], sizes = [16, 32], strides = [1, 1]} : vector<16x96xf32> to vector<16x32xf32>
    %197 = vector.broadcast %166 : vector<1x32xf32> to vector<16x32xf32>
    %198 = arith.addf %196, %197 : vector<16x32xf32>
    %199 = vector.shape_cast %198 : vector<16x32xf32> to vector<2x8x32xf32>
    %200 = vector.extract_strided_slice %195 {offsets = [0, 32], sizes = [16, 32], strides = [1, 1]} : vector<16x96xf32> to vector<16x32xf32>
    %201 = vector.broadcast %167 : vector<1x32xf32> to vector<16x32xf32>
    %202 = arith.addf %200, %201 : vector<16x32xf32>
    %203 = vector.shape_cast %202 : vector<16x32xf32> to vector<2x8x32xf32>
    %204 = vector.extract_strided_slice %195 {offsets = [0, 64], sizes = [16, 32], strides = [1, 1]} : vector<16x96xf32> to vector<16x32xf32>
    %205 = vector.broadcast %168 : vector<1x32xf32> to vector<16x32xf32>
    %206 = arith.addf %204, %205 : vector<16x32xf32>
    %207 = vector.shape_cast %206 : vector<16x32xf32> to vector<2x8x32xf32>
    %208 = vector.extract_strided_slice %199 {offsets = [0, 0, 0], sizes = [2, 8, 8], strides = [1, 1, 1]} : vector<2x8x32xf32> to vector<2x8x8xf32>
    %209 = vector.extract_strided_slice %203 {offsets = [0, 0, 0], sizes = [2, 8, 8], strides = [1, 1, 1]} : vector<2x8x32xf32> to vector<2x8x8xf32>
    %210 = vector.extract_strided_slice %207 {offsets = [0, 0, 0], sizes = [2, 8, 8], strides = [1, 1, 1]} : vector<2x8x32xf32> to vector<2x8x8xf32>
    "tpu.trace_start"() <{level = 10 : i32, message = "bqd,bkd->bqk"}> : () -> ()
    %cst_79 = arith.constant dense<0.000000e+00> : vector<2x8x8xf32>
    %211 = tpu.matmul %208, %209, %cst_79 {dimension_numbers = #tpu.dot_dimension_numbers<[2], [2], [1], [1], [0, 0, 0, 1, 1, 1], [0], [0]>} : vector<2x8x8xf32>, vector<2x8x8xf32>, vector<2x8x8xf32> -> vector<2x8x8xf32>
    "tpu.trace_stop"() : () -> ()
    %212 = arith.addf %211, %2 : vector<2x8x8xf32>
    %cst_80 = arith.constant dense<0xFF800000> : vector<2x8xf32>
    %213 = vector.multi_reduction <maximumf>, %212, %cst_80 [2] : vector<2x8x8xf32> to vector<2x8xf32>
    %214 = vector.shape_cast %213 : vector<2x8xf32> to vector<2x8x1xf32>
    %215 = vector.broadcast %214 : vector<2x8x1xf32> to vector<2x8x8xf32>
    %216 = arith.subf %212, %215 : vector<2x8x8xf32>
    %217 = math.exp %216 : vector<2x8x8xf32>
    %cst_81 = arith.constant dense<0.000000e+00> : vector<2x8xf32>
    %218 = vector.multi_reduction <add>, %217, %cst_81 [2] : vector<2x8x8xf32> to vector<2x8xf32>
    %219 = vector.shape_cast %218 : vector<2x8xf32> to vector<2x8x1xf32>
    %220 = tpu.reciprocal %219 {approx = true} : vector<2x8x1xf32> -> vector<2x8x1xf32>
    %221 = vector.broadcast %220 : vector<2x8x1xf32> to vector<2x8x8xf32>
    %222 = arith.mulf %217, %221 : vector<2x8x8xf32>
    "tpu.trace_start"() <{level = 10 : i32, message = "bqk,bkd->bqd"}> : () -> ()
    %cst_82 = arith.constant dense<0.000000e+00> : vector<2x8x8xf32>
    %223 = tpu.matmul %222, %210, %cst_82 {dimension_numbers = #tpu.dot_dimension_numbers<[2], [1], [1], [2], [0, 0, 0, 1, 1, 2], [0], [0]>} : vector<2x8x8xf32>, vector<2x8x8xf32>, vector<2x8x8xf32> -> vector<2x8x8xf32>
    "tpu.trace_stop"() : () -> ()
    %224 = vector.extract_strided_slice %199 {offsets = [0, 0, 8], sizes = [2, 8, 8], strides = [1, 1, 1]} : vector<2x8x32xf32> to vector<2x8x8xf32>
    %225 = vector.extract_strided_slice %203 {offsets = [0, 0, 8], sizes = [2, 8, 8], strides = [1, 1, 1]} : vector<2x8x32xf32> to vector<2x8x8xf32>
    %226 = vector.extract_strided_slice %207 {offsets = [0, 0, 8], sizes = [2, 8, 8], strides = [1, 1, 1]} : vector<2x8x32xf32> to vector<2x8x8xf32>
    "tpu.trace_start"() <{level = 10 : i32, message = "bqd,bkd->bqk"}> : () -> ()
    %cst_83 = arith.constant dense<0.000000e+00> : vector<2x8x8xf32>
    %227 = tpu.matmul %224, %225, %cst_83 {dimension_numbers = #tpu.dot_dimension_numbers<[2], [2], [1], [1], [0, 0, 0, 1, 1, 1], [0], [0]>} : vector<2x8x8xf32>, vector<2x8x8xf32>, vector<2x8x8xf32> -> vector<2x8x8xf32>
    "tpu.trace_stop"() : () -> ()
    %228 = arith.addf %227, %2 : vector<2x8x8xf32>
    %cst_84 = arith.constant dense<0xFF800000> : vector<2x8xf32>
    %229 = vector.multi_reduction <maximumf>, %228, %cst_84 [2] : vector<2x8x8xf32> to vector<2x8xf32>
    %230 = vector.shape_cast %229 : vector<2x8xf32> to vector<2x8x1xf32>
    %231 = vector.broadcast %230 : vector<2x8x1xf32> to vector<2x8x8xf32>
    %232 = arith.subf %228, %231 : vector<2x8x8xf32>
    %233 = math.exp %232 : vector<2x8x8xf32>
    %cst_85 = arith.constant dense<0.000000e+00> : vector<2x8xf32>
    %234 = vector.multi_reduction <add>, %233, %cst_85 [2] : vector<2x8x8xf32> to vector<2x8xf32>
    %235 = vector.shape_cast %234 : vector<2x8xf32> to vector<2x8x1xf32>
    %236 = tpu.reciprocal %235 {approx = true} : vector<2x8x1xf32> -> vector<2x8x1xf32>
    %237 = vector.broadcast %236 : vector<2x8x1xf32> to vector<2x8x8xf32>
    %238 = arith.mulf %233, %237 : vector<2x8x8xf32>
    "tpu.trace_start"() <{level = 10 : i32, message = "bqk,bkd->bqd"}> : () -> ()
    %cst_86 = arith.constant dense<0.000000e+00> : vector<2x8x8xf32>
    %239 = tpu.matmul %238, %226, %cst_86 {dimension_numbers = #tpu.dot_dimension_numbers<[2], [1], [1], [2], [0, 0, 0, 1, 1, 2], [0], [0]>} : vector<2x8x8xf32>, vector<2x8x8xf32>, vector<2x8x8xf32> -> vector<2x8x8xf32>
    "tpu.trace_stop"() : () -> ()
    %240 = vector.extract_strided_slice %199 {offsets = [0, 0, 16], sizes = [2, 8, 8], strides = [1, 1, 1]} : vector<2x8x32xf32> to vector<2x8x8xf32>
    %241 = vector.extract_strided_slice %203 {offsets = [0, 0, 16], sizes = [2, 8, 8], strides = [1, 1, 1]} : vector<2x8x32xf32> to vector<2x8x8xf32>
    %242 = vector.extract_strided_slice %207 {offsets = [0, 0, 16], sizes = [2, 8, 8], strides = [1, 1, 1]} : vector<2x8x32xf32> to vector<2x8x8xf32>
    "tpu.trace_start"() <{level = 10 : i32, message = "bqd,bkd->bqk"}> : () -> ()
    %cst_87 = arith.constant dense<0.000000e+00> : vector<2x8x8xf32>
    %243 = tpu.matmul %240, %241, %cst_87 {dimension_numbers = #tpu.dot_dimension_numbers<[2], [2], [1], [1], [0, 0, 0, 1, 1, 1], [0], [0]>} : vector<2x8x8xf32>, vector<2x8x8xf32>, vector<2x8x8xf32> -> vector<2x8x8xf32>
    "tpu.trace_stop"() : () -> ()
    %244 = arith.addf %243, %2 : vector<2x8x8xf32>
    %cst_88 = arith.constant dense<0xFF800000> : vector<2x8xf32>
    %245 = vector.multi_reduction <maximumf>, %244, %cst_88 [2] : vector<2x8x8xf32> to vector<2x8xf32>
    %246 = vector.shape_cast %245 : vector<2x8xf32> to vector<2x8x1xf32>
    %247 = vector.broadcast %246 : vector<2x8x1xf32> to vector<2x8x8xf32>
    %248 = arith.subf %244, %247 : vector<2x8x8xf32>
    %249 = math.exp %248 : vector<2x8x8xf32>
    %cst_89 = arith.constant dense<0.000000e+00> : vector<2x8xf32>
    %250 = vector.multi_reduction <add>, %249, %cst_89 [2] : vector<2x8x8xf32> to vector<2x8xf32>
    %251 = vector.shape_cast %250 : vector<2x8xf32> to vector<2x8x1xf32>
    %252 = tpu.reciprocal %251 {approx = true} : vector<2x8x1xf32> -> vector<2x8x1xf32>
    %253 = vector.broadcast %252 : vector<2x8x1xf32> to vector<2x8x8xf32>
    %254 = arith.mulf %249, %253 : vector<2x8x8xf32>
    "tpu.trace_start"() <{level = 10 : i32, message = "bqk,bkd->bqd"}> : () -> ()
    %cst_90 = arith.constant dense<0.000000e+00> : vector<2x8x8xf32>
    %255 = tpu.matmul %254, %242, %cst_90 {dimension_numbers = #tpu.dot_dimension_numbers<[2], [1], [1], [2], [0, 0, 0, 1, 1, 2], [0], [0]>} : vector<2x8x8xf32>, vector<2x8x8xf32>, vector<2x8x8xf32> -> vector<2x8x8xf32>
    "tpu.trace_stop"() : () -> ()
    %256 = vector.extract_strided_slice %199 {offsets = [0, 0, 24], sizes = [2, 8, 8], strides = [1, 1, 1]} : vector<2x8x32xf32> to vector<2x8x8xf32>
    %257 = vector.extract_strided_slice %203 {offsets = [0, 0, 24], sizes = [2, 8, 8], strides = [1, 1, 1]} : vector<2x8x32xf32> to vector<2x8x8xf32>
    %258 = vector.extract_strided_slice %207 {offsets = [0, 0, 24], sizes = [2, 8, 8], strides = [1, 1, 1]} : vector<2x8x32xf32> to vector<2x8x8xf32>
    "tpu.trace_start"() <{level = 10 : i32, message = "bqd,bkd->bqk"}> : () -> ()
    %cst_91 = arith.constant dense<0.000000e+00> : vector<2x8x8xf32>
    %259 = tpu.matmul %256, %257, %cst_91 {dimension_numbers = #tpu.dot_dimension_numbers<[2], [2], [1], [1], [0, 0, 0, 1, 1, 1], [0], [0]>} : vector<2x8x8xf32>, vector<2x8x8xf32>, vector<2x8x8xf32> -> vector<2x8x8xf32>
    "tpu.trace_stop"() : () -> ()
    %260 = arith.addf %259, %2 : vector<2x8x8xf32>
    %cst_92 = arith.constant dense<0xFF800000> : vector<2x8xf32>
    %261 = vector.multi_reduction <maximumf>, %260, %cst_92 [2] : vector<2x8x8xf32> to vector<2x8xf32>
    %262 = vector.shape_cast %261 : vector<2x8xf32> to vector<2x8x1xf32>
    %263 = vector.broadcast %262 : vector<2x8x1xf32> to vector<2x8x8xf32>
    %264 = arith.subf %260, %263 : vector<2x8x8xf32>
    %265 = math.exp %264 : vector<2x8x8xf32>
    %cst_93 = arith.constant dense<0.000000e+00> : vector<2x8xf32>
    %266 = vector.multi_reduction <add>, %265, %cst_93 [2] : vector<2x8x8xf32> to vector<2x8xf32>
    %267 = vector.shape_cast %266 : vector<2x8xf32> to vector<2x8x1xf32>
    %268 = tpu.reciprocal %267 {approx = true} : vector<2x8x1xf32> -> vector<2x8x1xf32>
    %269 = vector.broadcast %268 : vector<2x8x1xf32> to vector<2x8x8xf32>
    %270 = arith.mulf %265, %269 : vector<2x8x8xf32>
    "tpu.trace_start"() <{level = 10 : i32, message = "bqk,bkd->bqd"}> : () -> ()
    %cst_94 = arith.constant dense<0.000000e+00> : vector<2x8x8xf32>
    %271 = tpu.matmul %270, %258, %cst_94 {dimension_numbers = #tpu.dot_dimension_numbers<[2], [1], [1], [2], [0, 0, 0, 1, 1, 2], [0], [0]>} : vector<2x8x8xf32>, vector<2x8x8xf32>, vector<2x8x8xf32> -> vector<2x8x8xf32>
    "tpu.trace_stop"() : () -> ()
    %272 = tpu.concatenate %223, %239, %255, %271 in 2 : vector<2x8x8xf32>, vector<2x8x8xf32>, vector<2x8x8xf32>, vector<2x8x8xf32> -> vector<2x8x32xf32>
    %273 = vector.shape_cast %272 : vector<2x8x32xf32> to vector<16x32xf32>
    %c1_95 = arith.constant 1 : index
    %c0_96 = arith.constant 0 : index
    %c0_97 = arith.constant 0 : index
    %274 = vector.load %arg5[%c1_95, %c0_96, %c0_97] : memref<2x32x32xf32, #tpu.memory_space<vmem>>, vector<1x32x32xf32>
    %275 = vector.shape_cast %274 : vector<1x32x32xf32> to vector<32x32xf32>
    %cst_98 = arith.constant dense<0.000000e+00> : vector<16x32xf32>
    %276 = tpu.matmul %273, %275, %cst_98 {dimension_numbers = #tpu.dot_dimension_numbers<[1], [0], [0], [1], [0, 0, 1, 1], [], []>} : vector<16x32xf32>, vector<32x32xf32>, vector<16x32xf32> -> vector<16x32xf32>
    %277 = arith.addf %163, %276 : vector<16x32xf32>
    %278 = vector.broadcast %169 : vector<1x32xf32> to vector<16x32xf32>
    %279 = arith.addf %277, %278 : vector<16x32xf32>
    %cst_99 = arith.constant dense<0.000000e+00> : vector<16xf32>
    %280 = vector.multi_reduction <add>, %279, %cst_99 [1] : vector<16x32xf32> to vector<16xf32>
    %281 = vector.shape_cast %280 : vector<16xf32> to vector<16x1xf32>
    %cst_100 = arith.constant 3.200000e+01 : f32
    %282 = vector.broadcast %cst_100 : f32 to vector<16x1xf32>
    %283 = arith.divf %281, %282 : vector<16x1xf32>
    %284 = vector.broadcast %283 : vector<16x1xf32> to vector<16x32xf32>
    %285 = arith.subf %279, %284 : vector<16x32xf32>
    %286 = arith.mulf %285, %285 : vector<16x32xf32>
    %cst_101 = arith.constant dense<0.000000e+00> : vector<16xf32>
    %287 = vector.multi_reduction <add>, %286, %cst_101 [1] : vector<16x32xf32> to vector<16xf32>
    %288 = vector.shape_cast %287 : vector<16xf32> to vector<16x1xf32>
    %cst_102 = arith.constant 3.100000e+01 : f32
    %289 = vector.broadcast %cst_102 : f32 to vector<16x1xf32>
    %290 = arith.divf %288, %289 : vector<16x1xf32>
    %291 = math.sqrt %290 : vector<16x1xf32>
    %292 = vector.broadcast %170 : vector<1x32xf32> to vector<16x32xf32>
    %293 = arith.mulf %292, %285 : vector<16x32xf32>
    %cst_103 = arith.constant 9.99999997E-7 : f32
    %294 = vector.broadcast %cst_103 : f32 to vector<16x1xf32>
    %295 = arith.addf %291, %294 : vector<16x1xf32>
    %296 = vector.broadcast %295 : vector<16x1xf32> to vector<16x32xf32>
    %297 = arith.divf %293, %296 : vector<16x32xf32>
    %298 = vector.broadcast %171 : vector<1x32xf32> to vector<16x32xf32>
    %299 = arith.addf %297, %298 : vector<16x32xf32>
    %300 = arith.truncf %299 : vector<16x32xf32> to vector<16x32xbf16>
    %c1_104 = arith.constant 1 : index
    %c0_105 = arith.constant 0 : index
    %c0_106 = arith.constant 0 : index
    %301 = vector.load %arg6[%c1_104, %c0_105, %c0_106] : memref<2x32x2048xbf16, #tpu.memory_space<vmem>>, vector<1x32x2048xbf16>
    %302 = vector.shape_cast %301 : vector<1x32x2048xbf16> to vector<32x2048xbf16>
    %cst_107 = arith.constant dense<0.000000e+00> : vector<16x2048xf32>
    %303 = tpu.matmul %300, %302, %cst_107 {dimension_numbers = #tpu.dot_dimension_numbers<[1], [0], [0], [1], [0, 0, 1, 1], [], []>} : vector<16x32xbf16>, vector<32x2048xbf16>, vector<16x2048xf32> -> vector<16x2048xf32>
    %304 = arith.truncf %303 : vector<16x2048xf32> to vector<16x2048xbf16>
    %c1_108 = arith.constant 1 : index
    %c0_109 = arith.constant 0 : index
    %305 = vector.load %arg7[%c1_108, %c0_109] : memref<2x2048xbf16, #tpu.memory_space<vmem>>, vector<1x2048xbf16>
    %306 = vector.broadcast %305 : vector<1x2048xbf16> to vector<16x2048xbf16>
    %307 = arith.addf %304, %306 : vector<16x2048xbf16>
    %cst_110 = arith.constant 0.000000e+00 : bf16
    %308 = vector.broadcast %cst_110 : bf16 to vector<16x2048xbf16>
    %309 = arith.maximumf %307, %308 : vector<16x2048xbf16>
    %c1_111 = arith.constant 1 : index
    %c0_112 = arith.constant 0 : index
    %c0_113 = arith.constant 0 : index
    %310 = vector.load %arg8[%c1_111, %c0_112, %c0_113] : memref<2x2048x32xbf16, #tpu.memory_space<vmem>>, vector<1x2048x32xbf16>
    %311 = vector.shape_cast %310 : vector<1x2048x32xbf16> to vector<2048x32xbf16>
    %cst_114 = arith.constant dense<0.000000e+00> : vector<16x32xf32>
    %312 = tpu.matmul %309, %311, %cst_114 {dimension_numbers = #tpu.dot_dimension_numbers<[1], [0], [0], [1], [0, 0, 1, 1], [], []>} : vector<16x2048xbf16>, vector<2048x32xbf16>, vector<16x32xf32> -> vector<16x32xf32>
    %313 = vector.broadcast %172 : vector<1x32xf32> to vector<16x32xf32>
    %314 = arith.addf %312, %313 : vector<16x32xf32>
    %315 = arith.addf %279, %314 : vector<16x32xf32>
    %c18 = arith.constant 18 : index
    %c0_115 = arith.constant 0 : index
    %316 = vector.load %arg3[%c18, %c0_115] : memref<20x32xf32, #tpu.memory_space<vmem>>, vector<1x32xf32>
    %c19 = arith.constant 19 : index
    %c0_116 = arith.constant 0 : index
    %317 = vector.load %arg3[%c19, %c0_116] : memref<20x32xf32, #tpu.memory_space<vmem>>, vector<1x32xf32>
    %cst_117 = arith.constant dense<0.000000e+00> : vector<16xf32>
    %318 = vector.multi_reduction <add>, %315, %cst_117 [1] : vector<16x32xf32> to vector<16xf32>
    %319 = vector.shape_cast %318 : vector<16xf32> to vector<16x1xf32>
    %cst_118 = arith.constant 3.200000e+01 : f32
    %320 = vector.broadcast %cst_118 : f32 to vector<16x1xf32>
    %321 = arith.divf %319, %320 : vector<16x1xf32>
    %322 = vector.broadcast %321 : vector<16x1xf32> to vector<16x32xf32>
    %323 = arith.subf %315, %322 : vector<16x32xf32>
    %324 = arith.mulf %323, %323 : vector<16x32xf32>
    %cst_119 = arith.constant dense<0.000000e+00> : vector<16xf32>
    %325 = vector.multi_reduction <add>, %324, %cst_119 [1] : vector<16x32xf32> to vector<16xf32>
    %326 = vector.shape_cast %325 : vector<16xf32> to vector<16x1xf32>
    %cst_120 = arith.constant 3.100000e+01 : f32
    %327 = vector.broadcast %cst_120 : f32 to vector<16x1xf32>
    %328 = arith.divf %326, %327 : vector<16x1xf32>
    %329 = math.sqrt %328 : vector<16x1xf32>
    %330 = vector.broadcast %316 : vector<1x32xf32> to vector<16x32xf32>
    %331 = arith.mulf %330, %323 : vector<16x32xf32>
    %cst_121 = arith.constant 9.99999997E-7 : f32
    %332 = vector.broadcast %cst_121 : f32 to vector<16x1xf32>
    %333 = arith.addf %329, %332 : vector<16x1xf32>
    %334 = vector.broadcast %333 : vector<16x1xf32> to vector<16x32xf32>
    %335 = arith.divf %331, %334 : vector<16x32xf32>
    %336 = vector.broadcast %317 : vector<1x32xf32> to vector<16x32xf32>
    %337 = arith.addf %335, %336 : vector<16x32xf32>
    %c0_122 = arith.constant 0 : index
    %c0_123 = arith.constant 0 : index
    %338 = vector.load %arg9[%c0_122, %c0_123] : memref<16x32xf32, #tpu.memory_space<vmem>>, vector<16x32xf32>
    tpu.vector_store %arg9[%c0_122, %c0_123], %337 {strides = array<i32>} : memref<16x32xf32, #tpu.memory_space<vmem>>, vector<16x32xf32>,
    return
  }
}

</mosaic_0001>

<bundles_post_ra>
// kernel: tpu_custom_call.1
= control target key start
LH: loop header
LB: loop body
LE: loop exit
PB: predicated region body
PF: predicated region fallthrough
CT: control target
= control target key end

     0   :  { %vm64_vm0 = vcmask 261120   ;;  %s11464_s0 = inlined_call_operand.vmem [shape: f32[16,32], index: 0, kind: input, shape index: {}]   ;;  %s11465_s1 = inlined_call_operand.vmem [shape: f32[8,32], index: 1, kind: input, shape index: {}]   ;;  %s11466_s2 = inlined_call_operand.vmem [shape: f32[2,1,8], index: 2, kind: input, shape index: {}]   ;;  %s11467_s3 = inlined_call_operand.vmem [shape: f32[20,32], index: 3, kind: input, shape index: {}]   ;;  %s11468_s4 = inlined_call_operand.vmem [shape: f32[2,32,96], index: 4, kind: input, shape index: {}]   ;;  %s11469_s5 = inlined_call_operand.vmem [shape: f32[2,32,32], index: 5, kind: input, shape index: {}]   ;;  %s11470_s6 = inlined_call_operand.vmem [shape: bf16[2,32,2048], index: 6, kind: input, shape index: {}]   ;;  %s11471_s7 = inlined_call_operand.vmem [shape: bf16[2,2048], index: 7, kind: input, shape index: {}]   ;;  %s11472_s8 = inlined_call_operand.vmem [shape: bf16[2,2048,32], index: 8, kind: input, shape index: {}]   ;;  %s11473_s9 = inlined_call_operand.hbm [shape: f32[16,32], index: 9, kind: output, shape index: {}]  }
   0x1   :  { %v48_v0 = vld [vmem:[%s11464_s0] sm:$0xff]  ;;  %v49_v2 = vld [vmem:[%s11464_s0 + $0x8] sm:$0xff] }
   0x2   :  { %v52_v1 = vld [vmem:[%s11465_s1] sm:$0xff]  ;;  %v50_v3 = vmul.f32 5.656854, %v48_v0  ;;  %v51_v4 = vmul.f32 5.656854, %v49_v2 }
   0x4   :  { %v9654_v5 = vadd.f32 %v52_v1, %v50_v3  ;;  %v9656_v6 = vadd.f32 %v52_v1, %v51_v4 }
   0x6   :  { %v65_v7 = vsel %vm64_vm0, %v9654_v5, 0.0  ;;  %v68_v8 = vsel %vm64_vm0, %v9656_v6, 0.0 }
   0x7   :  { %66 = vadd.xlane.f32.xlu0 %v65_v7 }
   0xb   :  { %69 = vadd.xlane.f32.xlu0 %v68_v8 }
  0x90   :  { %v67_v9 = vpop.xlane.xlu0 %66 }
  0x91   :  { %v72_v10 = vmul.f32 0.03125, %v67_v9 }
  0x93   :  { %v74_v11 = vsub.f32 %v9654_v5, %v72_v10 }
  0x94   :  { %v70_v12 = vpop.xlane.xlu0 %69 }
  0x95   :  { %v73_v13 = vmul.f32 0.03125, %v70_v12  ;;  %v76_v14 = vmul.f32 %v74_v11, %v74_v11 }
  0x97   :  { %v75_v15 = vsub.f32 %v9656_v6, %v73_v13  ;;  %v78_v16 = vsel %vm64_vm0, %v76_v14, 0.0 }
  0x98   :  { %79 = vadd.xlane.f32.xlu1 %v78_v16 }
  0x99   :  { %v77_v17 = vmul.f32 %v75_v15, %v75_v15 }
  0x9b   :  { %v81_v18 = vsel %vm64_vm0, %v77_v17, 0.0 }
  0x9c   :  { %82 = vadd.xlane.f32.xlu1 %v81_v18 }
  0x9d   :  { %14 = vsyncpa [#allocation3], 0  ;;  %v122_v19 = vld [vmem:[%s11468_s4 + $0x18] sm:$0xff]  ;;  %v121_v20 = vld [vmem:[%s11468_s4 + $0x10] sm:$0xff]  ;;  %s9574_s23 = smov 32   ;;  %v9575_v50 = vmov 0.0  }
  0x9e   :  { %8961 = vmatprep.subr.mxu0 %v122_v19  ;;  %v120_v21 = vld [vmem:[%s11468_s4 + $0x8] sm:$0xff]  ;;  %v119_v22 = vld [vmem:[%s11468_s4] sm:$0xff]  ;;  %8972 = vmatprep.subr.mxu1 %v9575_v50  ;;  %vm9576_vm5 = vmmov 0   ;;  %s9577_s28 = smov 96   ;;  %vm233_vm6 = vcmask 64512   ;;  %s9578_s1 = smov 64  }
  0x9f   :  { %8962 = vmatpush3.msra.mxu0 %v122_v19  ;;  %v7818_v23 = vld [vmem:[%s11467_s3 + $0x3] ss:$0 sm:$0xff]  ;;  %v7813_v40 = vld [vmem:[%s11467_s3] ss:$0 sm:$0xff]  ;;  %v7814_v43 = vld [vmem:[%s11467_s3 + $0x1] ss:$0 sm:$0xff]  ;;  %8974 = vmatprep.mubr.msk.f32.mxu1 %vm9576_vm5, %v9575_v50 }
  0xa0   :  { %8963 = vmatprep.subr.mxu0 %v121_v20  ;;  %215 = vrot.lane.b32.xlu0 %v7818_v23, %s9574_s23  ;;  %v105_v41 = vmul.f32 %v7813_v40, %v74_v11  ;;  %v106_v45 = vmul.f32 %v7813_v40, %v75_v15  ;;  %v7817_v57 = vld [vmem:[%s11467_s3 + $0x2] ss:$0 sm:$0xff]  ;;  %v9726_v61 = vld [vmem:[%s11466_s2] ss:$0 sm:$0xff]  ;;  %v9732_v1 = vld [vmem:[%s11466_s2 + $0x1] ss:$0 sm:$0xff] }
  0xa1   :  { %8964 = vmatpush3.msra.mxu0 %v121_v20  ;;  %v7819_v9 = vld [vmem:[%s11467_s3 + $0x4] ss:$0 sm:$0xff]  ;;  %s9579_s15 = smov 88   ;;  %s9580_s16 = smov 120   ;;  %vm1582_vm7 = vcmask 195584   ;;  %vm1579_vm8 = vcmask 130048  }
  0xa2   :  { %8965 = vmatprep.subr.mxu0 %v120_v21  ;;  %s9581_s17 = smov 56   ;;  %s9582_s18 = smov 80  }
  0xa3   :  { %8966 = vmatpush3.msra.mxu0 %v120_v21  ;;  %s9583_s19 = smov 112   ;;  %s9584_s20 = smov 48  }
  0xa4   :  { %8967 = vmatprep.subr.mxu0 %v119_v22  ;;  %s9585_s21 = smov 72   ;;  %s9586_s22 = smov 104  }
  0xa5   :  { %8968 = vmatpush3.msra.mxu0 %v119_v22  ;;  %s9587_s24 = smov 40   ;;  %s9588_s25 = smov 8  }
  0xa6   :  { %8982 = vmatprep.subr.mxu0 %v9575_v50  ;;  %s11476_s26 = smov 16   ;;  %s11474_s0 = smov 24  }
 0x112   :  { %v216_v52 = vpop.permute.xlu0 %215 }
 0x121   :  { %v80_v24 = vpop.xlane.xlu1 %79 }
 0x122   :  { %v85_v25 = vmul.f32 0.032258064, %v80_v24 }
 0x124   :  { %9446 = vrsqrt.f32 %v85_v25  ;;  %vm89_vm1 = vcmp.eq.f32.partialorder %v85_v25, inf  ;;  %v92_v30 = vand.u32 2147483648, %v85_v25  ;;  %vm91_vm2 = vcmp.eq.f32.partialorder %v85_v25, 0.0 }
 0x125   :  { %v83_v26 = vpop.xlane.xlu1 %82 }
 0x126   :  { %v86_v27 = vmul.f32 0.032258064, %v83_v26 }
 0x128   :  { %9448 = vrsqrt.f32 %v86_v27  ;;  %vm96_vm3 = vcmp.eq.f32.partialorder %v86_v27, inf  ;;  %v99_v36 = vand.u32 2147483648, %v86_v27  ;;  %vm98_vm4 = vcmp.eq.f32.partialorder %v86_v27, 0.0 }
 0x131   :  { %v9447_v28 = vpop.eup %9446 }
 0x132   :  { %v88_v29 = vmul.f32 %v9447_v28, %v85_v25 }
 0x134   :  { %v90_v31 = vsel %vm89_vm1, %v85_v25, %v88_v29 }
 0x135   :  { %v9449_v32 = vpop.eup %9448  ;;  %v93_v33 = vsel %vm91_vm2, %v92_v30, %v90_v31 }
 0x136   :  { %v95_v34 = vmul.f32 %v9449_v32, %v86_v27  ;;  %v107_v35 = vadd.f32 1e-06, %v93_v33 }
 0x138   :  { %v97_v37 = vsel %vm96_vm3, %v86_v27, %v95_v34  ;;  %9450 = vrcp.f32 %v107_v35 }
 0x139   :  { %v100_v38 = vsel %vm98_vm4, %v99_v36, %v97_v37 }
 0x13a   :  { %v108_v39 = vadd.f32 1e-06, %v100_v38 }
 0x13c   :  { %9452 = vrcp.f32 %v108_v39 }
 0x145   :  { %v9451_v42 = vpop.eup %9450 }
 0x146   :  { %v110_v44 = vmul.f32 %v9451_v42, %v105_v41 }
 0x148   :  { %v117_v46 = vadd.f32 %v7814_v43, %v110_v44 }
 0x149   :  { %v9453_v47 = vpop.eup %9452 }
 0x14a   :  { %v112_v48 = vmul.f32 %v9453_v47, %v106_v45  ;;  %8969 = vmatprep.mubr.msk.f32.mxu0 %vm64_vm0, %v117_v46 }
 0x14c   :  { %v118_v49 = vadd.f32 %v7814_v43, %v112_v48 }
 0x14e   :  { %8970 = vmatmul.mubr.msk.f32.vlgmr.msra.gmra.mxu0 %vm64_vm0, %v118_v49 }
 0x14f   :  { %8984 = vmatprep.mubr.msk.f32.mxu0 %vm9576_vm5, %v9575_v50 }
 0x20e   :  { %v8971_v51 = vpop.f32.mrf.mxu0 }
 0x20f   :  { %v9700_v55 = vadd.f32 %v8971_v51, %v216_v52  ;;  %v9716_v60 = vadd.f32 %v8971_v51, %v7817_v57 }
 0x210   :  { %v195_v53 = vpop.f32.mrf.mxu0 }
 0x211   :  { %v9696_v54 = vadd.f32 %v216_v52, %v195_v53  ;;  %v9708_v58 = vadd.f32 %v7817_v57, %v195_v53 }
 0x213   :  { %231 = vrot.lane.b32.xlu1 %v9696_v54, %s9577_s28 }
 0x217   :  { %310 = vrot.lane.b32.xlu1 %v9700_v55, %s9577_s28 }
 0x285   :  { %v232_v56 = vpop.permute.xlu1 %231 }
 0x286   :  { %8973 = vmatpush3.xpose.msk.msra.mxu1 %vm233_vm6, %v232_v56 }
 0x287   :  { %8977 = vmatprep.subr.mxu1 %v9575_v50 }
 0x289   :  { %8975 = vmatmul.mubr.msk.f32.vlgmr.msra.gmra.mxu1 %vm233_vm6, %v9708_v58  ;;  %v311_v59 = vpop.permute.xlu1 %310 }
 0x28a   :  { %8978 = vmatpush3.xpose.msk.msra.mxu1 %vm233_vm6, %v311_v59  ;;  %8979 = vmatprep.mubr.msk.f32.mxu1 %vm9576_vm5, %v9575_v50 }
 0x28b   :  { %8987 = vmatprep.subr.mxu1 %v9575_v50 }
 0x28d   :  { %8980 = vmatmul.mubr.msk.f32.vlgmr.msra.gmra.mxu1 %vm233_vm6, %v9716_v60 }
 0x28e   :  { %8989 = vmatprep.mubr.msk.f32.mxu1 %vm9576_vm5, %v9575_v50 }
 0x349   :  { %v305_v62 = vpop.f32.mrf.mxu1 }
 0x34a   :  { %v306_v63 = vadd.f32 %v9726_v61, %v305_v62 }
 0x34b   :  { %v8976_v0 = vpop.f32.mrf.mxu1 }
 0x34c   :  { %v387_v2 = vsel %vm233_vm6, %v306_v63, -inf }
 0x34d   :  { %v383_v3 = vpop.f32.mrf.mxu1  ;;  %388 = vmax.xlane.f32.xlu1 %v387_v2 }
 0x34e   :  { %v384_v4 = vadd.f32 %v9732_v1, %v383_v3 }
 0x34f   :  { %v8981_v7 = vpop.f32.mrf.mxu1 }
 0x350   :  { %v390_v8 = vsel %vm233_vm6, %v384_v4, -inf }
 0x351   :  { %391 = vmax.xlane.f32.xlu0 %v390_v8 }
 0x367   :  { %225 = vrot.lane.b32.xlu0 %v7819_v9, %s9578_s1 }
 0x3d6   :  { %v389_v14 = vpop.xlane.xlu1 %388 }
 0x3d7   :  { %v393_v15 = vsub.f32 %v306_v63, %v389_v14 }
 0x3d9   :  { %v395_v16 = vmul.f32 1.442695, %v393_v15 }
 0x3da   :  { %v392_v10 = vpop.xlane.xlu0 %391 }
 0x3db   :  { %v394_v17 = vsub.f32 %v384_v4, %v392_v10  ;;  %9454 = vpow2.f32 %v395_v16 }
 0x3dd   :  { %v397_v18 = vmul.f32 1.442695, %v394_v17 }
 0x3de   :  { %v226_v11 = vpop.permute.xlu0 %225 }
 0x3df   :  { %v9741_v12 = vadd.f32 %v226_v11, %v195_v53  ;;  %v9743_v13 = vadd.f32 %v8971_v51, %v226_v11  ;;  %9456 = vpow2.f32 %v397_v18 }
 0x3e1   :  { %487 = vrot.lane.b32.xlu0 %v9743_v13, %s9578_s1  ;;  %410 = vrot.lane.b32.xlu1 %v9741_v12, %s9578_s1 }
 0x3e5   :  { %565 = vrot.lane.b32.xlu0 %v9696_v54, %s9579_s15  ;;  %643 = vrot.lane.b32.xlu1 %v9700_v55, %s9579_s15 }
 0x3e8   :  { %v9455_v19 = vpop.eup %9454 }
 0x3e9   :  { %563 = vrot.lane.b32.xlu0 %v9708_v58, %s9580_s16  ;;  %v399_v20 = vsel %vm233_vm6, %v9455_v19, 0.0 }
 0x3ec   :  { %v9457_v21 = vpop.eup %9456 }
 0x3ed   :  { %v402_v22 = vsel %vm233_vm6, %v9457_v21, 0.0 }
 0x409   :  { %400 = vadd.xlane.f32.xlu1 %v399_v20 }
 0x40d   :  { %403 = vadd.xlane.f32.xlu1 %v402_v22 }
 0x41e   :  { %641 = vrot.lane.b32.xlu1 %v9716_v60, %s9580_s16 }
 0x453   :  { %v488_v23 = vpop.permute.xlu0 %487  ;;  %v411_v24 = vpop.permute.xlu1 %410 }
 0x454   :  { %8983 = vmatpush3.msra.mxu0 %v411_v24  ;;  %8988 = vmatpush3.msra.mxu1 %v488_v23 }
 0x455   :  { %8992 = vmatprep.subr.mxu0 %v9575_v50  ;;  %8997 = vmatprep.subr.mxu1 %v9575_v50 }
 0x457   :  { %v644_v25 = vpop.permute.xlu1 %643  ;;  %v566_v29 = vpop.permute.xlu0 %565 }
 0x45b   :  { %v564_v33 = vpop.permute.xlu0 %563 }
 0x492   :  { %v401_v26 = vpop.xlane.xlu1 %400 }
 0x493   :  { %9458 = vrcp.f32 %v401_v26 }
 0x496   :  { %v404_v27 = vpop.xlane.xlu1 %403 }
 0x497   :  { %9460 = vrcp.f32 %v404_v27 }
 0x49a   :  { %v642_v34 = vpop.permute.xlu1 %641 }
 0x4a0   :  { %v9459_v28 = vpop.eup %9458 }
 0x4a1   :  { %v407_v30 = vmul.f32 %v9459_v28, %v9455_v19 }
 0x4a3   :  { %8985 = vmatmul.mubr.msk.f32.vlgmr.msra.gmra.mxu0 %vm233_vm6, %v407_v30 }
 0x4a4   :  { %v9461_v31 = vpop.eup %9460  ;;  %8993 = vmatpush3.xpose.msk.msra.mxu0 %vm233_vm6, %v566_v29  ;;  %8994 = vmatprep.mubr.msk.f32.mxu0 %vm9576_vm5, %v9575_v50 }
 0x4a5   :  { %v408_v32 = vmul.f32 %v9461_v31, %v9457_v21  ;;  %9002 = vmatprep.subr.mxu0 %v9575_v50 }
 0x4a7   :  { %8990 = vmatmul.mubr.msk.f32.vlgmr.msra.gmra.mxu1 %vm233_vm6, %v408_v32  ;;  %8995 = vmatmul.mubr.msk.f32.vlgmr.msra.gmra.mxu0 %vm233_vm6, %v564_v33 }
 0x4a8   :  { %8998 = vmatpush3.xpose.msk.msra.mxu1 %vm233_vm6, %v644_v25  ;;  %8999 = vmatprep.mubr.msk.f32.mxu1 %vm9576_vm5, %v9575_v50 }
 0x4a9   :  { %9007 = vmatprep.subr.mxu1 %v9575_v50  ;;  %9004 = vmatprep.mubr.msk.f32.mxu0 %vm9576_vm5, %v9575_v50 }
 0x4ab   :  { %9000 = vmatmul.mubr.msk.f32.vlgmr.msra.gmra.mxu1 %vm233_vm6, %v642_v34 }
 0x4ac   :  { %9009 = vmatprep.mubr.msk.f32.mxu1 %vm9576_vm5, %v9575_v50 }
 0x563   :  { %v9777_v35 = vpop.f32.mrf.mxu0 }
 0x565   :  { %v8986_v36 = vpop.f32.mrf.mxu0 }
 0x567   :  { %v9779_v37 = vpop.f32.mrf.mxu1  ;;  %v637_v38 = vpop.f32.mrf.mxu0 }
 0x568   :  { %v638_v39 = vadd.f32 %v9726_v61, %v637_v38 }
 0x569   :  { %v8991_v40 = vpop.f32.mrf.mxu1  ;;  %v8996_v41 = vpop.f32.mrf.mxu0 }
 0x56a   :  { %v719_v42 = vsel %vm233_vm6, %v638_v39, -inf }
 0x56b   :  { %720 = vmax.xlane.f32.xlu0 %v719_v42  ;;  %v715_v43 = vpop.f32.mrf.mxu1 }
 0x56c   :  { %v716_v44 = vadd.f32 %v9732_v1, %v715_v43 }
 0x56d   :  { %v9001_v45 = vpop.f32.mrf.mxu1 }
 0x56e   :  { %v722_v46 = vsel %vm233_vm6, %v716_v44, -inf }
 0x56f   :  { %723 = vmax.xlane.f32.xlu1 %v722_v46 }
 0x580   :  { %817 = vrot.lane.b32.xlu1 %v9743_v13, %s9581_s17 }
 0x581   :  { %741 = vrot.lane.b32.xlu0 %v9741_v12, %s9581_s17 }
 0x584   :  { %895 = vrot.lane.b32.xlu1 %v9696_v54, %s9582_s18 }
 0x588   :  { %973 = vrot.lane.b32.xlu1 %v9700_v55, %s9582_s18 }
 0x58c   :  { %971 = vrot.lane.b32.xlu1 %v9716_v60, %s9583_s19 }
 0x5f4   :  { %v721_v47 = vpop.xlane.xlu0 %720 }
 0x5f5   :  { %v725_v48 = vsub.f32 %v638_v39, %v721_v47 }
 0x5f7   :  { %v727_v49 = vmul.f32 1.442695, %v725_v48 }
 0x5f8   :  { %v742_v51 = vpop.permute.xlu0 %741  ;;  %v724_v52 = vpop.xlane.xlu1 %723 }
 0x5f9   :  { %9462 = vpow2.f32 %v727_v49  ;;  %v726_v53 = vsub.f32 %v716_v44, %v724_v52  ;;  %9003 = vmatpush3.msra.mxu0 %v742_v51 }
 0x5fa   :  { %9012 = vmatprep.subr.mxu0 %v9575_v50 }
 0x5fb   :  { %v729_v56 = vmul.f32 1.442695, %v726_v53 }
 0x5fc   :  { %v818_v57 = vpop.permute.xlu1 %817 }
 0x5fd   :  { %9464 = vpow2.f32 %v729_v56  ;;  %9008 = vmatpush3.msra.mxu1 %v818_v57 }
 0x5fe   :  { %9017 = vmatprep.subr.mxu1 %v9575_v50 }
 0x600   :  { %v896_v4 = vpop.permute.xlu1 %895 }
 0x604   :  { %v974_v10 = vpop.permute.xlu1 %973 }
 0x606   :  { %v9463_v59 = vpop.eup %9462 }
 0x607   :  { %v731_v62 = vsel %vm233_vm6, %v9463_v59, 0.0 }
 0x608   :  { %732 = vadd.xlane.f32.xlu0 %v731_v62  ;;  %v972_v15 = vpop.permute.xlu1 %971 }
 0x60a   :  { %v9465_v63 = vpop.eup %9464 }
 0x60b   :  { %v734_v0 = vsel %vm233_vm6, %v9465_v63, 0.0 }
 0x60c   :  { %735 = vadd.xlane.f32.xlu0 %v734_v0 }
 0x622   :  { %893 = vrot.lane.b32.xlu0 %v9708_v58, %s9583_s19 }
 0x691   :  { %v733_v2 = vpop.xlane.xlu0 %732 }
 0x692   :  { %9466 = vrcp.f32 %v733_v2 }
 0x695   :  { %v736_v3 = vpop.xlane.xlu0 %735 }
 0x696   :  { %9468 = vrcp.f32 %v736_v3 }
 0x699   :  { %v894_v14 = vpop.permute.xlu0 %893 }
 0x69f   :  { %v9467_v7 = vpop.eup %9466 }
 0x6a0   :  { %v739_v8 = vmul.f32 %v9467_v7, %v9463_v59 }
 0x6a2   :  { %9005 = vmatmul.mubr.msk.f32.vlgmr.msra.gmra.mxu0 %vm233_vm6, %v739_v8 }
 0x6a3   :  { %v9469_v9 = vpop.eup %9468  ;;  %9013 = vmatpush3.xpose.msk.msra.mxu0 %vm233_vm6, %v896_v4  ;;  %9014 = vmatprep.mubr.msk.f32.mxu0 %vm9576_vm5, %v9575_v50 }
 0x6a4   :  { %v740_v11 = vmul.f32 %v9469_v9, %v9465_v63  ;;  %9022 = vmatprep.subr.mxu0 %v9575_v50 }
 0x6a6   :  { %9010 = vmatmul.mubr.msk.f32.vlgmr.msra.gmra.mxu1 %vm233_vm6, %v740_v11  ;;  %9015 = vmatmul.mubr.msk.f32.vlgmr.msra.gmra.mxu0 %vm233_vm6, %v894_v14 }
 0x6a7   :  { %9018 = vmatpush3.xpose.msk.msra.mxu1 %vm233_vm6, %v974_v10  ;;  %9019 = vmatprep.mubr.msk.f32.mxu1 %vm9576_vm5, %v9575_v50 }
 0x6a8   :  { %9027 = vmatprep.subr.mxu1 %v9575_v50  ;;  %9024 = vmatprep.mubr.msk.f32.mxu0 %vm9576_vm5, %v9575_v50 }
 0x6aa   :  { %9020 = vmatmul.mubr.msk.f32.vlgmr.msra.gmra.mxu1 %vm233_vm6, %v972_v15 }
 0x6ab   :  { %9029 = vmatprep.mubr.msk.f32.mxu1 %vm9576_vm5, %v9575_v50 }
 0x762   :  { %v9817_v16 = vpop.f32.mrf.mxu0 }
 0x764   :  { %v9006_v17 = vpop.f32.mrf.mxu0 }
 0x766   :  { %v9819_v18 = vpop.f32.mrf.mxu1  ;;  %v967_v19 = vpop.f32.mrf.mxu0 }
 0x767   :  { %v968_v20 = vadd.f32 %v9726_v61, %v967_v19 }
 0x768   :  { %v9011_v21 = vpop.f32.mrf.mxu1  ;;  %v9016_v22 = vpop.f32.mrf.mxu0 }
 0x769   :  { %v1049_v23 = vsel %vm233_vm6, %v968_v20, -inf  ;;  %v1587_v22 = vld [vmem:[%s11469_s5 + $0x10] sm:$0xff] }
 0x76a   :  { %1050 = vmax.xlane.f32.xlu0 %v1049_v23  ;;  %v1045_v24 = vpop.f32.mrf.mxu1  ;;  %v1586_v23 = vld [vmem:[%s11469_s5 + $0x8] sm:$0xff] }
 0x76b   :  { %v1046_v25 = vadd.f32 %v9732_v1, %v1045_v24  ;;  %v1585_v24 = vld [vmem:[%s11469_s5] sm:$0xff] }
 0x76c   :  { %v9021_v26 = vpop.f32.mrf.mxu1 }
 0x76d   :  { %v1052_v27 = vsel %vm233_vm6, %v1046_v25, -inf }
 0x76e   :  { %1053 = vmax.xlane.f32.xlu1 %v1052_v27 }
 0x77f   :  { %1147 = vrot.lane.b32.xlu1 %v9743_v13, %s9584_s20 }
 0x780   :  { %1071 = vrot.lane.b32.xlu0 %v9741_v12, %s9584_s20 }
 0x783   :  { %1225 = vrot.lane.b32.xlu1 %v9696_v54, %s9585_s21 }
 0x787   :  { %1303 = vrot.lane.b32.xlu1 %v9700_v55, %s9585_s21 }
 0x78b   :  { %1301 = vrot.lane.b32.xlu1 %v9716_v60, %s9586_s22 }
 0x7f3   :  { %v1051_v28 = vpop.xlane.xlu0 %1050 }
 0x7f4   :  { %v1055_v29 = vsub.f32 %v968_v20, %v1051_v28 }
 0x7f6   :  { %v1057_v30 = vmul.f32 1.442695, %v1055_v29 }
 0x7f7   :  { %v1072_v31 = vpop.permute.xlu0 %1071  ;;  %v1054_v32 = vpop.xlane.xlu1 %1053 }
 0x7f8   :  { %9470 = vpow2.f32 %v1057_v30  ;;  %v1056_v33 = vsub.f32 %v1046_v25, %v1054_v32  ;;  %9023 = vmatpush3.msra.mxu0 %v1072_v31 }
 0x7f9   :  { %9032 = vmatprep.subr.mxu0 %v9575_v50 }
 0x7fa   :  { %v1059_v34 = vmul.f32 1.442695, %v1056_v33 }
 0x7fb   :  { %v1148_v36 = vpop.permute.xlu1 %1147 }
 0x7fc   :  { %9472 = vpow2.f32 %v1059_v34  ;;  %9028 = vmatpush3.msra.mxu1 %v1148_v36 }
 0x7fd   :  { %9037 = vmatprep.subr.mxu1 %v9575_v50 }
 0x7ff   :  { %v1226_v41 = vpop.permute.xlu1 %1225 }
 0x803   :  { %v1304_v45 = vpop.permute.xlu1 %1303 }
 0x805   :  { %v9471_v54 = vpop.eup %9470 }
 0x806   :  { %v1061_v55 = vsel %vm233_vm6, %v9471_v54, 0.0 }
 0x807   :  { %1062 = vadd.xlane.f32.xlu0 %v1061_v55  ;;  %v1302_v47 = vpop.permute.xlu1 %1301 }
 0x809   :  { %v9473_v60 = vpop.eup %9472 }
 0x80a   :  { %v1064_v38 = vsel %vm233_vm6, %v9473_v60, 0.0 }
 0x80b   :  { %1065 = vadd.xlane.f32.xlu0 %v1064_v38 }
 0x821   :  { %1223 = vrot.lane.b32.xlu0 %v9708_v58, %s9586_s22 }
 0x890   :  { %v1063_v39 = vpop.xlane.xlu0 %1062 }
 0x891   :  { %9474 = vrcp.f32 %v1063_v39 }
 0x894   :  { %v1066_v40 = vpop.xlane.xlu0 %1065 }
 0x895   :  { %9476 = vrcp.f32 %v1066_v40 }
 0x898   :  { %v1224_v58 = vpop.permute.xlu0 %1223 }
 0x89e   :  { %v9475_v42 = vpop.eup %9474 }
 0x89f   :  { %v1069_v43 = vmul.f32 %v9475_v42, %v9471_v54 }
 0x8a1   :  { %9025 = vmatmul.mubr.msk.f32.vlgmr.msra.gmra.mxu0 %vm233_vm6, %v1069_v43 }
 0x8a2   :  { %v9477_v44 = vpop.eup %9476  ;;  %9033 = vmatpush3.xpose.msk.msra.mxu0 %vm233_vm6, %v1226_v41  ;;  %9034 = vmatprep.mubr.msk.f32.mxu0 %vm9576_vm5, %v9575_v50 }
 0x8a3   :  { %v1070_v46 = vmul.f32 %v9477_v44, %v9473_v60  ;;  %9042 = vmatprep.subr.mxu0 %v9575_v50 }
 0x8a5   :  { %9030 = vmatmul.mubr.msk.f32.vlgmr.msra.gmra.mxu1 %vm233_vm6, %v1070_v46  ;;  %9035 = vmatmul.mubr.msk.f32.vlgmr.msra.gmra.mxu0 %vm233_vm6, %v1224_v58 }
 0x8a6   :  { %9038 = vmatpush3.xpose.msk.msra.mxu1 %vm233_vm6, %v1304_v45  ;;  %9039 = vmatprep.mubr.msk.f32.mxu1 %vm9576_vm5, %v9575_v50 }
 0x8a7   :  { %9047 = vmatprep.subr.mxu1 %v9575_v50  ;;  %9044 = vmatprep.mubr.msk.f32.mxu0 %vm9576_vm5, %v9575_v50 }
 0x8a9   :  { %9040 = vmatmul.mubr.msk.f32.vlgmr.msra.gmra.mxu1 %vm233_vm6, %v1302_v47 }
 0x8aa   :  { %9049 = vmatprep.mubr.msk.f32.mxu1 %vm9576_vm5, %v9575_v50 }
 0x961   :  { %v1143_v48 = vpop.f32.mrf.mxu0 }
 0x963   :  { %v9026_v49 = vpop.f32.mrf.mxu0 }
 0x965   :  { %v1219_v51 = vpop.f32.mrf.mxu1  ;;  %v1297_v52 = vpop.f32.mrf.mxu0 }
 0x966   :  { %v1298_v53 = vadd.f32 %v9726_v61, %v1297_v52 }
 0x967   :  { %v9031_v56 = vpop.f32.mrf.mxu1  ;;  %v9036_v57 = vpop.f32.mrf.mxu0 }
 0x968   :  { %v1379_v59 = vsel %vm233_vm6, %v1298_v53, -inf  ;;  %v1747_v57 = vld [vmem:[%s11470_s6 + $0x80] sm:$0xff] }
 0x969   :  { %1380 = vmax.xlane.f32.xlu0 %v1379_v59  ;;  %v1375_v62 = vpop.f32.mrf.mxu1  ;;  %v1755_v59 = vld [vmem:[%s11470_s6 + $0xc0] sm:$0xff] }
 0x96a   :  { %v1376_v63 = vadd.f32 %v9732_v1, %v1375_v62  ;;  %v1748_v62 = vld [vmem:[%s11470_s6 + $0x88] sm:$0xff] }
 0x96b   :  { %v9041_v0 = vpop.f32.mrf.mxu1 }
 0x96c   :  { %v1382_v2 = vsel %vm233_vm6, %v1376_v63, -inf  ;;  %v7866_v0 = vcombine.high %v1747_v57, %v1755_v59 }
 0x96d   :  { %1383 = vmax.xlane.f32.xlu1 %v1382_v2  ;;  %v1756_v2 = vld [vmem:[%s11470_s6 + $0xc8] sm:$0xff] }
 0x97e   :  { %1477 = vrot.lane.b32.xlu1 %v9743_v13, %s9587_s24 }
 0x982   :  { %1555 = vrot.lane.b32.xlu1 %v9817_v16, %s9588_s25 }
 0x986   :  { %1557 = vrot.lane.b32.xlu1 %v9819_v18, %s9588_s25 }
 0x98a   :  { %1565 = vrot.lane.b32.xlu1 %v1219_v51, %s11476_s26 }
 0x9f2   :  { %v1381_v61 = vpop.xlane.xlu0 %1380 }
 0x9f3   :  { %v1385_v1 = vsub.f32 %v1298_v53, %v1381_v61  ;;  %v1731_v61 = vld [vmem:[%s11470_s6] sm:$0xff] }
 0x9f5   :  { %v1387_v3 = vmul.f32 1.442695, %v1385_v1  ;;  %v1739_v1 = vld [vmem:[%s11470_s6 + $0x40] sm:$0xff] }
 0x9f6   :  { %v1384_v4 = vpop.xlane.xlu1 %1383 }
 0x9f7   :  { %9478 = vpow2.f32 %v1387_v3  ;;  %v1386_v7 = vsub.f32 %v1376_v63, %v1384_v4  ;;  %v7865_v63 = vcombine.low %v1747_v57, %v1755_v59  ;;  %v9591_v3 = vmov 0   ;;  %v1760_v57 = vld [vmem:[%s11470_s6 + $0xe8] sm:$0xff] }
 0x9f8   :  { %v7867_v4 = vcombine.low %v1748_v62, %v1756_v2 }
 0x9f9   :  { %v1389_v8 = vmul.f32 1.442695, %v1386_v7  ;;  %v7868_v7 = vcombine.high %v1748_v62, %v1756_v2  ;;  %v1735_v2 = vld [vmem:[%s11470_s6 + $0x20] sm:$0xff] }
 0x9fa   :  { %v1478_v9 = vpop.permute.xlu1 %1477 }
 0x9fb   :  { %9480 = vpow2.f32 %v1389_v8  ;;  %9048 = vmatpush3.msra.mxu1 %v1478_v9  ;;  %v7850_v8 = vcombine.high %v1731_v61, %v1739_v1  ;;  %v1732_v9 = vld [vmem:[%s11470_s6 + $0x8] sm:$0xff] }
 0x9fc   :  { %1938 = vmatprep.subr.bf16.mxu1 %v7866_v0 }
 0x9fe   :  { %v1556_v29 = vpop.permute.xlu1 %1555 }
 0x9ff   :  { %v1577_v32 = vsel %vm233_vm6, %v9777_v35, %v1556_v29  ;;  %v7846_v35 = vld [vmem:[%s11467_s3 + $0x5] ss:$0 sm:$0xff] }
 0xa02   :  { %v1558_v30 = vpop.permute.xlu1 %1557 }
 0xa03   :  { %v1578_v55 = vsel %vm233_vm6, %v9779_v37, %v1558_v30 }
 0xa04   :  { %v9479_v13 = vpop.eup %9478 }
 0xa05   :  { %v1391_v10 = vsel %vm233_vm6, %v9479_v13, 0.0 }
 0xa06   :  { %1392 = vadd.xlane.f32.xlu0 %v1391_v10  ;;  %v1566_v33 = vpop.permute.xlu1 %1565 }
 0xa07   :  { %v1581_v60 = vsel %vm1579_vm8, %v1578_v55, %v1566_v33 }
 0xa08   :  { %v9481_v11 = vpop.eup %9480 }
 0xa09   :  { %v1394_v14 = vsel %vm233_vm6, %v9481_v11, 0.0 }
 0xa0a   :  { %1395 = vadd.xlane.f32.xlu0 %v1394_v14 }
 0xa20   :  { %1401 = vrot.lane.b32.xlu0 %v9741_v12, %s9587_s24  ;;  %v1588_v12 = vld [vmem:[%s11469_s5 + $0x18] sm:$0xff] }
 0xa24   :  { %1563 = vrot.lane.b32.xlu0 %v1143_v48, %s11476_s26 }
 0xa8f   :  { %v1393_v15 = vpop.xlane.xlu0 %1392 }
 0xa90   :  { %9482 = vrcp.f32 %v1393_v15  ;;  %v1749_v15 = vld [vmem:[%s11470_s6 + $0x90] sm:$0xff] }
 0xa93   :  { %v1396_v16 = vpop.xlane.xlu0 %1395 }
 0xa94   :  { %9484 = vrcp.f32 %v1396_v16  ;;  %v1757_v16 = vld [vmem:[%s11470_s6 + $0xd0] sm:$0xff] }
 0xa97   :  { %v1402_v17 = vpop.permute.xlu0 %1401 }
 0xa98   :  { %9043 = vmatpush3.msra.mxu0 %v1402_v17  ;;  %v1750_v17 = vld [vmem:[%s11470_s6 + $0x98] sm:$0xff] }
 0xa99   :  { %9052 = vmatprep.subr.mxu0 %v1588_v12 }
 0xa9b   :  { %v1564_v31 = vpop.permute.xlu0 %1563 }
 0xa9c   :  { %v1580_v34 = vsel %vm1579_vm8, %v1577_v32, %v1564_v31 }
 0xa9d   :  { %v9483_v18 = vpop.eup %9482 }
 0xa9e   :  { %v1399_v19 = vmul.f32 %v9483_v18, %v9479_v13  ;;  %v1740_v13 = vld [vmem:[%s11470_s6 + $0x48] sm:$0xff]  ;;  %v7870_v18 = vcombine.high %v1749_v15, %v1757_v16 }
 0xa9f   :  { %v7852_v10 = vcombine.high %v1732_v9, %v1740_v13  ;;  %v7851_v14 = vcombine.low %v1732_v9, %v1740_v13 }
 0xaa0   :  { %9045 = vmatmul.mubr.msk.f32.vlgmr.msra.gmra.mxu0 %vm233_vm6, %v1399_v19  ;;  %v1758_v19 = vld [vmem:[%s11470_s6 + $0xd8] sm:$0xff] }
 0xaa1   :  { %v9485_v20 = vpop.eup %9484  ;;  %9053 = vmatpush3.msra.mxu0 %v1588_v12  ;;  %v7872_v12 = vcombine.high %v1750_v17, %v1758_v19 }
 0xaa2   :  { %v1400_v21 = vmul.f32 %v9485_v20, %v9481_v11  ;;  %9054 = vmatprep.subr.mxu0 %v1587_v22  ;;  %v7849_v11 = vcombine.low %v1731_v61, %v1739_v1  ;;  %v7869_v20 = vcombine.low %v1749_v15, %v1757_v16  ;;  %v1743_v61 = vld [vmem:[%s11470_s6 + $0x60] sm:$0xff]  ;;  %v1736_v1 = vld [vmem:[%s11470_s6 + $0x28] sm:$0xff]  ;;  %v1762_v15 = vld [vmem:[%s11470_s6 + $0xf8] sm:$0xff] }
 0xaa3   :  { %9055 = vmatpush3.msra.mxu0 %v1587_v22  ;;  %v7858_v9 = vcombine.high %v1735_v2, %v1743_v61  ;;  %v7857_v16 = vcombine.low %v1735_v2, %v1743_v61  ;;  %v9592_v2 = vmov 1966171168  }
 0xaa4   :  { %9050 = vmatmul.mubr.msk.f32.vlgmr.msra.gmra.mxu1 %vm233_vm6, %v1400_v21  ;;  %9056 = vmatprep.subr.mxu0 %v1586_v23  ;;  %v7871_v21 = vcombine.low %v1750_v17, %v1758_v19  ;;  %v2292_v61 = vunpack.c.l.s4 %v9592_v2  ;;  %v9224_v2 = vld [vmem:[%s11472_s8 + $0x1f0] sm:$0xff]  }
 0xaa5   :  { %9057 = vmatpush3.msra.mxu0 %v1586_v23  ;;  %1958 = vmatprep.mubr.bf16.mxu1 %v9591_v3 }
 0xaa6   :  { %9058 = vmatprep.subr.mxu0 %v1585_v24  ;;  %1939 = vmatpush1.bf16.msra.mxu1 %v7865_v63 }
 0xaa7   :  { %9059 = vmatpush3.msra.mxu0 %v1585_v24  ;;  %1940 = vmatprep.subr.bf16.mxu1 %v7850_v8 }
 0xaa8   :  { %1981 = vmatprep.subr.bf16.mxu0 %v7868_v7 }
 0xaaa   :  { %1941 = vmatpush1.bf16.msra.mxu1 %v7849_v11  ;;  %v1761_v11 = vld [vmem:[%s11470_s6 + $0xf0] sm:$0xff] }
 0xaab   :  { %2024 = vmatprep.subr.bf16.mxu1 %v7870_v18 }
 0xb60   :  { %v1473_v25 = vpop.f32.mrf.mxu0 }
 0xb61   :  { %1571 = vrot.lane.b32.xlu0 %v1473_v25, %s11474_s0 }
 0xb62   :  { %v9046_v26 = vpop.f32.mrf.mxu0 }
 0xb64   :  { %v1549_v27 = vpop.f32.mrf.mxu1 }
 0xb65   :  { %1573 = vrot.lane.b32.xlu1 %v1549_v27, %s11474_s0 }
 0xb66   :  { %v9051_v28 = vpop.f32.mrf.mxu1 }
 0xbd3   :  { %v1572_v36 = vpop.permute.xlu0 %1571 }
 0xbd4   :  { %v1583_v54 = vsel %vm1582_vm7, %v1580_v34, %v1572_v36 }
 0xbd5   :  { %9060 = vmatprep.mubr.msk.f32.mxu0 %vm64_vm0, %v1583_v54 }
 0xbd7   :  { %v1574_v38 = vpop.permute.xlu1 %1573 }
 0xbd8   :  { %v1584_v39 = vsel %vm1582_vm7, %v1581_v60, %v1574_v38  ;;  %v7847_v38 = vld [vmem:[%s11467_s3 + $0x6] ss:$0 sm:$0xff] }
 0xbd9   :  { %9061 = vmatmul.mubr.msk.f32.vlgmr.msra.gmra.mxu0 %vm64_vm0, %v1584_v39 }
 0xbda   :  { %2001 = vmatprep.mubr.bf16.mxu0 %v9591_v3  ;;  %1982 = vmatpush1.bf16.msra.mxu0 %v7867_v4  ;;  %v1744_v4 = vld [vmem:[%s11470_s6 + $0x68] sm:$0xff] }
 0xbdb   :  { %1983 = vmatprep.subr.bf16.mxu0 %v7852_v10  ;;  %v7860_v13 = vcombine.high %v1736_v1, %v1744_v4  ;;  %v1753_v10 = vld [vmem:[%s11470_s6 + $0xb0] sm:$0xff]  ;;  %v7859_v17 = vcombine.low %v1736_v1, %v1744_v4  ;;  %v2294_v1 = vlaneseq  ;;  %v2293_v4 = vunpack.c.0.s8 %v2292_v61 }
 0xbdc   :  { %v7878_v18 = vcombine.high %v1753_v10, %v1761_v11 }
 0xbde   :  { %1984 = vmatpush1.bf16.msra.mxu0 %v7851_v14  ;;  %v1754_v14 = vld [vmem:[%s11470_s6 + $0xb8] sm:$0xff] }
 0xbdf   :  { %2067 = vmatprep.subr.bf16.mxu0 %v7872_v12  ;;  %v7880_v19 = vcombine.high %v1754_v14, %v1762_v15  ;;  %v1738_v12 = vld [vmem:[%s11470_s6 + $0x38] sm:$0xff] }
 0xc99   :  { %v9062_v40 = vpop.f32.mrf.mxu0 }
 0xc9a   :  { %v1671_v41 = vadd.f32 %v9062_v40, %v9656_v6 }
 0xc9b   :  { %v1661_v42 = vpop.f32.mrf.mxu0 }
 0xc9c   :  { %v9903_v43 = vadd.f32 %v7846_v35, %v1671_v41  ;;  %v1670_v44 = vadd.f32 %v1661_v42, %v9654_v5  ;;  %v7848_v42 = vld [vmem:[%s11467_s3 + $0x7] ss:$0 sm:$0xff] }
 0xc9e   :  { %v9906_v37 = vadd.f32 %v7846_v35, %v1670_v44  ;;  %v1681_v45 = vsel %vm64_vm0, %v9903_v43, 0.0 }
 0xc9f   :  { %1682 = vadd.xlane.f32.xlu1 %v1681_v45  ;;  %v1733_v45 = vld [vmem:[%s11470_s6 + $0x10] sm:$0xff] }
 0xca0   :  { %v1678_v46 = vsel %vm64_vm0, %v9906_v37, 0.0 }
 0xca1   :  { %1679 = vadd.xlane.f32.xlu0 %v1678_v46  ;;  %v1741_v46 = vld [vmem:[%s11470_s6 + $0x50] sm:$0xff] }
 0xca2   :  { %v7853_v59 = vcombine.low %v1733_v45, %v1741_v46 }
 0xd28   :  { %v1683_v58 = vpop.xlane.xlu1 %1682 }
 0xd29   :  { %v1685_v47 = vmul.f32 0.03125, %v1683_v58  ;;  %v1734_v58 = vld [vmem:[%s11470_s6 + $0x18] sm:$0xff] }
 0xd2a   :  { %v1680_v48 = vpop.xlane.xlu0 %1679 }
 0xd2b   :  { %v1684_v49 = vmul.f32 0.03125, %v1680_v48  ;;  %v9913_v6 = vsub.f32 %v9903_v43, %v1685_v47  ;;  %v1742_v47 = vld [vmem:[%s11470_s6 + $0x58] sm:$0xff] }
 0xd2c   :  { %v7855_v62 = vcombine.low %v1734_v58, %v1742_v47 }
 0xd2d   :  { %v9916_v51 = vsub.f32 %v9906_v37, %v1684_v49  ;;  %v1689_v53 = vmul.f32 %v9913_v6, %v9913_v6  ;;  %v1717_v35 = vmul.f32 %v7847_v38, %v9913_v6 }
 0xd2f   :  { %v1688_v5 = vmul.f32 %v9916_v51, %v9916_v51  ;;  %v1693_v56 = vsel %vm64_vm0, %v1689_v53, 0.0  ;;  %v1716_v39 = vmul.f32 %v7847_v38, %v9916_v51  ;;  %v7854_v51 = vcombine.high %v1733_v45, %v1741_v46  ;;  %v1759_v53 = vld [vmem:[%s11470_s6 + $0xe0] sm:$0xff]  ;;  %v9196_v38 = vld [vmem:[%s11472_s8 + $0x28] sm:$0xff]   ;;  %v9203_v45 = vld [vmem:[%s11472_s8 + $0xd8] sm:$0xff]  }
 0xd30   :  { %v9204_v46 = vld [vmem:[%s11472_s8 + $0x18] sm:$0xff]  }
 0xd31   :  { %v1690_v52 = vsel %vm64_vm0, %v1688_v5, 0.0  ;;  %v7856_v5 = vcombine.high %v1734_v58, %v1742_v47  ;;  %v9205_v58 = vld [vmem:[%s11472_s8 + $0x98] sm:$0xff]   ;;  %v9206_v47 = vld [vmem:[%s11472_s8 + $0x50] sm:$0xff]  }
 0xd32   :  { %1691 = vadd.xlane.f32.xlu0 %v1690_v52  ;;  %v1751_v52 = vld [vmem:[%s11470_s6 + $0xa0] sm:$0xff] }
 0xd33   :  { %v7874_v63 = vcombine.high %v1751_v52, %v1759_v53  ;;  %v7873_v7 = vcombine.low %v1751_v52, %v1759_v53  ;;  %v9212_v52 = vld [vmem:[%s11472_s8 + $0x8] sm:$0xff]  }
 0xd34   :  { %v9213_v53 = vld [vmem:[%s11472_s8 + $0x88] sm:$0xff]  }
 0xd36   :  { %1694 = vadd.xlane.f32.xlu0 %v1693_v56  ;;  %v1752_v56 = vld [vmem:[%s11470_s6 + $0xa8] sm:$0xff] }
 0xd37   :  { %v7876_v0 = vcombine.high %v1752_v56, %v1760_v57  ;;  %v7875_v8 = vcombine.low %v1752_v56, %v1760_v57  ;;  %v9214_v56 = vld [vmem:[%s11472_s8 + $0x40] sm:$0xff]  }
 0xd38   :  { %v9215_v57 = vld [vmem:[%s11472_s8 + $0xc0] sm:$0xff]  }
 0xdbb   :  { %v1692_v22 = vpop.xlane.xlu0 %1691 }
 0xdbc   :  { %v1696_v23 = vmul.f32 0.032258064, %v1692_v22  ;;  %v1746_v22 = vld [vmem:[%s11470_s6 + $0x78] sm:$0xff] }
 0xdbe   :  { %9486 = vrsqrt.f32 %v1696_v23  ;;  %vm1700_vm9 = vcmp.eq.f32.partialorder %v1696_v23, inf  ;;  %v1703_v28 = vand.u32 2147483648, %v1696_v23  ;;  %vm1702_vm10 = vcmp.eq.f32.partialorder %v1696_v23, 0.0 }
 0xdbf   :  { %v1695_v24 = vpop.xlane.xlu0 %1694 }
 0xdc0   :  { %v1697_v25 = vmul.f32 0.032258064, %v1695_v24  ;;  %v7879_v24 = vcombine.low %v1754_v14, %v1762_v15 }
 0xdc2   :  { %9488 = vrsqrt.f32 %v1697_v25  ;;  %vm1707_vm11 = vcmp.eq.f32.partialorder %v1697_v25, inf  ;;  %v1710_v34 = vand.u32 2147483648, %v1697_v25  ;;  %vm1709_vm12 = vcmp.eq.f32.partialorder %v1697_v25, 0.0 }
 0xdcb   :  { %v9487_v26 = vpop.eup %9486 }
 0xdcc   :  { %v1699_v27 = vmul.f32 %v9487_v26, %v1696_v23  ;;  %v7864_v26 = vcombine.high %v1738_v12, %v1746_v22 }
 0xdce   :  { %v1701_v29 = vsel %vm1700_vm9, %v1696_v23, %v1699_v27  ;;  %v7877_v23 = vcombine.low %v1753_v10, %v1761_v11 }
 0xdcf   :  { %v9489_v30 = vpop.eup %9488  ;;  %v1704_v31 = vsel %vm1702_vm10, %v1703_v28, %v1701_v29  ;;  %v7863_v28 = vcombine.low %v1738_v12, %v1746_v22  ;;  %v9186_v29 = vld [vmem:[%s11472_s8 + $0x78] sm:$0xff]  }
 0xdd0   :  { %v1718_v32 = vadd.f32 1e-06, %v1704_v31  ;;  %v1706_v33 = vmul.f32 %v9489_v30, %v1697_v25  ;;  %v9187_v30 = vld [vmem:[%s11472_s8 + $0xf8] sm:$0xff]  }
 0xdd1   :  { %v9188_v31 = vld [vmem:[%s11472_s8 + $0x38] sm:$0xff]  }
 0xdd2   :  { %9490 = vrcp.f32 %v1718_v32  ;;  %v1708_v36 = vsel %vm1707_vm11, %v1697_v25, %v1706_v33  ;;  %v9189_v32 = vld [vmem:[%s11472_s8 + $0xb8] sm:$0xff]   ;;  %v9190_v33 = vld [vmem:[%s11472_s8 + $0x70] sm:$0xff]  }
 0xdd3   :  { %v1711_v54 = vsel %vm1709_vm12, %v1710_v34, %v1708_v36  ;;  %v9191_v34 = vld [vmem:[%s11472_s8 + $0xf0] sm:$0xff]  }
 0xdd4   :  { %v1719_v55 = vadd.f32 1e-06, %v1711_v54  ;;  %v9192_v36 = vld [vmem:[%s11472_s8 + $0x30] sm:$0xff]  }
 0xdd5   :  { %v9193_v54 = vld [vmem:[%s11472_s8 + $0xb0] sm:$0xff]  }
 0xdd6   :  { %9492 = vrcp.f32 %v1719_v55  ;;  %v9194_v55 = vld [vmem:[%s11472_s8 + $0x68] sm:$0xff]  }
 0xddf   :  { %v9491_v60 = vpop.eup %9490 }
 0xde0   :  { %v1721_v40 = vmul.f32 %v9491_v60, %v1716_v39  ;;  %v9195_v60 = vld [vmem:[%s11472_s8 + $0xe8] sm:$0xff]  }
 0xde1   :  { %v9197_v39 = vld [vmem:[%s11472_s8 + $0xa8] sm:$0xff]  }
 0xde2   :  { %v1728_v48 = vadd.f32 %v7848_v42, %v1721_v40  ;;  %v9199_v40 = vld [vmem:[%s11472_s8 + $0xe0] sm:$0xff]  }
 0xde3   :  { %v9493_v41 = vpop.eup %9492 }
 0xde4   :  { %v1723_v44 = vmul.f32 %v9493_v41, %v1717_v35  ;;  %v9198_v35 = vld [vmem:[%s11472_s8 + $0x60] sm:$0xff]  }
 0xde5   :  { %v9200_v41 = vld [vmem:[%s11472_s8 + $0x20] sm:$0xff]  }
 0xde6   :  { %v1729_v49 = vadd.f32 %v7848_v42, %v1723_v44  ;;  %v9201_v42 = vld [vmem:[%s11472_s8 + $0xa0] sm:$0xff]   ;;  %v9202_v44 = vld [vmem:[%s11472_s8 + $0x58] sm:$0xff]  }
 0xde8   :  { %v9982_v6 = vpack.c.bf16 %v1729_v49, %v1728_v48  ;;  %v9207_v48 = vld [vmem:[%s11472_s8 + $0xd0] sm:$0xff]  }
 0xde9   :  { %v9208_v49 = vld [vmem:[%s11472_s8 + $0x10] sm:$0xff]  }
 0xdea   :  { %7881 = vmatmul.mubr.msk.bf16.vlgmr.msra.gmra.mxu1 %vm64_vm0, %v9982_v6  ;;  %7882 = vmatmul.mubr.msk.bf16.vlgmr.msra.gmra.mxu0 %vm64_vm0, %v9982_v6 }
 0xdeb   :  { %2025 = vmatpush1.bf16.msra.mxu1 %v7869_v20  ;;  %2068 = vmatpush1.bf16.msra.mxu0 %v7871_v21  ;;  %v1737_v20 = vld [vmem:[%s11470_s6 + $0x30] sm:$0xff] }
 0xdec   :  { %2026 = vmatprep.subr.bf16.mxu1 %v7854_v51  ;;  %2069 = vmatprep.subr.bf16.mxu0 %v7856_v5  ;;  %v1745_v21 = vld [vmem:[%s11470_s6 + $0x70] sm:$0xff]  ;;  %v9210_v51 = vld [vmem:[%s11472_s8 + $0x48] sm:$0xff]  }
 0xded   :  { %2044 = vmatprep.mubr.bf16.mxu1 %v9591_v3  ;;  %2087 = vmatprep.mubr.bf16.mxu0 %v9591_v3  ;;  %v7862_v25 = vcombine.high %v1737_v20, %v1745_v21  ;;  %v7861_v27 = vcombine.low %v1737_v20, %v1745_v21  ;;  %v9211_v5 = vld [vmem:[%s11472_s8 + $0xc8] sm:$0xff]  }
 0xdef   :  { %2027 = vmatpush1.bf16.msra.mxu1 %v7853_v59  ;;  %2070 = vmatpush1.bf16.msra.mxu0 %v7855_v62  ;;  %v9216_v59 = vld [vmem:[%s11472_s8] sm:$0xff]  }
 0xdf0   :  { %2110 = vmatprep.subr.bf16.mxu1 %v7874_v63  ;;  %2153 = vmatprep.subr.bf16.mxu0 %v7876_v0  ;;  %v9217_v62 = vld [vmem:[%s11472_s8 + $0x80] sm:$0xff]   ;;  %v9219_v63 = vld [vmem:[%s11472_s8 + $0x178] sm:$0xff]  }
 0xdf1   :  { %v9220_v0 = vld [vmem:[%s11472_s8 + $0x1f8] sm:$0xff]  }
 0xdf2   :  { %7883 = vmatmul.mubr.msk.bf16.vlgmr.msra.gmra.mxu1 %vm64_vm0, %v9982_v6  ;;  %7884 = vmatmul.mubr.msk.bf16.vlgmr.msra.gmra.mxu0 %vm64_vm0, %v9982_v6 }
 0xdf3   :  { %2111 = vmatpush1.bf16.msra.mxu1 %v7873_v7  ;;  %2154 = vmatpush1.bf16.msra.mxu0 %v7875_v8  ;;  %v2295_v7 = vshrl.u32 %v2294_v1, 7 }
 0xdf4   :  { %2112 = vmatprep.subr.bf16.mxu1 %v7858_v9  ;;  %2155 = vmatprep.subr.bf16.mxu0 %v7860_v13  ;;  %v2286_v9 = vld [vmem:[%s11471_s7] sm:$0xff] }
 0xdf5   :  { %2130 = vmatprep.mubr.bf16.mxu1 %v9591_v3  ;;  %2173 = vmatprep.mubr.bf16.mxu0 %v9591_v3  ;;  %v10156_v8 = vsub.s32 %v2293_v4, %v2295_v7  ;;  %v2290_v11 = vcombine.high %v2286_v9, %v2286_v9  ;;  %v10169_v22 = vsub.s32 0, %v2295_v7 }
 0xdf7   :  { %2113 = vmatpush1.bf16.msra.mxu1 %v7857_v16  ;;  %2156 = vmatpush1.bf16.msra.mxu0 %v7859_v17  ;;  %v2297_v13 = vrot.slane %v2286_v9, %v10156_v8  ;;  %v10165_v16 = vrot.slane %v2290_v11, %v10156_v8  ;;  %v9225_v9 = vld [vmem:[%s11472_s8 + $0x130] sm:$0xff]   ;;  %v9227_v11 = vld [vmem:[%s11472_s8 + $0x168] sm:$0xff]  }
 0xdf8   :  { %2196 = vmatprep.subr.bf16.mxu1 %v7878_v18  ;;  %2239 = vmatprep.subr.bf16.mxu0 %v7880_v19 }
 0xdf9   :  { %v2305_v10 = vcombine.high %v2297_v13, %v2297_v13  ;;  %v2313_v14 = vrot.slane %v2297_v13, %v10156_v8  ;;  %v2306_v19 = vcombine.high %v10165_v16, %v10165_v16  ;;  %v9226_v13 = vld [vmem:[%s11472_s8 + $0x1b0] sm:$0xff]  }
 0xdfa   :  { %7885 = vmatmul.mubr.msk.bf16.vlgmr.msra.gmra.mxu1 %vm64_vm0, %v9982_v6  ;;  %7886 = vmatmul.mubr.msk.bf16.vlgmr.msra.gmra.mxu0 %vm64_vm0, %v9982_v6 }
 0xdfb   :  { %2197 = vmatpush1.bf16.msra.mxu1 %v7877_v23  ;;  %2240 = vmatpush1.bf16.msra.mxu0 %v7879_v24  ;;  %v2327_v15 = vrot.slane %v2305_v10, %v10156_v8  ;;  %v2335_v17 = vcombine.high %v2313_v14, %v2313_v14  ;;  %v2389_v12 = vpack.i.b16 %v2313_v14, %v2313_v14  ;;  %v10211_v10 = vld [vmem:[%s11471_s7 + $0x8] sm:$0xff] }
 0xdfc   :  { %2198 = vmatprep.subr.bf16.mxu1 %v7862_v25  ;;  %2241 = vmatprep.subr.bf16.mxu0 %v7864_v26  ;;  %v2334_v26 = vrot.slane %v2306_v19, %v10156_v8 }
 0xdfd   :  { %2216 = vmatprep.mubr.bf16.mxu1 %v9591_v3  ;;  %2259 = vmatprep.mubr.bf16.mxu0 %v9591_v3  ;;  %v2337_v18 = vcombine.high %v2327_v15, %v2327_v15  ;;  %v2403_v23 = vpack.i.b16 %v2335_v17, %v2335_v17  ;;  %v2396_v24 = vpack.i.b16 %v2327_v15, %v2327_v15  ;;  %v9228_v17 = vld [vmem:[%s11472_s8 + $0x1e8] sm:$0xff]  }
 0xdff   :  { %2199 = vmatpush1.bf16.msra.mxu1 %v7861_v27  ;;  %2242 = vmatpush1.bf16.msra.mxu0 %v7863_v28  ;;  %v2410_v25 = vpack.i.b16 %v2337_v18, %v2337_v18  ;;  %v10221_v18 = vrot.slane %v10211_v10, %v10156_v8 }
 0xe00   :  { %8565 = vmatprep.subr.bf16.mxu1 %v9186_v29  ;;  %8587 = vmatprep.subr.bf16.mxu0 %v9187_v30  ;;  %v2394_v30 = vrot.slane %v2389_v12, %v10169_v22  ;;  %v9230_v12 = vld [vmem:[%s11472_s8 + $0x1a8] sm:$0xff]  }
 0xe02   :  { %7887 = vmatmul.mubr.msk.bf16.vlgmr.msra.gmra.mxu1 %vm64_vm0, %v9982_v6  ;;  %7888 = vmatmul.mubr.msk.bf16.vlgmr.msra.gmra.mxu0 %vm64_vm0, %v9982_v6  ;;  %v9209_v6 = vld [vmem:[%s11472_s8 + $0x90] sm:$0xff]  }
 0xe03   :  { %8566 = vmatpush3.bf16.msra.mxu1 %v9188_v31  ;;  %8588 = vmatpush3.bf16.msra.mxu0 %v9189_v32  ;;  %v2408_v32 = vrot.slane %v2403_v23, %v10169_v22  ;;  %v9231_v23 = vld [vmem:[%s11472_s8 + $0x160] sm:$0xff]  }
 0xe04   :  { %8567 = vmatprep.subr.bf16.mxu1 %v9190_v33  ;;  %8589 = vmatprep.subr.bf16.mxu0 %v9191_v34  ;;  %v2401_v33 = vrot.slane %v2396_v24, %v10169_v22  ;;  %v9232_v24 = vld [vmem:[%s11472_s8 + $0x1e0] sm:$0xff]  }
 0xe07   :  { %8568 = vmatpush3.bf16.msra.mxu1 %v9192_v36  ;;  %8590 = vmatpush3.bf16.msra.mxu0 %v9193_v54  ;;  %v2415_v54 = vrot.slane %v2410_v25, %v10169_v22 }
 0xe08   :  { %8569 = vmatprep.subr.bf16.mxu1 %v9194_v55  ;;  %8591 = vmatprep.subr.bf16.mxu0 %v9195_v60  ;;  %v2338_v55 = vcombine.high %v2334_v26, %v2334_v26 }
 0xe0b   :  { %8570 = vmatpush3.bf16.msra.mxu1 %v9196_v38  ;;  %8592 = vmatpush3.bf16.msra.mxu0 %v9197_v39 }
 0xe0c   :  { %8571 = vmatprep.subr.bf16.mxu1 %v9198_v35  ;;  %8593 = vmatprep.subr.bf16.mxu0 %v9199_v40 }
 0xe0f   :  { %8572 = vmatpush3.bf16.msra.mxu1 %v9200_v41  ;;  %8594 = vmatpush3.bf16.msra.mxu0 %v9201_v42 }
 0xe10   :  { %8573 = vmatprep.subr.bf16.mxu1 %v9202_v44  ;;  %8595 = vmatprep.subr.bf16.mxu0 %v9203_v45 }
 0xe13   :  { %8574 = vmatpush3.bf16.msra.mxu1 %v9204_v46  ;;  %8596 = vmatpush3.bf16.msra.mxu0 %v9205_v58  ;;  %v2424_v58 = vpack.i.b16 %v2334_v26, %v2334_v26  ;;  %v2354_v26 = vcombine.high %v10221_v18, %v10221_v18 }
 0xe14   :  { %8575 = vmatprep.subr.bf16.mxu1 %v9206_v47  ;;  %8597 = vmatprep.subr.bf16.mxu0 %v9207_v48  ;;  %v2438_v47 = vpack.i.b16 %v2338_v55, %v2338_v55  ;;  %v9240_v55 = vld [vmem:[%s11472_s8 + $0x150] sm:$0xff]  }
 0xe17   :  { %8576 = vmatpush3.bf16.msra.mxu1 %v9208_v49  ;;  %8598 = vmatpush3.bf16.msra.mxu0 %v9209_v6 }
 0xe18   :  { %8577 = vmatprep.subr.bf16.mxu1 %v9210_v51  ;;  %8599 = vmatprep.subr.bf16.mxu0 %v9211_v5  ;;  %v9221_v5 = vld [vmem:[%s11472_s8 + $0x138] sm:$0xff]  }
 0xe1b   :  { %8578 = vmatpush3.bf16.msra.mxu1 %v9212_v52  ;;  %8600 = vmatpush3.bf16.msra.mxu0 %v9213_v53 }
 0xe1c   :  { %8579 = vmatprep.subr.bf16.mxu1 %v9214_v56  ;;  %8601 = vmatprep.subr.bf16.mxu0 %v9215_v57 }
 0xe1f   :  { %8580 = vmatpush3.bf16.msra.mxu1 %v9216_v59  ;;  %8602 = vmatpush3.bf16.msra.mxu0 %v9217_v62  ;;  %v9222_v59 = vld [vmem:[%s11472_s8 + $0x1b8] sm:$0xff]   ;;  %v9223_v62 = vld [vmem:[%s11472_s8 + $0x170] sm:$0xff]  }
 0xe20   :  { %8609 = vmatprep.subr.bf16.mxu1 %v9219_v63  ;;  %8631 = vmatprep.subr.bf16.mxu0 %v9220_v0  ;;  %v2429_v63 = vrot.slane %v2424_v58, %v10169_v22  ;;  %v2443_v0 = vrot.slane %v2438_v47, %v10169_v22  ;;  %v9244_v58 = vld [vmem:[%s11472_s8 + $0x148] sm:$0xff]  }
 0xeaa   :  { %v1960_v20 = vpop.f32.mrf.mxu1  ;;  %v2003_v21 = vpop.f32.mrf.mxu0 }
 0xeac   :  { %v1962_v27 = vpop.f32.mrf.mxu1  ;;  %v2005_v28 = vpop.f32.mrf.mxu0 }
 0xeae   :  { %v1964_v29 = vpop.f32.mrf.mxu1  ;;  %v2007_v31 = vpop.f32.mrf.mxu0 }
 0xeaf   :  { %v2270_v34 = vpack.c.bf16 %v1964_v29, %v1960_v20  ;;  %v2272_v36 = vpack.c.bf16 %v2007_v31, %v2003_v21  ;;  %v9229_v21 = vld [vmem:[%s11472_s8 + $0x128] sm:$0xff]   ;;  %v9234_v29 = vld [vmem:[%s11472_s8 + $0x1a0] sm:$0xff]   ;;  %v2320_v31 = vrot.slane %v10165_v16, %v10156_v8  ;;  %v9239_v16 = vld [vmem:[%s11472_s8 + $0x198] sm:$0xff]  }
 0xeb0   :  { %v1966_v60 = vpop.f32.mrf.mxu1  ;;  %v2009_v38 = vpop.f32.mrf.mxu0 }
 0xeb1   :  { %v2271_v39 = vpack.c.bf16 %v1966_v60, %v1962_v27  ;;  %v2273_v35 = vpack.c.bf16 %v2009_v38, %v2005_v28  ;;  %v2500_v40 = vadd.bf16 %v2394_v30, %v2270_v34  ;;  %v2502_v41 = vadd.bf16 %v2408_v32, %v2272_v36  ;;  %v9233_v27 = vld [vmem:[%s11472_s8 + $0x120] sm:$0xff]   ;;  %v9236_v30 = vld [vmem:[%s11472_s8 + $0x158] sm:$0xff]   ;;  %v9241_v38 = vld [vmem:[%s11472_s8 + $0x1d0] sm:$0xff]  }
 0xeb2   :  { %v10176_v42 = vpop.f32.mrf.mxu1  ;;  %v10178_v44 = vpop.f32.mrf.mxu0  ;;  %v9237_v32 = vld [vmem:[%s11472_s8 + $0x1d8] sm:$0xff]   ;;  %v2376_v34 = vrot.slane %v2354_v26, %v10156_v8  ;;  %v2336_v60 = vcombine.high %v2320_v31, %v2320_v31  ;;  %v2339_v26 = vcombine.high %v10211_v10, %v10211_v10  ;;  %v9261_v10 = vld [vmem:[%s11472_s8 + $0x2e8] sm:$0xff]  }
 0xeb3   :  { %v2501_v45 = vadd.bf16 %v2401_v33, %v2271_v39  ;;  %v2503_v46 = vadd.bf16 %v2415_v54, %v2273_v35  ;;  %v2516_v52 = vmax.bf16 %v9591_v3, %v2500_v40  ;;  %v2518_v53 = vmax.bf16 %v9591_v3, %v2502_v41  ;;  %v9238_v36 = vld [vmem:[%s11472_s8 + $0x118] sm:$0xff]   ;;  %v9242_v40 = vld [vmem:[%s11472_s8 + $0x110] sm:$0xff]  }
 0xeb4   :  { %v2048_v48 = vpop.f32.mrf.mxu1  ;;  %v2091_v49 = vpop.f32.mrf.mxu0  ;;  %v2386_v35 = vcombine.high %v2376_v34, %v2376_v34  ;;  %v2417_v41 = vpack.i.b16 %v2320_v31, %v2320_v31  ;;  %v2431_v47 = vpack.i.b16 %v2336_v60, %v2336_v60  ;;  %v9260_v31 = vld [vmem:[%s11472_s8 + $0x268] sm:$0xff]   ;;  %v9266_v60 = vld [vmem:[%s11472_s8 + $0x220] sm:$0xff]  }
 0xeb5   :  { %v2517_v6 = vmax.bf16 %v9591_v3, %v2501_v45  ;;  %v2519_v51 = vmax.bf16 %v9591_v3, %v2503_v46  ;;  %v9243_v46 = vld [vmem:[%s11472_s8 + $0x190] sm:$0xff]  }
 0xeb6   :  { %v10187_v56 = vpop.f32.mrf.mxu1  ;;  %v10189_v57 = vpop.f32.mrf.mxu0 }
 0xeb7   :  { %3592 = vmatprep.mubr.bf16.mxu1 %v2517_v6  ;;  %3633 = vmatprep.mubr.bf16.mxu0 %v2519_v51  ;;  %v2466_v51 = vpack.i.b16 %v2386_v35, %v2386_v35  ;;  %v9267_v35 = vld [vmem:[%s11472_s8 + $0x2a0] sm:$0xff]  }
 0xeb8   :  { %v2052_v61 = vpop.f32.mrf.mxu1  ;;  %v2095_v1 = vpop.f32.mrf.mxu0  ;;  %3593 = vmatmul.mubr.bf16.vlgmr.msra.gmra.mxu1 %v2516_v52  ;;  %3634 = vmatmul.mubr.bf16.vlgmr.msra.gmra.mxu0 %v2518_v53  ;;  %v2274_v52 = vpack.c.bf16 %v10187_v56, %v10176_v42  ;;  %v2422_v53 = vrot.slane %v2417_v41, %v10169_v22  ;;  %v9249_v42 = vld [vmem:[%s11472_s8 + $0x1c0] sm:$0xff]   ;;  %v2362_v41 = vrot.slane %v10221_v18, %v10156_v8  ;;  %v9271_v18 = vld [vmem:[%s11472_s8 + $0x298] sm:$0xff]  }
 0xeb9   :  { %v2275_v4 = vpack.c.bf16 %v2052_v61, %v2048_v48  ;;  %v2277_v7 = vpack.c.bf16 %v2095_v1, %v2091_v49  ;;  %8610 = vmatpush3.bf16.msra.mxu1 %v9221_v5  ;;  %8632 = vmatpush3.bf16.msra.mxu0 %v9222_v59  ;;  %v9245_v48 = vld [vmem:[%s11472_s8 + $0x1c8] sm:$0xff]   ;;  %v2452_v49 = vpack.i.b16 %v2376_v34, %v2376_v34 }
 0xeba   :  { %8611 = vmatprep.subr.bf16.mxu1 %v9223_v62  ;;  %8633 = vmatprep.subr.bf16.mxu0 %v9224_v2  ;;  %v10237_v25 = vpop.f32.mrf.mxu1  ;;  %v10244_v28 = vpop.f32.mrf.mxu0  ;;  %v9246_v5 = vld [vmem:[%s11472_s8 + $0x108] sm:$0xff]   ;;  %v2436_v2 = vrot.slane %v2431_v47, %v10169_v22 }
 0xebb   :  { %v2505_v14 = vadd.bf16 %v2429_v63, %v2275_v4  ;;  %v2507_v15 = vadd.bf16 %v2443_v0, %v2277_v7  ;;  %v9247_v62 = vld [vmem:[%s11472_s8 + $0x188] sm:$0xff]   ;;  %v9248_v63 = vld [vmem:[%s11472_s8 + $0x140] sm:$0xff]   ;;  %v2276_v0 = vpack.c.bf16 %v10189_v57, %v10178_v44  ;;  %v2457_v61 = vrot.slane %v2452_v49, %v10169_v22  ;;  %v9252_v57 = vld [vmem:[%s11472_s8 + $0x278] sm:$0xff]  }
 0xebc   :  { %v2134_v33 = vpop.f32.mrf.mxu1  ;;  %v2177_v54 = vpop.f32.mrf.mxu0  ;;  %v2471_v4 = vrot.slane %v2466_v51, %v10169_v22  ;;  %v9250_v7 = vld [vmem:[%s11472_s8 + $0x100] sm:$0xff]   ;;  %v9263_v34 = vld [vmem:[%s11472_s8 + $0x2a8] sm:$0xff]   ;;  %v2384_v51 = vcombine.high %v2362_v41, %v2362_v41 }
 0xebd   :  { %8612 = vmatpush3.bf16.msra.mxu1 %v9225_v9  ;;  %v2521_v19 = vmax.bf16 %v9591_v3, %v2505_v14  ;;  %v2523_v20 = vmax.bf16 %v9591_v3, %v2507_v15  ;;  %8634 = vmatpush3.bf16.msra.mxu0 %v9226_v13  ;;  %v2504_v9 = vadd.bf16 %v2422_v53, %v2274_v52  ;;  %v9251_v44 = vld [vmem:[%s11472_s8 + $0x180] sm:$0xff]  }
 0xebe   :  { %8613 = vmatprep.subr.bf16.mxu1 %v9227_v11  ;;  %8635 = vmatprep.subr.bf16.mxu0 %v9228_v17  ;;  %v10270_v39 = vpop.f32.mrf.mxu1  ;;  %v10275_v45 = vpop.f32.mrf.mxu0  ;;  %v2506_v13 = vadd.bf16 %v2436_v2, %v2276_v0  ;;  %v9253_v11 = vld [vmem:[%s11472_s8 + $0x2f8] sm:$0xff]   ;;  %v9275_v0 = vld [vmem:[%s11472_s8 + $0x290] sm:$0xff]   ;;  %v9276_v2 = vld [vmem:[%s11472_s8 + $0x248] sm:$0xff]  }
 0xebf   :  { %3674 = vmatprep.mubr.bf16.mxu1 %v2521_v19  ;;  %3715 = vmatprep.mubr.bf16.mxu0 %v2523_v20  ;;  %v9254_v17 = vld [vmem:[%s11472_s8 + $0x238] sm:$0xff]   ;;  %v2520_v19 = vmax.bf16 %v9591_v3, %v2504_v9  ;;  %v2278_v9 = vpack.c.bf16 %v10270_v39, %v10237_v25  ;;  %v9281_v25 = vld [vmem:[%s11472_s8 + $0x2c0] sm:$0xff]  }
 0xec0   :  { %v2138_v6 = vpop.f32.mrf.mxu1  ;;  %v2181_v59 = vpop.f32.mrf.mxu0  ;;  %v9255_v20 = vld [vmem:[%s11472_s8 + $0x2b8] sm:$0xff]  }
 0xec1   :  { %8614 = vmatpush3.bf16.msra.mxu1 %v9229_v21  ;;  %8636 = vmatpush3.bf16.msra.mxu0 %v9230_v12  ;;  %v2279_v56 = vpack.c.bf16 %v2138_v6, %v2134_v33  ;;  %v2281_v1 = vpack.c.bf16 %v2181_v59, %v2177_v54  ;;  %v2522_v21 = vmax.bf16 %v9591_v3, %v2506_v13  ;;  %v9256_v12 = vld [vmem:[%s11472_s8 + $0x270] sm:$0xff]   ;;  %v9262_v33 = vld [vmem:[%s11472_s8 + $0x228] sm:$0xff]   ;;  %v9265_v54 = vld [vmem:[%s11472_s8 + $0x2e0] sm:$0xff]  }
 0xec2   :  { %8615 = vmatprep.subr.bf16.mxu1 %v9231_v23  ;;  %8637 = vmatprep.subr.bf16.mxu0 %v9232_v24  ;;  %v9257_v24 = vld [vmem:[%s11472_s8 + $0x2f0] sm:$0xff]   ;;  %v9279_v13 = vld [vmem:[%s11472_s8 + $0x288] sm:$0xff]  }
 0xec3   :  { %v2509_v14 = vadd.bf16 %v2457_v61, %v2279_v56  ;;  %v2511_v15 = vadd.bf16 %v2471_v4, %v2281_v1  ;;  %v9272_v6 = vld [vmem:[%s11472_s8 + $0x250] sm:$0xff]   ;;  %v9277_v56 = vld [vmem:[%s11472_s8 + $0x2c8] sm:$0xff]  }
 0xec4   :  { %v9274_v59 = vld [vmem:[%s11472_s8 + $0x210] sm:$0xff]  }
 0xec5   :  { %8616 = vmatpush3.bf16.msra.mxu1 %v9233_v27  ;;  %8638 = vmatpush3.bf16.msra.mxu0 %v9234_v29  ;;  %v2525_v23 = vmax.bf16 %v9591_v3, %v2509_v14  ;;  %v2527_v27 = vmax.bf16 %v9591_v3, %v2511_v15  ;;  %v9258_v29 = vld [vmem:[%s11472_s8 + $0x230] sm:$0xff]   ;;  %v2280_v14 = vpack.c.bf16 %v10275_v45, %v10244_v28  ;;  %v9283_v28 = vld [vmem:[%s11472_s8 + $0x280] sm:$0xff]   ;;  %v9284_v45 = vld [vmem:[%s11472_s8 + $0x378] sm:$0xff]  }
 0xec6   :  { %8617 = vmatprep.subr.bf16.mxu1 %v9236_v30  ;;  %8639 = vmatprep.subr.bf16.mxu0 %v9237_v32  ;;  %v9259_v30 = vld [vmem:[%s11472_s8 + $0x2b0] sm:$0xff]   ;;  %v10349_v32 = vrot.slane %v2339_v26, %v10156_v8 }
 0xec9   :  { %8618 = vmatpush3.bf16.msra.mxu1 %v9238_v36  ;;  %8640 = vmatpush3.bf16.msra.mxu0 %v9239_v16  ;;  %v9264_v36 = vld [vmem:[%s11472_s8 + $0x260] sm:$0xff]   ;;  %v10363_v16 = vpop.f32.mrf.mxu1 }
 0xeca   :  { %8619 = vmatprep.subr.bf16.mxu1 %v9240_v55  ;;  %8641 = vmatprep.subr.bf16.mxu0 %v9241_v38  ;;  %v2355_v55 = vcombine.high %v10349_v32, %v10349_v32  ;;  %v10370_v38 = vpop.f32.mrf.mxu0 }
 0xecc   :  { %v2383_v47 = vrot.slane %v2355_v55, %v10156_v8  ;;  %v2263_v49 = vpop.f32.mrf.mxu0  ;;  %v9290_v55 = vld [vmem:[%s11472_s8 + $0x330] sm:$0xff]  }
 0xecd   :  { %8620 = vmatpush3.bf16.msra.mxu1 %v9242_v40  ;;  %8642 = vmatpush3.bf16.msra.mxu0 %v9243_v46  ;;  %v9268_v40 = vld [vmem:[%s11472_s8 + $0x258] sm:$0xff]  }
 0xece   :  { %8621 = vmatprep.subr.bf16.mxu1 %v9244_v58  ;;  %8643 = vmatprep.subr.bf16.mxu0 %v9245_v48  ;;  %v9269_v46 = vld [vmem:[%s11472_s8 + $0x2d8] sm:$0xff]   ;;  %v2220_v58 = vpop.f32.mrf.mxu1  ;;  %v2387_v53 = vcombine.high %v2383_v47, %v2383_v47  ;;  %v2480_v61 = vpack.i.b16 %v2383_v47, %v2383_v47  ;;  %v9297_v47 = vld [vmem:[%s11472_s8 + $0x3e0] sm:$0xff]  }
 0xecf   :  { %v9270_v48 = vld [vmem:[%s11472_s8 + $0x218] sm:$0xff]  }
 0xed0   :  { %v10396_v52 = vpop.f32.mrf.mxu1  ;;  %v2494_v4 = vpack.i.b16 %v2387_v53, %v2387_v53  ;;  %v9303_v53 = vld [vmem:[%s11472_s8 + $0x398] sm:$0xff]  }
 0xed1   :  { %8622 = vmatpush3.bf16.msra.mxu1 %v9246_v5  ;;  %8644 = vmatpush3.bf16.msra.mxu0 %v9247_v62  ;;  %v9273_v5 = vld [vmem:[%s11472_s8 + $0x2d0] sm:$0xff]   ;;  %v2445_v62 = vpack.i.b16 %v2362_v41, %v2362_v41  ;;  %v9294_v41 = vld [vmem:[%s11472_s8 + $0x328] sm:$0xff]  }
 0xed2   :  { %8623 = vmatprep.subr.bf16.mxu1 %v9248_v63  ;;  %8645 = vmatprep.subr.bf16.mxu0 %v9249_v42  ;;  %v10401_v63 = vpop.f32.mrf.mxu0  ;;  %v2459_v42 = vpack.i.b16 %v2384_v51, %v2384_v51  ;;  %v2224_v1 = vpop.f32.mrf.mxu1  ;;  %v9301_v51 = vld [vmem:[%s11472_s8 + $0x3d8] sm:$0xff]  }
 0xed3   :  { %v2283_v39 = vpack.c.bf16 %v2224_v1, %v2220_v58  ;;  %v9296_v58 = vld [vmem:[%s11472_s8 + $0x360] sm:$0xff]   ;;  %v9309_v1 = vld [vmem:[%s11472_s8 + $0x3c8] sm:$0xff]  }
 0xed4   :  { %v2464_v15 = vrot.slane %v2459_v42, %v10169_v22  ;;  %v9307_v42 = vld [vmem:[%s11472_s8 + $0x390] sm:$0xff]  }
 0xed5   :  { %8624 = vmatpush3.bf16.msra.mxu1 %v9250_v7  ;;  %8646 = vmatpush3.bf16.msra.mxu0 %v9251_v44  ;;  %v9278_v7 = vld [vmem:[%s11472_s8 + $0x208] sm:$0xff]   ;;  %v2450_v44 = vrot.slane %v2445_v62, %v10169_v22  ;;  %v9305_v62 = vld [vmem:[%s11472_s8 + $0x3d0] sm:$0xff]  }
 0xed6   :  { %8653 = vmatprep.subr.bf16.mxu1 %v9252_v57  ;;  %8675 = vmatprep.subr.bf16.mxu0 %v9253_v11  ;;  %v2267_v57 = vpop.f32.mrf.mxu0  ;;  %v9280_v11 = vld [vmem:[%s11472_s8 + $0x240] sm:$0xff]  }
 0xed8   :  { %3675 = vmatmul.mubr.bf16.vlgmr.msra.gmra.mxu1 %v2520_v19  ;;  %3716 = vmatmul.mubr.bf16.vlgmr.msra.gmra.mxu0 %v2522_v21  ;;  %v2285_v19 = vpack.c.bf16 %v2267_v57, %v2263_v49  ;;  %v9282_v21 = vld [vmem:[%s11472_s8 + $0x200] sm:$0xff]  }
 0xed9   :  { %8654 = vmatpush3.bf16.msra.mxu1 %v9254_v17  ;;  %3756 = vmatprep.mubr.bf16.mxu1 %v2525_v23  ;;  %v2485_v17 = vrot.slane %v2480_v61, %v10169_v22  ;;  %v2510_v23 = vadd.bf16 %v2464_v15, %v2280_v14  ;;  %v9299_v49 = vld [vmem:[%s11472_s8 + $0x3a0] sm:$0xff]  }
 0xeda   :  { %8676 = vmatpush3.bf16.msra.mxu0 %v9255_v20  ;;  %3797 = vmatprep.mubr.bf16.mxu0 %v2527_v27  ;;  %v2499_v20 = vrot.slane %v2494_v4, %v10169_v22  ;;  %v9310_v4 = vld [vmem:[%s11472_s8 + $0x308] sm:$0xff]   ;;  %v9312_v57 = vld [vmem:[%s11472_s8 + $0x340] sm:$0xff]  }
 0xedb   :  { %8655 = vmatprep.subr.bf16.mxu1 %v9256_v12  ;;  %8677 = vmatprep.subr.bf16.mxu0 %v9257_v24  ;;  %v2508_v12 = vadd.bf16 %v2450_v44, %v2278_v9  ;;  %v9285_v24 = vld [vmem:[%s11472_s8 + $0x3f8] sm:$0xff]   ;;  %v2513_v26 = vadd.bf16 %v2485_v17, %v2283_v39  ;;  %v9311_v44 = vld [vmem:[%s11472_s8 + $0x388] sm:$0xff]   ;;  %v9315_v15 = vld [vmem:[%s11472_s8 + $0x380] sm:$0xff]  }
 0xedc   :  { %v2515_v27 = vadd.bf16 %v2499_v20, %v2285_v19 }
 0xedd   :  { %8656 = vmatpush3.bf16.msra.mxu1 %v9258_v29  ;;  %v9286_v29 = vld [vmem:[%s11472_s8 + $0x338] sm:$0xff]  }
 0xede   :  { %8678 = vmatpush3.bf16.msra.mxu0 %v9259_v30  ;;  %8657 = vmatprep.subr.bf16.mxu1 %v9260_v31  ;;  %v2524_v30 = vmax.bf16 %v9591_v3, %v2508_v12  ;;  %v9287_v31 = vld [vmem:[%s11472_s8 + $0x3b8] sm:$0xff]  }
 0xedf   :  { %8679 = vmatprep.subr.bf16.mxu0 %v9261_v10  ;;  %v2526_v10 = vmax.bf16 %v9591_v3, %v2510_v23 }
 0xee1   :  { %8658 = vmatpush3.bf16.msra.mxu1 %v9262_v33  ;;  %v9288_v33 = vld [vmem:[%s11472_s8 + $0x370] sm:$0xff]  }
 0xee2   :  { %8680 = vmatpush3.bf16.msra.mxu0 %v9263_v34  ;;  %8659 = vmatprep.subr.bf16.mxu1 %v9264_v36  ;;  %v2529_v34 = vmax.bf16 %v9591_v3, %v2513_v26  ;;  %v9289_v36 = vld [vmem:[%s11472_s8 + $0x3f0] sm:$0xff]  }
 0xee3   :  { %8681 = vmatprep.subr.bf16.mxu0 %v9265_v54  ;;  %v2531_v54 = vmax.bf16 %v9591_v3, %v2515_v27 }
 0xee5   :  { %8660 = vmatpush3.bf16.msra.mxu1 %v9266_v60  ;;  %v9291_v60 = vld [vmem:[%s11472_s8 + $0x3b0] sm:$0xff]  }
 0xee6   :  { %8682 = vmatpush3.bf16.msra.mxu0 %v9267_v35  ;;  %8661 = vmatprep.subr.bf16.mxu1 %v9268_v40  ;;  %v9292_v35 = vld [vmem:[%s11472_s8 + $0x368] sm:$0xff]  }
 0xee7   :  { %8683 = vmatprep.subr.bf16.mxu0 %v9269_v46  ;;  %v9293_v40 = vld [vmem:[%s11472_s8 + $0x3e8] sm:$0xff]  }
 0xee8   :  { %v9295_v46 = vld [vmem:[%s11472_s8 + $0x3a8] sm:$0xff]  }
 0xee9   :  { %8662 = vmatpush3.bf16.msra.mxu1 %v9270_v48  ;;  %v9298_v48 = vld [vmem:[%s11472_s8 + $0x320] sm:$0xff]  }
 0xeea   :  { %8684 = vmatpush3.bf16.msra.mxu0 %v9271_v18  ;;  %8663 = vmatprep.subr.bf16.mxu1 %v9272_v6  ;;  %v9300_v18 = vld [vmem:[%s11472_s8 + $0x358] sm:$0xff]   ;;  %v2369_v6 = vrot.slane %v10349_v32, %v10156_v8  ;;  %v9304_v32 = vld [vmem:[%s11472_s8 + $0x350] sm:$0xff]  }
 0xeeb   :  { %8685 = vmatprep.subr.bf16.mxu0 %v9273_v5  ;;  %v9302_v5 = vld [vmem:[%s11472_s8 + $0x318] sm:$0xff]  }
 0xeed   :  { %8664 = vmatpush3.bf16.msra.mxu1 %v9274_v59  ;;  %v2385_v59 = vcombine.high %v2369_v6, %v2369_v6 }
 0xeee   :  { %8686 = vmatpush3.bf16.msra.mxu0 %v9275_v0  ;;  %8665 = vmatprep.subr.bf16.mxu1 %v9276_v2  ;;  %v9306_v0 = vld [vmem:[%s11472_s8 + $0x310] sm:$0xff]   ;;  %v2473_v2 = vpack.i.b16 %v2369_v6, %v2369_v6 }
 0xeef   :  { %8687 = vmatprep.subr.bf16.mxu0 %v9277_v56  ;;  %v9308_v56 = vld [vmem:[%s11472_s8 + $0x348] sm:$0xff]   ;;  %v2487_v61 = vpack.i.b16 %v2385_v59, %v2385_v59 }
 0xef0   :  { %v2478_v9 = vrot.slane %v2473_v2, %v10169_v22 }
 0xef1   :  { %8666 = vmatpush3.bf16.msra.mxu1 %v9278_v7  ;;  %v2282_v7 = vpack.c.bf16 %v10396_v52, %v10363_v16  ;;  %v9313_v16 = vld [vmem:[%s11472_s8 + $0x3c0] sm:$0xff]  }
 0xef2   :  { %8688 = vmatpush3.bf16.msra.mxu0 %v9279_v13  ;;  %8667 = vmatprep.subr.bf16.mxu1 %v9280_v11  ;;  %v2284_v13 = vpack.c.bf16 %v10401_v63, %v10370_v38  ;;  %v2492_v11 = vrot.slane %v2487_v61, %v10169_v22  ;;  %v9314_v52 = vld [vmem:[%s11472_s8 + $0x300] sm:$0xff]  }
 0xef3   :  { %8689 = vmatprep.subr.bf16.mxu0 %v9281_v25  ;;  %v2512_v14 = vadd.bf16 %v2478_v9, %v2282_v7 }
 0xef4   :  { %v2514_v38 = vadd.bf16 %v2492_v11, %v2284_v13 }
 0xef5   :  { %8668 = vmatpush3.bf16.msra.mxu1 %v9282_v21  ;;  %v2528_v63 = vmax.bf16 %v9591_v3, %v2512_v14 }
 0xef6   :  { %8690 = vmatpush3.bf16.msra.mxu0 %v9283_v28  ;;  %8697 = vmatprep.subr.bf16.mxu1 %v9284_v45  ;;  %v2530_v25 = vmax.bf16 %v9591_v3, %v2514_v38 }
 0xef7   :  { %8719 = vmatprep.subr.bf16.mxu0 %v9285_v24 }
 0xef8   :  { %3757 = vmatmul.mubr.bf16.vlgmr.msra.gmra.mxu1 %v2524_v30 }
 0xef9   :  { %3798 = vmatmul.mubr.bf16.vlgmr.msra.gmra.mxu0 %v2526_v10  ;;  %8698 = vmatpush3.bf16.msra.mxu1 %v9286_v29 }
 0xefa   :  { %3838 = vmatprep.mubr.bf16.mxu1 %v2529_v34  ;;  %8720 = vmatpush3.bf16.msra.mxu0 %v9287_v31 }
 0xefb   :  { %3879 = vmatprep.mubr.bf16.mxu0 %v2531_v54  ;;  %8699 = vmatprep.subr.bf16.mxu1 %v9288_v33  ;;  %v7889_v33 = vld [vmem:[%s11467_s3 + $0x8] ss:$0 sm:$0xff] }
 0xefc   :  { %8721 = vmatprep.subr.bf16.mxu0 %v9289_v36 }
 0xefd   :  { %8700 = vmatpush3.bf16.msra.mxu1 %v9290_v55 }
 0xefe   :  { %8722 = vmatpush3.bf16.msra.mxu0 %v9291_v60  ;;  %8701 = vmatprep.subr.bf16.mxu1 %v9292_v35 }
 0xeff   :  { %8723 = vmatprep.subr.bf16.mxu0 %v9293_v40 }
 0xf01   :  { %8702 = vmatpush3.bf16.msra.mxu1 %v9294_v41 }
 0xf02   :  { %8724 = vmatpush3.bf16.msra.mxu0 %v9295_v46  ;;  %8703 = vmatprep.subr.bf16.mxu1 %v9296_v58 }
 0xf03   :  { %8725 = vmatprep.subr.bf16.mxu0 %v9297_v47 }
 0xf05   :  { %8704 = vmatpush3.bf16.msra.mxu1 %v9298_v48 }
 0xf06   :  { %8726 = vmatpush3.bf16.msra.mxu0 %v9299_v49  ;;  %8705 = vmatprep.subr.bf16.mxu1 %v9300_v18 }
 0xf07   :  { %8727 = vmatprep.subr.bf16.mxu0 %v9301_v51 }
 0xf09   :  { %8706 = vmatpush3.bf16.msra.mxu1 %v9302_v5 }
 0xf0a   :  { %8728 = vmatpush3.bf16.msra.mxu0 %v9303_v53  ;;  %8707 = vmatprep.subr.bf16.mxu1 %v9304_v32 }
 0xf0b   :  { %8729 = vmatprep.subr.bf16.mxu0 %v9305_v62 }
 0xf0d   :  { %8708 = vmatpush3.bf16.msra.mxu1 %v9306_v0 }
 0xf0e   :  { %8730 = vmatpush3.bf16.msra.mxu0 %v9307_v42  ;;  %8709 = vmatprep.subr.bf16.mxu1 %v9308_v56 }
 0xf0f   :  { %8731 = vmatprep.subr.bf16.mxu0 %v9309_v1 }
 0xf11   :  { %8710 = vmatpush3.bf16.msra.mxu1 %v9310_v4 }
 0xf12   :  { %8732 = vmatpush3.bf16.msra.mxu0 %v9311_v44  ;;  %8711 = vmatprep.subr.bf16.mxu1 %v9312_v57 }
 0xf13   :  { %8733 = vmatprep.subr.bf16.mxu0 %v9313_v16 }
 0xf15   :  { %8712 = vmatpush3.bf16.msra.mxu1 %v9314_v52 }
 0xf16   :  { %8734 = vmatpush3.bf16.msra.mxu0 %v9315_v15 }
 0xf17   :  { %9079 = vmatprep.subr.mxu0 %v9575_v50 }
 0xf18   :  { %3839 = vmatmul.mubr.bf16.vlgmr.msra.gmra.mxu1 %v2528_v63 }
 0xf19   :  { %3880 = vmatmul.mubr.bf16.vlgmr.msra.gmra.mxu0 %v2530_v25 }
 0xf1a   :  { %9081 = vmatprep.mubr.msk.f32.mxu0 %vm9576_vm5, %v9575_v50 }
 0xf78   :  { %v8581_v39 = vpop.f32.mrf.mxu1  ;;  %v8603_v17 = vpop.f32.mrf.mxu0 }
 0xf7a   :  { %v8582_v19 = vpop.f32.mrf.mxu1  ;;  %v8604_v20 = vpop.f32.mrf.mxu0 }
 0xf7b   :  { %v8583_v10 = vadd.f32 %v8582_v19, %v8581_v39  ;;  %v8605_v40 = vadd.f32 %v8604_v20, %v8603_v17 }
 0xf7c   :  { %v8584_v21 = vpop.f32.mrf.mxu1  ;;  %v8606_v12 = vpop.f32.mrf.mxu0 }
 0xf7d   :  { %v3595_v54 = vadd.f32 %v8583_v10, %v7889_v33 }
 0xf7e   :  { %v8585_v28 = vpop.f32.mrf.mxu1  ;;  %v8607_v23 = vpop.f32.mrf.mxu0 }
 0xf7f   :  { %v8586_v55 = vadd.f32 %v8585_v28, %v8584_v21  ;;  %v3636_v46 = vadd.f32 %v8605_v40, %v3595_v54  ;;  %v8608_v49 = vadd.f32 %v8607_v23, %v8606_v12  ;;  %v8023_v54 = vld [vmem:[%s11468_s4 + $0x38] sm:$0xff]  ;;  %v8027_v40 = vld [vmem:[%s11467_s3 + $0xc] ss:$0 sm:$0xff] }
 0xf80   :  { %9063 = vmatprep.subr.mxu1 %v8023_v54 }
 0xf81   :  { %v3598_v58 = vadd.f32 %v8586_v55, %v7889_v33  ;;  %v8022_v55 = vld [vmem:[%s11468_s4 + $0x30] sm:$0xff]  ;;  %9064 = vmatpush3.msra.mxu1 %v8023_v54 }
 0xf82   :  { %9065 = vmatprep.subr.mxu1 %v8022_v55 }
 0xf83   :  { %v3639_v51 = vadd.f32 %v8608_v49, %v3598_v58  ;;  %9066 = vmatpush3.msra.mxu1 %v8022_v55 }
 0xf98   :  { %v8625_v45 = vpop.f32.mrf.mxu1  ;;  %v8647_v24 = vpop.f32.mrf.mxu0 }
 0xf9a   :  { %v8626_v26 = vpop.f32.mrf.mxu1  ;;  %v8648_v27 = vpop.f32.mrf.mxu0 }
 0xf9b   :  { %v8627_v41 = vadd.f32 %v8626_v26, %v8625_v45  ;;  %v8649_v5 = vadd.f32 %v8648_v27, %v8647_v24 }
 0xf9c   :  { %v8628_v29 = vpop.f32.mrf.mxu1  ;;  %v8650_v30 = vpop.f32.mrf.mxu0 }
 0xf9d   :  { %v3677_v18 = vadd.f32 %v8627_v41, %v3636_v46 }
 0xf9e   :  { %v8629_v31 = vpop.f32.mrf.mxu1  ;;  %v8651_v36 = vpop.f32.mrf.mxu0 }
 0xf9f   :  { %v8630_v6 = vadd.f32 %v8629_v31, %v8628_v29  ;;  %v3718_v62 = vadd.f32 %v8649_v5, %v3677_v18  ;;  %v8652_v2 = vadd.f32 %v8651_v36, %v8650_v30 }
 0xfa1   :  { %v3680_v0 = vadd.f32 %v8630_v6, %v3639_v51 }
 0xfa3   :  { %v3721_v4 = vadd.f32 %v8652_v2, %v3680_v0 }
 0xfb8   :  { %v8669_v34 = vpop.f32.mrf.mxu1 }
 0xfb9   :  { %v8691_v60 = vpop.f32.mrf.mxu0 }
 0xfba   :  { %v8670_v35 = vpop.f32.mrf.mxu1 }
 0xfbb   :  { %v8692_v47 = vpop.f32.mrf.mxu0  ;;  %v8671_v53 = vadd.f32 %v8670_v35, %v8669_v34  ;;  %v8020_v35 = vld [vmem:[%s11468_s4 + $0x20] sm:$0xff] }
 0xfbc   :  { %v8672_v48 = vpop.f32.mrf.mxu1  ;;  %v8693_v7 = vadd.f32 %v8692_v47, %v8691_v60  ;;  %v8021_v60 = vld [vmem:[%s11468_s4 + $0x28] sm:$0xff] }
 0xfbd   :  { %v8694_v32 = vpop.f32.mrf.mxu0  ;;  %v3759_v42 = vadd.f32 %v8671_v53, %v3718_v62  ;;  %9067 = vmatprep.subr.mxu1 %v8021_v60 }
 0xfbe   :  { %v8673_v59 = vpop.f32.mrf.mxu1  ;;  %9068 = vmatpush3.msra.mxu1 %v8021_v60 }
 0xfbf   :  { %v8674_v56 = vadd.f32 %v8673_v59, %v8672_v48  ;;  %v8695_v61 = vpop.f32.mrf.mxu0  ;;  %v3800_v57 = vadd.f32 %v8693_v7, %v3759_v42  ;;  %9069 = vmatprep.subr.mxu1 %v8020_v35  ;;  %v8018_v42 = vld [vmem:[%s11467_s3 + $0x9] ss:$0 sm:$0xff] }
 0xfc0   :  { %v8696_v14 = vadd.f32 %v8695_v61, %v8694_v32  ;;  %9070 = vmatpush3.msra.mxu1 %v8020_v35 }
 0xfc1   :  { %v3762_v13 = vadd.f32 %v8674_v56, %v3721_v4  ;;  %9074 = vmatprep.subr.mxu1 %v9575_v50 }
 0xfc3   :  { %v3803_v39 = vadd.f32 %v8696_v14, %v3762_v13 }
 0xfd8   :  { %v8713_v1 = vpop.f32.mrf.mxu1 }
 0xfd9   :  { %v8735_v9 = vpop.f32.mrf.mxu0 }
 0xfda   :  { %v8714_v44 = vpop.f32.mrf.mxu1 }
 0xfdb   :  { %v8715_v11 = vadd.f32 %v8714_v44, %v8713_v1  ;;  %v8736_v16 = vpop.f32.mrf.mxu0  ;;  %v8019_v1 = vld [vmem:[%s11467_s3 + $0xa] ss:$0 sm:$0xff] }
 0xfdc   :  { %v8716_v52 = vpop.f32.mrf.mxu1  ;;  %v8737_v38 = vadd.f32 %v8736_v16, %v8735_v9 }
 0xfdd   :  { %v3841_v15 = vadd.f32 %v8715_v11, %v3800_v57  ;;  %v8738_v63 = vpop.f32.mrf.mxu0 }
 0xfde   :  { %v8717_v25 = vpop.f32.mrf.mxu1 }
 0xfdf   :  { %v3882_v17 = vadd.f32 %v8737_v38, %v3841_v15  ;;  %v8718_v19 = vadd.f32 %v8717_v25, %v8716_v52  ;;  %v8739_v20 = vpop.f32.mrf.mxu0 }
 0xfe0   :  { %v8740_v28 = vadd.f32 %v8739_v20, %v8738_v63  ;;  %v8026_v63 = vld [vmem:[%s11467_s3 + $0xb] ss:$0 sm:$0xff]  ;;  %v10625_v20 = vld [vmem:[%s11466_s2] ss:$0 sm:$0xff] }
 0xfe1   :  { %v10555_v21 = vadd.f32 %v3882_v17, %v9906_v37  ;;  %v3844_v12 = vadd.f32 %v8718_v19, %v3803_v39 }
 0xfe3   :  { %v3885_v45 = vadd.f32 %v8740_v28, %v3844_v12  ;;  %v3899_v23 = vsel %vm64_vm0, %v10555_v21, 0.0 }
 0xfe4   :  { %3900 = vadd.xlane.f32.xlu0 %v3899_v23 }
 0xfe5   :  { %v10560_v24 = vadd.f32 %v3885_v45, %v9903_v43 }
 0xfe7   :  { %v3902_v26 = vsel %vm64_vm0, %v10560_v24, 0.0 }
 0xfe8   :  { %3903 = vadd.xlane.f32.xlu1 %v3902_v26  ;;  %v10632_v26 = vld [vmem:[%s11466_s2 + $0x1] ss:$0 sm:$0xff]  ;;  %s11478_s2 = smov 16  }
0x106d   :  { %v3901_v27 = vpop.xlane.xlu0 %3900 }
0x106e   :  { %v3905_v29 = vmul.f32 0.03125, %v3901_v27 }
0x1070   :  { %v3907_v30 = vsub.f32 %v10555_v21, %v3905_v29 }
0x1071   :  { %v3904_v37 = vpop.xlane.xlu1 %3903 }
0x1072   :  { %v3906_v31 = vmul.f32 0.03125, %v3904_v37  ;;  %v3909_v10 = vmul.f32 %v3907_v30, %v3907_v30  ;;  %v3937_v56 = vmul.f32 %v8018_v42, %v3907_v30  ;;  %v8028_v37 = vld [vmem:[%s11467_s3 + $0xd] ss:$0 sm:$0xff] }
0x1074   :  { %v3908_v33 = vsub.f32 %v10560_v24, %v3906_v31  ;;  %v3911_v34 = vsel %vm64_vm0, %v3909_v10, 0.0 }
0x1075   :  { %3912 = vadd.xlane.f32.xlu0 %v3911_v34 }
0x1076   :  { %v3910_v36 = vmul.f32 %v3908_v33, %v3908_v33  ;;  %v3938_v7 = vmul.f32 %v8018_v42, %v3908_v33 }
0x1078   :  { %v3914_v43 = vsel %vm64_vm0, %v3910_v36, 0.0 }
0x1079   :  { %3915 = vadd.xlane.f32.xlu1 %v3914_v43 }
0x108b   :  { %4048 = vrot.lane.b32.xlu0 %v8027_v40, %s9574_s23 }
0x10fe   :  { %v3913_v41 = vpop.xlane.xlu0 %3912 }
0x10ff   :  { %v3917_v46 = vmul.f32 0.032258064, %v3913_v41 }
0x1101   :  { %9494 = vrsqrt.f32 %v3917_v46  ;;  %vm3921_vm13 = vcmp.eq.f32.partialorder %v3917_v46, inf  ;;  %v3924_v18 = vand.u32 2147483648, %v3917_v46  ;;  %vm3923_vm14 = vcmp.eq.f32.partialorder %v3917_v46, 0.0 }
0x1102   :  { %v3916_v58 = vpop.xlane.xlu1 %3915  ;;  %v4049_v16 = vpop.permute.xlu0 %4048 }
0x1103   :  { %v3918_v47 = vmul.f32 0.032258064, %v3916_v58 }
0x1105   :  { %9496 = vrsqrt.f32 %v3918_v47  ;;  %vm3928_vm15 = vcmp.eq.f32.partialorder %v3918_v47, inf  ;;  %v3931_v59 = vand.u32 2147483648, %v3918_v47  ;;  %vm3930_vm1 = vcmp.eq.f32.partialorder %v3918_v47, 0.0 }
0x110e   :  { %v9495_v48 = vpop.eup %9494 }
0x110f   :  { %v3920_v49 = vmul.f32 %v9495_v48, %v3917_v46 }
0x1111   :  { %v3922_v6 = vsel %vm3921_vm13, %v3917_v46, %v3920_v49 }
0x1112   :  { %v9497_v51 = vpop.eup %9496  ;;  %v3925_v5 = vsel %vm3923_vm14, %v3924_v18, %v3922_v6 }
0x1113   :  { %v3939_v53 = vadd.f32 1e-06, %v3925_v5  ;;  %v3927_v32 = vmul.f32 %v9497_v51, %v3918_v47 }
0x1115   :  { %9498 = vrcp.f32 %v3939_v53  ;;  %v3929_v62 = vsel %vm3928_vm15, %v3918_v47, %v3927_v32 }
0x1116   :  { %v3932_v0 = vsel %vm3930_vm1, %v3931_v59, %v3929_v62 }
0x1117   :  { %v3940_v2 = vadd.f32 1e-06, %v3932_v0 }
0x1119   :  { %9500 = vrcp.f32 %v3940_v2 }
0x1122   :  { %v9499_v61 = vpop.eup %9498 }
0x1123   :  { %v3942_v4 = vmul.f32 %v9499_v61, %v3937_v56 }
0x1125   :  { %v3949_v9 = vadd.f32 %v8019_v1, %v3942_v4 }
0x1126   :  { %v9501_v44 = vpop.eup %9500 }
0x1127   :  { %v3944_v57 = vmul.f32 %v9501_v44, %v3938_v7  ;;  %9071 = vmatprep.mubr.msk.f32.mxu1 %vm64_vm0, %v3949_v9 }
0x1129   :  { %v3950_v13 = vadd.f32 %v8019_v1, %v3944_v57 }
0x112b   :  { %9072 = vmatmul.mubr.msk.f32.vlgmr.msra.gmra.mxu1 %vm64_vm0, %v3950_v13 }
0x112c   :  { %9076 = vmatprep.mubr.msk.f32.mxu1 %vm9576_vm5, %v9575_v50 }
0x11eb   :  { %v9073_v11 = vpop.f32.mrf.mxu1 }
0x11ec   :  { %v10599_v15 = vadd.f32 %v9073_v11, %v4049_v16  ;;  %v10615_v17 = vadd.f32 %v9073_v11, %v8026_v63 }
0x11ed   :  { %v4028_v52 = vpop.f32.mrf.mxu1 }
0x11ee   :  { %v10595_v14 = vadd.f32 %v4049_v16, %v4028_v52  ;;  %v10607_v25 = vadd.f32 %v8026_v63, %v4028_v52 }
0x11f0   :  { %4064 = vrot.lane.b32.xlu1 %v10595_v14, %s9577_s28 }
0x11f4   :  { %4142 = vrot.lane.b32.xlu1 %v10599_v15, %s9577_s28 }
0x1262   :  { %v4065_v38 = vpop.permute.xlu1 %4064 }
0x1263   :  { %9075 = vmatpush3.xpose.msk.msra.mxu1 %vm233_vm6, %v4065_v38 }
0x1264   :  { %9084 = vmatprep.subr.mxu1 %v9575_v50 }
0x1266   :  { %9077 = vmatmul.mubr.msk.f32.vlgmr.msra.gmra.mxu1 %vm233_vm6, %v10607_v25  ;;  %v4143_v39 = vpop.permute.xlu1 %4142 }
0x1267   :  { %9080 = vmatpush3.xpose.msk.msra.mxu0 %vm233_vm6, %v4143_v39  ;;  %9086 = vmatprep.mubr.msk.f32.mxu1 %vm9576_vm5, %v9575_v50 }
0x1268   :  { %9089 = vmatprep.subr.mxu0 %v9575_v50 }
0x126a   :  { %9082 = vmatmul.mubr.msk.f32.vlgmr.msra.gmra.mxu0 %vm233_vm6, %v10615_v17 }
0x126b   :  { %9091 = vmatprep.mubr.msk.f32.mxu0 %vm9576_vm5, %v9575_v50 }
0x1326   :  { %v4137_v19 = vpop.f32.mrf.mxu1 }
0x1327   :  { %v4138_v12 = vadd.f32 %v10625_v20, %v4137_v19 }
0x1328   :  { %v9078_v28 = vpop.f32.mrf.mxu1 }
0x1329   :  { %v4219_v45 = vsel %vm233_vm6, %v4138_v12, -inf }
0x132a   :  { %4220 = vmax.xlane.f32.xlu1 %v4219_v45  ;;  %v4215_v23 = vpop.f32.mrf.mxu0 }
0x132b   :  { %v4216_v27 = vadd.f32 %v10632_v26, %v4215_v23 }
0x132c   :  { %v9083_v29 = vpop.f32.mrf.mxu0 }
0x132d   :  { %v4222_v30 = vsel %vm233_vm6, %v4216_v27, -inf }
0x132e   :  { %4223 = vmax.xlane.f32.xlu0 %v4222_v30 }
0x1344   :  { %4058 = vrot.lane.b32.xlu0 %v8028_v37, %s9578_s1 }
0x13b3   :  { %v4221_v43 = vpop.xlane.xlu1 %4220 }
0x13b4   :  { %v4225_v54 = vsub.f32 %v4138_v12, %v4221_v43 }
0x13b6   :  { %v4227_v60 = vmul.f32 1.442695, %v4225_v54 }
0x13b7   :  { %v4224_v31 = vpop.xlane.xlu0 %4223 }
0x13b8   :  { %v4226_v36 = vsub.f32 %v4216_v27, %v4224_v31 }
0x13ba   :  { %v4229_v55 = vmul.f32 1.442695, %v4226_v36 }
0x13bb   :  { %v4059_v10 = vpop.permute.xlu0 %4058 }
0x13bc   :  { %v10640_v33 = vadd.f32 %v4059_v10, %v4028_v52  ;;  %v10642_v34 = vadd.f32 %v9073_v11, %v4059_v10  ;;  %9502 = vpow2.f32 %v4229_v55 }
0x13bd   :  { %9504 = vpow2.f32 %v4227_v60 }
0x13be   :  { %4319 = vrot.lane.b32.xlu0 %v10642_v34, %s9578_s1  ;;  %4242 = vrot.lane.b32.xlu1 %v10640_v33, %s9578_s1 }
0x13c2   :  { %4397 = vrot.lane.b32.xlu0 %v10595_v14, %s9579_s15  ;;  %4475 = vrot.lane.b32.xlu1 %v10599_v15, %s9579_s15 }
0x13c6   :  { %4395 = vrot.lane.b32.xlu0 %v10607_v25, %s9580_s16 }
0x13c9   :  { %v9503_v35 = vpop.eup %9502 }
0x13ca   :  { %v4234_v40 = vsel %vm233_vm6, %v9503_v35, 0.0  ;;  %v9505_v41 = vpop.eup %9504 }
0x13cb   :  { %v4231_v46 = vsel %vm233_vm6, %v9505_v41, 0.0 }
0x13e6   :  { %4235 = vadd.xlane.f32.xlu1 %v4234_v40 }
0x13ea   :  { %4232 = vadd.xlane.f32.xlu1 %v4231_v46 }
0x13fb   :  { %4473 = vrot.lane.b32.xlu1 %v10615_v17, %s9580_s16  ;;  %s9593_s16 = smov [#allocation2]  }
0x1430   :  { %v4320_v58 = vpop.permute.xlu0 %4319  ;;  %v4243_v47 = vpop.permute.xlu1 %4242 }
0x1431   :  { %9085 = vmatpush3.msra.mxu1 %v4243_v47  ;;  %9090 = vmatpush3.msra.mxu0 %v4320_v58 }
0x1432   :  { %9099 = vmatprep.subr.mxu0 %v9575_v50  ;;  %9094 = vmatprep.subr.mxu1 %v9575_v50 }
0x1434   :  { %v4476_v48 = vpop.permute.xlu1 %4475  ;;  %v4398_v53 = vpop.permute.xlu0 %4397 }
0x1438   :  { %v4396_v62 = vpop.permute.xlu0 %4395 }
0x146f   :  { %v4236_v49 = vpop.xlane.xlu1 %4235 }
0x1470   :  { %9506 = vrcp.f32 %v4236_v49 }
0x1473   :  { %v4233_v18 = vpop.xlane.xlu1 %4232 }
0x1474   :  { %9508 = vrcp.f32 %v4233_v18 }
0x1477   :  { %v4474_v59 = vpop.permute.xlu1 %4473 }
0x147d   :  { %v9507_v6 = vpop.eup %9506 }
0x147e   :  { %v4240_v51 = vmul.f32 %v9507_v6, %v9503_v35 }
0x1480   :  { %9092 = vmatmul.mubr.msk.f32.vlgmr.msra.gmra.mxu0 %vm233_vm6, %v4240_v51 }
0x1481   :  { %v9509_v5 = vpop.eup %9508  ;;  %9100 = vmatpush3.xpose.msk.msra.mxu0 %vm233_vm6, %v4476_v48  ;;  %9101 = vmatprep.mubr.msk.f32.mxu0 %vm9576_vm5, %v9575_v50 }
0x1482   :  { %v4239_v32 = vmul.f32 %v9509_v5, %v9505_v41  ;;  %9109 = vmatprep.subr.mxu0 %v9575_v50 }
0x1484   :  { %9087 = vmatmul.mubr.msk.f32.vlgmr.msra.gmra.mxu1 %vm233_vm6, %v4239_v32  ;;  %9102 = vmatmul.mubr.msk.f32.vlgmr.msra.gmra.mxu0 %vm233_vm6, %v4474_v59 }
0x1485   :  { %9095 = vmatpush3.xpose.msk.msra.mxu1 %vm233_vm6, %v4398_v53  ;;  %9096 = vmatprep.mubr.msk.f32.mxu1 %vm9576_vm5, %v9575_v50 }
0x1486   :  { %9104 = vmatprep.subr.mxu1 %v9575_v50  ;;  %9111 = vmatprep.mubr.msk.f32.mxu0 %vm9576_vm5, %v9575_v50 }
0x1488   :  { %9097 = vmatmul.mubr.msk.f32.vlgmr.msra.gmra.mxu1 %vm233_vm6, %v4396_v62 }
0x1489   :  { %9106 = vmatprep.mubr.msk.f32.mxu1 %vm9576_vm5, %v9575_v50 }
0x1540   :  { %v10676_v0 = vpop.f32.mrf.mxu0 }
0x1542   :  { %v9093_v2 = vpop.f32.mrf.mxu0 }
0x1544   :  { %v10678_v42 = vpop.f32.mrf.mxu1  ;;  %v4547_v56 = vpop.f32.mrf.mxu0 }
0x1545   :  { %v4548_v61 = vadd.f32 %v10632_v26, %v4547_v56 }
0x1546   :  { %v9088_v1 = vpop.f32.mrf.mxu1  ;;  %v9103_v4 = vpop.f32.mrf.mxu0 }
0x1547   :  { %v4554_v7 = vsel %vm233_vm6, %v4548_v61, -inf }
0x1548   :  { %v4469_v9 = vpop.f32.mrf.mxu1  ;;  %4555 = vmax.xlane.f32.xlu1 %v4554_v7 }
0x1549   :  { %v4470_v44 = vadd.f32 %v10625_v20, %v4469_v9 }
0x154a   :  { %v9098_v57 = vpop.f32.mrf.mxu1 }
0x154b   :  { %v4551_v13 = vsel %vm233_vm6, %v4470_v44, -inf }
0x154c   :  { %4552 = vmax.xlane.f32.xlu0 %v4551_v13 }
0x1559   :  { %4649 = vrot.lane.b32.xlu1 %v10642_v34, %s9581_s17 }
0x155d   :  { %4727 = vrot.lane.b32.xlu1 %v10595_v14, %s9582_s18 }
0x1561   :  { %4805 = vrot.lane.b32.xlu1 %v10599_v15, %s9582_s18 }
0x1565   :  { %4803 = vrot.lane.b32.xlu1 %v10615_v17, %s9583_s19 }
0x15d1   :  { %v4556_v11 = vpop.xlane.xlu1 %4555 }
0x15d2   :  { %v4558_v16 = vsub.f32 %v4548_v61, %v4556_v11 }
0x15d4   :  { %v4561_v52 = vmul.f32 1.442695, %v4558_v16 }
0x15d5   :  { %v4553_v38 = vpop.xlane.xlu0 %4552  ;;  %v4650_v63 = vpop.permute.xlu1 %4649 }
0x15d6   :  { %9510 = vpow2.f32 %v4561_v52  ;;  %v4557_v39 = vsub.f32 %v4470_v44, %v4553_v38  ;;  %9110 = vmatpush3.msra.mxu0 %v4650_v63 }
0x15d7   :  { %9119 = vmatprep.subr.mxu0 %v9575_v50 }
0x15d8   :  { %v4559_v19 = vmul.f32 1.442695, %v4557_v39 }
0x15d9   :  { %v4728_v30 = vpop.permute.xlu1 %4727 }
0x15da   :  { %9512 = vpow2.f32 %v4559_v19 }
0x15dd   :  { %v4806_v10 = vpop.permute.xlu1 %4805 }
0x15e1   :  { %v4804_v55 = vpop.permute.xlu1 %4803 }
0x15e3   :  { %v9511_v12 = vpop.eup %9510 }
0x15e4   :  { %v4566_v28 = vsel %vm233_vm6, %v9511_v12, 0.0 }
0x15e5   :  { %4567 = vadd.xlane.f32.xlu0 %v4566_v28 }
0x15e7   :  { %v9513_v45 = vpop.eup %9512 }
0x15e8   :  { %v4563_v23 = vsel %vm233_vm6, %v9513_v45, 0.0 }
0x15e9   :  { %4564 = vadd.xlane.f32.xlu0 %v4563_v23 }
0x15ff   :  { %4573 = vrot.lane.b32.xlu0 %v10640_v33, %s9581_s17  ;;  %s7800_s17 = sshll.u32 %s9593_s16, 4  ;;  %s7801_s17 = int_to_ptr.vmem [resolvable:$true] %s7800_s17 }
0x1600   :  { %p9557_p1 = scmp.lt.s32.totalorder %s7801_s17, %s7801_s17 }
0x1603   :  { %4725 = vrot.lane.b32.xlu0 %v10607_v25, %s9583_s19 }
0x166e   :  { %v4568_v27 = vpop.xlane.xlu0 %4567 }
0x166f   :  { %9514 = vrcp.f32 %v4568_v27 }
0x1672   :  { %v4565_v29 = vpop.xlane.xlu0 %4564 }
0x1673   :  { %9516 = vrcp.f32 %v4565_v29 }
0x1676   :  { %v4574_v37 = vpop.permute.xlu0 %4573 }
0x1677   :  { %9105 = vmatpush3.msra.mxu1 %v4574_v37 }
0x1678   :  { %9114 = vmatprep.subr.mxu1 %v9575_v50 }
0x167a   :  { %v4726_v60 = vpop.permute.xlu0 %4725 }
0x167c   :  { %v9515_v31 = vpop.eup %9514 }
0x167d   :  { %v4572_v36 = vmul.f32 %v9515_v31, %v9511_v12 }
0x167f   :  { %9112 = vmatmul.mubr.msk.f32.vlgmr.msra.gmra.mxu0 %vm233_vm6, %v4572_v36 }
0x1680   :  { %v9517_v43 = vpop.eup %9516  ;;  %9120 = vmatpush3.xpose.msk.msra.mxu0 %vm233_vm6, %v4806_v10  ;;  %9121 = vmatprep.mubr.msk.f32.mxu0 %vm9576_vm5, %v9575_v50 }
0x1681   :  { %v4571_v54 = vmul.f32 %v9517_v43, %v9513_v45  ;;  %9129 = vmatprep.subr.mxu0 %v9575_v50 }
0x1683   :  { %9107 = vmatmul.mubr.msk.f32.vlgmr.msra.gmra.mxu1 %vm233_vm6, %v4571_v54  ;;  %9122 = vmatmul.mubr.msk.f32.vlgmr.msra.gmra.mxu0 %vm233_vm6, %v4804_v55 }
0x1684   :  { %9115 = vmatpush3.xpose.msk.msra.mxu1 %vm233_vm6, %v4728_v30  ;;  %9116 = vmatprep.mubr.msk.f32.mxu1 %vm9576_vm5, %v9575_v50 }
0x1685   :  { %9124 = vmatprep.subr.mxu1 %v9575_v50  ;;  %9131 = vmatprep.mubr.msk.f32.mxu0 %vm9576_vm5, %v9575_v50 }
0x1687   :  { %9117 = vmatmul.mubr.msk.f32.vlgmr.msra.gmra.mxu1 %vm233_vm6, %v4726_v60 }
0x1688   :  { %9126 = vmatprep.mubr.msk.f32.mxu1 %vm9576_vm5, %v9575_v50 }
0x173f   :  { %v10716_v35 = vpop.f32.mrf.mxu0 }
0x1741   :  { %v9113_v40 = vpop.f32.mrf.mxu0 }
0x1743   :  { %v10718_v41 = vpop.f32.mrf.mxu1  ;;  %v4877_v46 = vpop.f32.mrf.mxu0 }
0x1744   :  { %v4878_v58 = vadd.f32 %v10632_v26, %v4877_v46 }
0x1745   :  { %v9108_v47 = vpop.f32.mrf.mxu1  ;;  %v9123_v48 = vpop.f32.mrf.mxu0 }
0x1746   :  { %v4884_v49 = vsel %vm233_vm6, %v4878_v58, -inf }
0x1747   :  { %v4799_v18 = vpop.f32.mrf.mxu1  ;;  %4885 = vmax.xlane.f32.xlu1 %v4884_v49 }
0x1748   :  { %v4800_v6 = vadd.f32 %v10625_v20, %v4799_v18  ;;  %v8055_v18 = vld [vmem:[%s11469_s5 + $0x30] sm:$0xff] }
0x1749   :  { %v9118_v51 = vpop.f32.mrf.mxu1 }
0x174a   :  { %v4881_v5 = vsel %vm233_vm6, %v4800_v6, -inf  ;;  %v8053_v51 = vld [vmem:[%s11469_s5 + $0x20] sm:$0xff] }
0x174b   :  { %4882 = vmax.xlane.f32.xlu0 %v4881_v5 }
0x1758   :  { %4979 = vrot.lane.b32.xlu1 %v10642_v34, %s9584_s20 }
0x175c   :  { %5057 = vrot.lane.b32.xlu1 %v10595_v14, %s9585_s21 }
0x1760   :  { %5135 = vrot.lane.b32.xlu1 %v10599_v15, %s9585_s21 }
0x1764   :  { %5133 = vrot.lane.b32.xlu1 %v10615_v17, %s9586_s22 }
0x17d0   :  { %v4886_v53 = vpop.xlane.xlu1 %4885 }
0x17d1   :  { %v4888_v32 = vsub.f32 %v4878_v58, %v4886_v53 }
0x17d3   :  { %v4891_v59 = vmul.f32 1.442695, %v4888_v32 }
0x17d4   :  { %v4883_v62 = vpop.xlane.xlu0 %4882  ;;  %v4980_v2 = vpop.permute.xlu1 %4979 }
0x17d5   :  { %9518 = vpow2.f32 %v4891_v59  ;;  %v4887_v56 = vsub.f32 %v4800_v6, %v4883_v62  ;;  %9130 = vmatpush3.msra.mxu0 %v4980_v2  ;;  %v8054_v6 = vld [vmem:[%s11469_s5 + $0x28] sm:$0xff] }
0x17d6   :  { %9139 = vmatprep.subr.mxu0 %v9575_v50 }
0x17d7   :  { %v4889_v61 = vmul.f32 1.442695, %v4887_v56 }
0x17d8   :  { %v5058_v9 = vpop.permute.xlu1 %5057 }
0x17d9   :  { %9520 = vpow2.f32 %v4889_v61 }
0x17dc   :  { %v5136_v13 = vpop.permute.xlu1 %5135 }
0x17e0   :  { %v5134_v52 = vpop.permute.xlu1 %5133 }
0x17e2   :  { %v9519_v1 = vpop.eup %9518 }
0x17e3   :  { %v4896_v14 = vsel %vm233_vm6, %v9519_v1, 0.0 }
0x17e4   :  { %4897 = vadd.xlane.f32.xlu0 %v4896_v14 }
0x17e6   :  { %v9521_v15 = vpop.eup %9520 }
0x17e7   :  { %v4893_v4 = vsel %vm233_vm6, %v9521_v15, 0.0 }
0x17e8   :  { %4894 = vadd.xlane.f32.xlu0 %v4893_v4 }
0x17fe   :  { %4903 = vrot.lane.b32.xlu0 %v10640_v33, %s9584_s20 }
0x1802   :  { %5055 = vrot.lane.b32.xlu0 %v10607_v25, %s9586_s22  ;;  %s11479_s22 = smov 24  }
0x186d   :  { %v4898_v17 = vpop.xlane.xlu0 %4897 }
0x186e   :  { %9522 = vrcp.f32 %v4898_v17 }
0x1871   :  { %v4895_v7 = vpop.xlane.xlu0 %4894 }
0x1872   :  { %9524 = vrcp.f32 %v4895_v7 }
0x1875   :  { %v4904_v44 = vpop.permute.xlu0 %4903 }
0x1876   :  { %9125 = vmatpush3.msra.mxu1 %v4904_v44 }
0x1877   :  { %9134 = vmatprep.subr.mxu1 %v9575_v50 }
0x1879   :  { %v5056_v38 = vpop.permute.xlu0 %5055 }
0x187b   :  { %v9523_v57 = vpop.eup %9522 }
0x187c   :  { %v4902_v11 = vmul.f32 %v9523_v57, %v9519_v1 }
0x187e   :  { %9132 = vmatmul.mubr.msk.f32.vlgmr.msra.gmra.mxu0 %vm233_vm6, %v4902_v11 }
0x187f   :  { %v9525_v16 = vpop.eup %9524  ;;  %9140 = vmatpush3.xpose.msk.msra.mxu0 %vm233_vm6, %v5136_v13  ;;  %9141 = vmatprep.mubr.msk.f32.mxu0 %vm9576_vm5, %v9575_v50 }
0x1880   :  { %v4901_v25 = vmul.f32 %v9525_v16, %v9521_v15  ;;  %9149 = vmatprep.subr.mxu0 %v9575_v50 }
0x1882   :  { %9127 = vmatmul.mubr.msk.f32.vlgmr.msra.gmra.mxu1 %vm233_vm6, %v4901_v25  ;;  %9142 = vmatmul.mubr.msk.f32.vlgmr.msra.gmra.mxu0 %vm233_vm6, %v5134_v52 }
0x1883   :  { %9135 = vmatpush3.xpose.msk.msra.mxu1 %vm233_vm6, %v5058_v9  ;;  %9136 = vmatprep.mubr.msk.f32.mxu1 %vm9576_vm5, %v9575_v50 }
0x1884   :  { %9144 = vmatprep.subr.mxu1 %v9575_v50  ;;  %9151 = vmatprep.mubr.msk.f32.mxu0 %vm9576_vm5, %v9575_v50 }
0x1886   :  { %9137 = vmatmul.mubr.msk.f32.vlgmr.msra.gmra.mxu1 %vm233_vm6, %v5056_v38 }
0x1887   :  { %9146 = vmatprep.mubr.msk.f32.mxu1 %vm9576_vm5, %v9575_v50 }
0x193e   :  { %v5051_v63 = vpop.f32.mrf.mxu0 }
0x1940   :  { %v9133_v39 = vpop.f32.mrf.mxu0 }
0x1942   :  { %v4975_v19 = vpop.f32.mrf.mxu1  ;;  %v5207_v12 = vpop.f32.mrf.mxu0 }
0x1943   :  { %v5208_v28 = vadd.f32 %v10632_v26, %v5207_v12 }
0x1944   :  { %v9128_v45 = vpop.f32.mrf.mxu1  ;;  %v9143_v23 = vpop.f32.mrf.mxu0 }
0x1945   :  { %v5214_v27 = vsel %vm233_vm6, %v5208_v28, -inf }
0x1946   :  { %v5129_v29 = vpop.f32.mrf.mxu1  ;;  %5215 = vmax.xlane.f32.xlu1 %v5214_v27 }
0x1947   :  { %v5130_v30 = vadd.f32 %v10625_v20, %v5129_v29  ;;  %v8078_v29 = vld [vmem:[%s11470_s6 + $0x180] sm:$0xff] }
0x1948   :  { %v9138_v37 = vpop.f32.mrf.mxu1 }
0x1949   :  { %v5211_v31 = vsel %vm233_vm6, %v5130_v30, -inf  ;;  %v8079_v37 = vld [vmem:[%s11470_s6 + $0x188] sm:$0xff] }
0x194a   :  { %5212 = vmax.xlane.f32.xlu0 %v5211_v31 }
0x1957   :  { %5309 = vrot.lane.b32.xlu1 %v10642_v34, %s9587_s24 }
0x195b   :  { %5387 = vrot.lane.b32.xlu1 %v10718_v41, %s9588_s25 }
0x195f   :  { %5389 = vrot.lane.b32.xlu1 %v10716_v35, %s9588_s25 }
0x1963   :  { %5397 = vrot.lane.b32.xlu1 %v5051_v63, %s11478_s2 }
0x19cf   :  { %v5216_v50 = vpop.xlane.xlu1 %5215 }
0x19d0   :  { %v5218_v26 = vsub.f32 %v5208_v28, %v5216_v50 }
0x19d2   :  { %v5221_v10 = vmul.f32 1.442695, %v5218_v26  ;;  %v8087_v26 = vld [vmem:[%s11470_s6 + $0x1c8] sm:$0xff] }
0x19d3   :  { %v5213_v36 = vpop.xlane.xlu0 %5212  ;;  %v5310_v20 = vpop.permute.xlu1 %5309 }
0x19d4   :  { %9526 = vpow2.f32 %v5221_v10  ;;  %v5217_v43 = vsub.f32 %v5130_v30, %v5213_v36  ;;  %9150 = vmatpush3.msra.mxu0 %v5310_v20  ;;  %v8086_v30 = vld [vmem:[%s11470_s6 + $0x1c0] sm:$0xff]  ;;  %v8112_v20 = vcombine.low %v8079_v37, %v8087_v26 }
0x19d5   :  { %v8110_v31 = vcombine.low %v8078_v29, %v8086_v30  ;;  %v8111_v50 = vcombine.high %v8078_v29, %v8086_v30  ;;  %v8062_v10 = vld [vmem:[%s11470_s6 + $0x100] sm:$0xff]  ;;  %v8083_v29 = vld [vmem:[%s11470_s6 + $0x1a8] sm:$0xff] }
0x19d6   :  { %v5219_v54 = vmul.f32 1.442695, %v5217_v43  ;;  %v8070_v36 = vld [vmem:[%s11470_s6 + $0x140] sm:$0xff]  ;;  %v8113_v43 = vcombine.high %v8079_v37, %v8087_v26  ;;  %v8091_v30 = vld [vmem:[%s11470_s6 + $0x1e8] sm:$0xff] }
0x19d7   :  { %v5388_v62 = vpop.permute.xlu1 %5387  ;;  %5770 = vmatprep.subr.bf16.mxu0 %v8111_v50  ;;  %v8121_v26 = vcombine.high %v8083_v29, %v8091_v30 }
0x19d8   :  { %9528 = vpow2.f32 %v5219_v54  ;;  %v5409_v1 = vsel %vm233_vm6, %v10678_v42, %v5388_v62  ;;  %v8059_v42 = vld [vmem:[%s11467_s3 + $0xe] ss:$0 sm:$0xff]  ;;  %v8095_v54 = vcombine.high %v8062_v10, %v8070_v36 }
0x19db   :  { %v5390_v2 = vpop.permute.xlu1 %5389 }
0x19dc   :  { %v5410_v15 = vsel %vm233_vm6, %v10676_v0, %v5390_v2 }
0x19df   :  { %v5398_v56 = vpop.permute.xlu1 %5397 }
0x19e0   :  { %v5412_v7 = vsel %vm1579_vm8, %v5410_v15, %v5398_v56 }
0x19e1   :  { %v9527_v55 = vpop.eup %9526 }
0x19e2   :  { %v5226_v34 = vsel %vm233_vm6, %v9527_v55, 0.0 }
0x19e3   :  { %5227 = vadd.xlane.f32.xlu0 %v5226_v34  ;;  %v8071_v34 = vld [vmem:[%s11470_s6 + $0x148] sm:$0xff] }
0x19e5   :  { %v9529_v60 = vpop.eup %9528 }
0x19e6   :  { %v5223_v40 = vsel %vm233_vm6, %v9529_v60, 0.0 }
0x19e7   :  { %5224 = vadd.xlane.f32.xlu0 %v5223_v40  ;;  %v8094_v40 = vcombine.low %v8062_v10, %v8070_v36  ;;  %v8066_v10 = vld [vmem:[%s11470_s6 + $0x120] sm:$0xff] }
0x19e8   :  { %v8074_v36 = vld [vmem:[%s11470_s6 + $0x160] sm:$0xff] }
0x19fd   :  { %5233 = vrot.lane.b32.xlu0 %v10640_v33, %s9587_s24  ;;  %v8056_v33 = vld [vmem:[%s11469_s5 + $0x38] sm:$0xff] }
0x1a01   :  { %5395 = vrot.lane.b32.xlu0 %v4975_v19, %s11478_s2 }
0x1a6c   :  { %v5228_v35 = vpop.xlane.xlu0 %5227 }
0x1a6d   :  { %9530 = vrcp.f32 %v5228_v35 }
0x1a70   :  { %v5225_v41 = vpop.xlane.xlu0 %5224 }
0x1a71   :  { %9532 = vrcp.f32 %v5225_v41  ;;  %v8080_v41 = vld [vmem:[%s11470_s6 + $0x190] sm:$0xff] }
0x1a74   :  { %v5234_v46 = vpop.permute.xlu0 %5233 }
0x1a75   :  { %9145 = vmatpush3.msra.mxu1 %v5234_v46  ;;  %v8088_v46 = vld [vmem:[%s11470_s6 + $0x1d0] sm:$0xff] }
0x1a76   :  { %9154 = vmatprep.subr.mxu1 %v8056_v33 }
0x1a78   :  { %v5396_v61 = vpop.permute.xlu0 %5395 }
0x1a79   :  { %v5411_v4 = vsel %vm1579_vm8, %v5409_v1, %v5396_v61 }
0x1a7a   :  { %v9531_v58 = vpop.eup %9530 }
0x1a7b   :  { %v5232_v47 = vmul.f32 %v9531_v58, %v9527_v55  ;;  %v8063_v55 = vld [vmem:[%s11470_s6 + $0x108] sm:$0xff]  ;;  %v8081_v58 = vld [vmem:[%s11470_s6 + $0x198] sm:$0xff] }
0x1a7c   :  { %v8096_v35 = vcombine.low %v8063_v55, %v8071_v34 }
0x1a7d   :  { %9152 = vmatmul.mubr.msk.f32.vlgmr.msra.gmra.mxu0 %vm233_vm6, %v5232_v47  ;;  %v8114_v47 = vcombine.low %v8080_v41, %v8088_v46 }
0x1a7e   :  { %v9533_v48 = vpop.eup %9532  ;;  %5790 = vmatprep.mubr.bf16.mxu0 %v9591_v3  ;;  %5771 = vmatpush1.bf16.msra.mxu0 %v8110_v31 }
0x1a7f   :  { %v5231_v49 = vmul.f32 %v9533_v48, %v9529_v60  ;;  %v8097_v60 = vcombine.high %v8063_v55, %v8071_v34  ;;  %5772 = vmatprep.subr.bf16.mxu0 %v8095_v54  ;;  %v8115_v48 = vcombine.high %v8080_v41, %v8088_v46  ;;  %v8120_v55 = vcombine.low %v8083_v29, %v8091_v30  ;;  %v8085_v41 = vld [vmem:[%s11470_s6 + $0x1b8] sm:$0xff]  ;;  %v9343_v29 = vld [vmem:[%s11472_s8 + $0x488] sm:$0xff]   ;;  %v9344_v30 = vld [vmem:[%s11472_s8 + $0x440] sm:$0xff]  }
0x1a80   :  { %v8103_v34 = vcombine.high %v8066_v10, %v8074_v36  ;;  %v8093_v46 = vld [vmem:[%s11470_s6 + $0x1f8] sm:$0xff] }
0x1a81   :  { %9147 = vmatmul.mubr.msk.f32.vlgmr.msra.gmra.mxu1 %vm233_vm6, %v5231_v49  ;;  %v8089_v49 = vld [vmem:[%s11470_s6 + $0x1d8] sm:$0xff] }
0x1a82   :  { %9155 = vmatpush3.msra.mxu1 %v8056_v33  ;;  %5773 = vmatpush1.bf16.msra.mxu0 %v8094_v40  ;;  %v8116_v33 = vcombine.low %v8081_v58, %v8089_v49  ;;  %v8084_v40 = vld [vmem:[%s11470_s6 + $0x1b0] sm:$0xff] }
0x1a83   :  { %9156 = vmatprep.subr.mxu1 %v8055_v18  ;;  %5856 = vmatprep.subr.bf16.mxu0 %v8115_v48 }
0x1a84   :  { %9157 = vmatpush3.msra.mxu1 %v8055_v18  ;;  %v8117_v18 = vcombine.high %v8081_v58, %v8089_v49  ;;  %v8102_v58 = vcombine.low %v8066_v10, %v8074_v36  ;;  %v8125_v49 = vcombine.high %v8085_v41, %v8093_v46  ;;  %v9350_v10 = vld [vmem:[%s11472_s8 + $0x5f8] sm:$0xff]   ;;  %v6118_v36 = vld [vmem:[%s11471_s7] sm:$0xff] }
0x1a85   :  { %9158 = vmatprep.subr.mxu1 %v8054_v6 }
0x1a86   :  { %9159 = vmatpush3.msra.mxu1 %v8054_v6 }
0x1a87   :  { %9160 = vmatprep.subr.mxu1 %v8053_v51 }
0x1a88   :  { %9161 = vmatpush3.msra.mxu1 %v8053_v51 }
0x1a89   :  { %5813 = vmatprep.subr.bf16.mxu1 %v8113_v43  ;;  %v8075_v43 = vld [vmem:[%s11470_s6 + $0x168] sm:$0xff] }
0x1b3d   :  { %v5381_v5 = vpop.f32.mrf.mxu0 }
0x1b3e   :  { %5405 = vrot.lane.b32.xlu1 %v5381_v5, %s11479_s22 }
0x1b3f   :  { %v9153_v53 = vpop.f32.mrf.mxu0 }
0x1b41   :  { %v5305_v32 = vpop.f32.mrf.mxu1 }
0x1b42   :  { %5403 = vrot.lane.b32.xlu0 %v5305_v32, %s11479_s22 }
0x1b43   :  { %v9148_v59 = vpop.f32.mrf.mxu1 }
0x1bb0   :  { %v5406_v14 = vpop.permute.xlu1 %5405 }
0x1bb1   :  { %v5414_v44 = vsel %vm1582_vm7, %v5412_v7, %v5406_v14 }
0x1bb4   :  { %v5404_v17 = vpop.permute.xlu0 %5403 }
0x1bb5   :  { %v5413_v9 = vsel %vm1582_vm7, %v5411_v4, %v5404_v17 }
0x1bb6   :  { %9162 = vmatprep.mubr.msk.f32.mxu1 %vm64_vm0, %v5413_v9 }
0x1bb7   :  { %9163 = vmatmul.mubr.msk.f32.vlgmr.msra.gmra.mxu1 %vm64_vm0, %v5414_v44  ;;  %v8060_v44 = vld [vmem:[%s11467_s3 + $0xf] ss:$0 sm:$0xff] }
0x1bb8   :  { %5833 = vmatprep.mubr.bf16.mxu1 %v9591_v3  ;;  %5814 = vmatpush1.bf16.msra.mxu1 %v8112_v20  ;;  %v8067_v20 = vld [vmem:[%s11470_s6 + $0x128] sm:$0xff] }
0x1bb9   :  { %5815 = vmatprep.subr.bf16.mxu1 %v8097_v60  ;;  %v8105_v60 = vcombine.high %v8067_v20, %v8075_v43 }
0x1bbc   :  { %5816 = vmatpush1.bf16.msra.mxu1 %v8096_v35  ;;  %v8092_v35 = vld [vmem:[%s11470_s6 + $0x1f0] sm:$0xff] }
0x1bbd   :  { %5899 = vmatprep.subr.bf16.mxu1 %v8117_v18  ;;  %v8123_v48 = vcombine.high %v8084_v40, %v8092_v35  ;;  %v8076_v18 = vld [vmem:[%s11470_s6 + $0x170] sm:$0xff] }
0x1c77   :  { %v9164_v0 = vpop.f32.mrf.mxu1 }
0x1c78   :  { %v5502_v57 = vadd.f32 %v9164_v0, %v10560_v24 }
0x1c79   :  { %v5492_v13 = vpop.f32.mrf.mxu1 }
0x1c7a   :  { %v10804_v11 = vadd.f32 %v8059_v42, %v5502_v57  ;;  %v5501_v16 = vadd.f32 %v5492_v13, %v10555_v21 }
0x1c7c   :  { %v10807_v25 = vadd.f32 %v8059_v42, %v5501_v16  ;;  %v5512_v52 = vsel %vm64_vm0, %v10804_v11, 0.0  ;;  %v8061_v16 = vld [vmem:[%s11467_s3 + $0x10] ss:$0 sm:$0xff] }
0x1c7d   :  { %5513 = vadd.xlane.f32.xlu1 %v5512_v52 }
0x1c7e   :  { %v5509_v38 = vsel %vm64_vm0, %v10807_v25, 0.0 }
0x1c7f   :  { %5510 = vadd.xlane.f32.xlu0 %v5509_v38  ;;  %v8064_v38 = vld [vmem:[%s11470_s6 + $0x110] sm:$0xff] }
0x1d06   :  { %v5514_v63 = vpop.xlane.xlu1 %5513 }
0x1d07   :  { %v5516_v39 = vmul.f32 0.03125, %v5514_v63  ;;  %v8072_v63 = vld [vmem:[%s11470_s6 + $0x150] sm:$0xff] }
0x1d08   :  { %v5511_v19 = vpop.xlane.xlu0 %5510  ;;  %v8098_v37 = vcombine.low %v8064_v38, %v8072_v63 }
0x1d09   :  { %v5515_v12 = vmul.f32 0.03125, %v5511_v19  ;;  %v10814_v24 = vsub.f32 %v10804_v11, %v5516_v39  ;;  %v8065_v39 = vld [vmem:[%s11470_s6 + $0x118] sm:$0xff] }
0x1d0a   :  { %v8073_v19 = vld [vmem:[%s11470_s6 + $0x158] sm:$0xff] }
0x1d0b   :  { %v10817_v28 = vsub.f32 %v10807_v25, %v5515_v12  ;;  %v5520_v23 = vmul.f32 %v10814_v24, %v10814_v24  ;;  %v5548_v0 = vmul.f32 %v8060_v44, %v10814_v24  ;;  %v8100_v31 = vcombine.low %v8065_v39, %v8073_v19 }
0x1d0d   :  { %v5519_v21 = vmul.f32 %v10817_v28, %v10817_v28  ;;  %v5524_v27 = vsel %vm64_vm0, %v5520_v23, 0.0  ;;  %v5547_v42 = vmul.f32 %v8060_v44, %v10817_v28  ;;  %v8082_v23 = vld [vmem:[%s11470_s6 + $0x1a0] sm:$0xff]  ;;  %v9325_v44 = vld [vmem:[%s11472_s8 + $0x4e8] sm:$0xff]  }
0x1d0f   :  { %v5521_v45 = vsel %vm64_vm0, %v5519_v21, 0.0  ;;  %v8099_v21 = vcombine.high %v8064_v38, %v8072_v63  ;;  %v9332_v38 = vld [vmem:[%s11472_s8 + $0x458] sm:$0xff]  }
0x1d10   :  { %5522 = vadd.xlane.f32.xlu0 %v5521_v45  ;;  %v8101_v45 = vcombine.high %v8065_v39, %v8073_v19  ;;  %v9333_v63 = vld [vmem:[%s11472_s8 + $0x4d8] sm:$0xff]  }
0x1d11   :  { %v9334_v39 = vld [vmem:[%s11472_s8 + $0x418] sm:$0xff]  }
0x1d12   :  { %v9335_v19 = vld [vmem:[%s11472_s8 + $0x498] sm:$0xff]  }
0x1d14   :  { %5525 = vadd.xlane.f32.xlu0 %v5524_v27  ;;  %v8090_v27 = vld [vmem:[%s11470_s6 + $0x1e0] sm:$0xff] }
0x1d15   :  { %v8119_v50 = vcombine.high %v8082_v23, %v8090_v27  ;;  %v8118_v54 = vcombine.low %v8082_v23, %v8090_v27  ;;  %v9341_v23 = vld [vmem:[%s11472_s8 + $0x4c8] sm:$0xff]  }
0x1d16   :  { %v9342_v27 = vld [vmem:[%s11472_s8 + $0x408] sm:$0xff]  }
0x1d99   :  { %v5523_v6 = vpop.xlane.xlu0 %5522 }
0x1d9a   :  { %v5527_v51 = vmul.f32 0.032258064, %v5523_v6  ;;  %v8069_v6 = vld [vmem:[%s11470_s6 + $0x138] sm:$0xff] }
0x1d9c   :  { %9534 = vrsqrt.f32 %v5527_v51  ;;  %vm5531_vm2 = vcmp.eq.f32.partialorder %v5527_v51, inf  ;;  %v5534_v62 = vand.u32 2147483648, %v5527_v51  ;;  %vm5533_vm3 = vcmp.eq.f32.partialorder %v5527_v51, 0.0 }
0x1d9d   :  { %v5526_v5 = vpop.xlane.xlu0 %5525 }
0x1d9e   :  { %v5528_v53 = vmul.f32 0.032258064, %v5526_v5  ;;  %v8122_v5 = vcombine.low %v8084_v40, %v8092_v35 }
0x1da0   :  { %9536 = vrsqrt.f32 %v5528_v53  ;;  %vm5538_vm4 = vcmp.eq.f32.partialorder %v5528_v53, inf  ;;  %v5541_v15 = vand.u32 2147483648, %v5528_v53  ;;  %vm5540_vm5 = vcmp.eq.f32.partialorder %v5528_v53, 0.0 }
0x1da9   :  { %v9535_v32 = vpop.eup %9534 }
0x1daa   :  { %v5530_v59 = vmul.f32 %v9535_v32, %v5527_v51 }
0x1dac   :  { %v5532_v2 = vsel %vm5531_vm2, %v5527_v51, %v5530_v59  ;;  %v8077_v51 = vld [vmem:[%s11470_s6 + $0x178] sm:$0xff] }
0x1dad   :  { %v9537_v56 = vpop.eup %9536  ;;  %v5535_v61 = vsel %vm5533_vm3, %v5534_v62, %v5532_v2  ;;  %v8109_v59 = vcombine.high %v8069_v6, %v8077_v51  ;;  %v8108_v2 = vcombine.low %v8069_v6, %v8077_v51 }
0x1dae   :  { %v5549_v1 = vadd.f32 1e-06, %v5535_v61  ;;  %v5537_v14 = vmul.f32 %v9537_v56, %v5528_v53  ;;  %v9316_v56 = vld [vmem:[%s11472_s8 + $0x478] sm:$0xff]  }
0x1daf   :  { %v9317_v61 = vld [vmem:[%s11472_s8 + $0x4f8] sm:$0xff]  }
0x1db0   :  { %9538 = vrcp.f32 %v5549_v1  ;;  %v5539_v4 = vsel %vm5538_vm4, %v5528_v53, %v5537_v14  ;;  %v8124_v53 = vcombine.low %v8085_v41, %v8093_v46  ;;  %v9318_v1 = vld [vmem:[%s11472_s8 + $0x438] sm:$0xff]  }
0x1db1   :  { %v5542_v17 = vsel %vm5540_vm5, %v5541_v15, %v5539_v4  ;;  %v9319_v14 = vld [vmem:[%s11472_s8 + $0x4b8] sm:$0xff]   ;;  %v9320_v15 = vld [vmem:[%s11472_s8 + $0x470] sm:$0xff]  }
0x1db2   :  { %v5550_v7 = vadd.f32 1e-06, %v5542_v17  ;;  %v9321_v4 = vld [vmem:[%s11472_s8 + $0x4f0] sm:$0xff]  }
0x1db3   :  { %v9322_v17 = vld [vmem:[%s11472_s8 + $0x430] sm:$0xff]  }
0x1db4   :  { %9540 = vrcp.f32 %v5550_v7  ;;  %v9323_v7 = vld [vmem:[%s11472_s8 + $0x4b0] sm:$0xff]  }
0x1dbd   :  { %v9539_v9 = vpop.eup %9538 }
0x1dbe   :  { %v5552_v57 = vmul.f32 %v9539_v9, %v5547_v42  ;;  %v9324_v9 = vld [vmem:[%s11472_s8 + $0x468] sm:$0xff]  }
0x1dbf   :  { %v9326_v42 = vld [vmem:[%s11472_s8 + $0x428] sm:$0xff]  }
0x1dc0   :  { %v5559_v12 = vadd.f32 %v8061_v16, %v5552_v57  ;;  %v9328_v57 = vld [vmem:[%s11472_s8 + $0x460] sm:$0xff]  }
0x1dc1   :  { %v9541_v13 = vpop.eup %9540 }
0x1dc2   :  { %v5554_v52 = vmul.f32 %v9541_v13, %v5548_v0  ;;  %v9327_v0 = vld [vmem:[%s11472_s8 + $0x4a8] sm:$0xff]   ;;  %v9329_v13 = vld [vmem:[%s11472_s8 + $0x4e0] sm:$0xff]  }
0x1dc4   :  { %v5560_v24 = vadd.f32 %v8061_v16, %v5554_v52  ;;  %v9330_v16 = vld [vmem:[%s11472_s8 + $0x420] sm:$0xff]  }
0x1dc5   :  { %v9331_v52 = vld [vmem:[%s11472_s8 + $0x4a0] sm:$0xff]  }
0x1dc6   :  { %v10881_v28 = vpack.c.bf16 %v5560_v24, %v5559_v12  ;;  %v9336_v12 = vld [vmem:[%s11472_s8 + $0x450] sm:$0xff]  }
0x1dc7   :  { %v9337_v24 = vld [vmem:[%s11472_s8 + $0x4d0] sm:$0xff]  }
0x1dc8   :  { %8126 = vmatmul.mubr.msk.bf16.vlgmr.msra.gmra.mxu0 %vm64_vm0, %v10881_v28  ;;  %8127 = vmatmul.mubr.msk.bf16.vlgmr.msra.gmra.mxu1 %vm64_vm0, %v10881_v28 }
0x1dc9   :  { %5857 = vmatpush1.bf16.msra.mxu0 %v8114_v47  ;;  %5900 = vmatpush1.bf16.msra.mxu1 %v8116_v33  ;;  %v8104_v47 = vcombine.low %v8067_v20, %v8075_v43  ;;  %v8068_v33 = vld [vmem:[%s11470_s6 + $0x130] sm:$0xff]  ;;  %v6129_v20 = vrot.slane %v6118_v36, %v10156_v8  ;;  %s9552_s6 = scalar_lea.vmem %s7801_s17, 256 }
0x1dca   :  { %5858 = vmatprep.subr.bf16.mxu0 %v8099_v21  ;;  %5901 = vmatprep.subr.bf16.mxu1 %v8101_v45  ;;  %v8107_v32 = vcombine.high %v8068_v33, %v8076_v18  ;;  %v8106_v62 = vcombine.low %v8068_v33, %v8076_v18  ;;  %v9339_v21 = vld [vmem:[%s11472_s8 + $0x490] sm:$0xff]   ;;  %v9340_v45 = vld [vmem:[%s11472_s8 + $0x448] sm:$0xff]   ;;  %p9553_p0 = scmp.ne.s32.totalorder %s7801_s17, %s9552_s6  ;;  %p9558_p2 = scmp.lt.s32.totalorder %s9552_s6, %s9552_s6 }
0x1dcb   :  { %5876 = vmatprep.mubr.bf16.mxu0 %v9591_v3  ;;  %5919 = vmatprep.mubr.bf16.mxu1 %v9591_v3  ;;  %v6137_v43 = vcombine.high %v6129_v20, %v6129_v20 }
0x1dcc   :  { %p9559_p3 = por %p9558_p2, %p9557_p1 }
0x1dcd   :  { %5859 = vmatpush1.bf16.msra.mxu0 %v8098_v37  ;;  %5902 = vmatpush1.bf16.msra.mxu1 %v8100_v31  ;;  %v9345_v37 = vld [vmem:[%s11472_s8 + $0x4c0] sm:$0xff]  }
0x1dce   :  { %5942 = vmatprep.subr.bf16.mxu0 %v8119_v50  ;;  %5985 = vmatprep.subr.bf16.mxu1 %v8121_v26  ;;  %v9346_v31 = vld [vmem:[%s11472_s8 + $0x400] sm:$0xff]   ;;  %v9349_v26 = vld [vmem:[%s11472_s8 + $0x578] sm:$0xff]   ;;  %p9560_p4 = pnand %p9559_p3, %p9553_p0 }
0x1dcf   :  { %v9347_v50 = vld [vmem:[%s11472_s8 + $0x480] sm:$0xff]  }
0x1dd0   :  { %8128 = vmatmul.mubr.msk.bf16.vlgmr.msra.gmra.mxu0 %vm64_vm0, %v10881_v28  ;;  %8129 = vmatmul.mubr.msk.bf16.vlgmr.msra.gmra.mxu1 %vm64_vm0, %v10881_v28 }
0x1dd1   :  { %5943 = vmatpush1.bf16.msra.mxu0 %v8118_v54  ;;  %5986 = vmatpush1.bf16.msra.mxu1 %v8120_v55  ;;  %v6122_v54 = vcombine.high %v6118_v36, %v6118_v36  ;;  %v6145_v55 = vrot.slane %v6129_v20, %v10156_v8  ;;  %v9354_v20 = vld [vmem:[%s11472_s8 + $0x5f0] sm:$0xff]  }
0x1dd2   :  { %5944 = vmatprep.subr.bf16.mxu0 %v8103_v34  ;;  %5987 = vmatprep.subr.bf16.mxu1 %v8105_v60  ;;  %v6159_v34 = vrot.slane %v6137_v43, %v10156_v8 }
0x1dd3   :  { %5962 = vmatprep.mubr.bf16.mxu0 %v9591_v3  ;;  %6005 = vmatprep.mubr.bf16.mxu1 %v9591_v3  ;;  %v11062_v60 = vrot.slane %v6122_v54, %v10156_v8  ;;  %v6167_v40 = vcombine.high %v6145_v55, %v6145_v55  ;;  %v6221_v46 = vshrl.u32 %v6145_v55, 16 }
0x1dd4   :  { %v6169_v35 = vcombine.high %v6159_v34, %v6159_v34 }
0x1dd5   :  { %5945 = vmatpush1.bf16.msra.mxu0 %v8102_v58  ;;  %5988 = vmatpush1.bf16.msra.mxu1 %v8104_v47  ;;  %v6138_v41 = vcombine.high %v11062_v60, %v11062_v60  ;;  %v6237_v58 = vshrl.u32 %v6167_v40, 16  ;;  %v6229_v47 = vshrl.u32 %v6159_v34, 16  ;;  %v6222_v6 = vpack.i.b16 %v6221_v46, %v6221_v46  ;;  %v9355_v40 = vld [vmem:[%s11472_s8 + $0x530] sm:$0xff]   ;;  %v9357_v46 = vld [vmem:[%s11472_s8 + $0x568] sm:$0xff]  }
0x1dd6   :  { %6028 = vmatprep.subr.bf16.mxu0 %v8123_v48  ;;  %6071 = vmatprep.subr.bf16.mxu1 %v8125_v49  ;;  %v6245_v48 = vshrl.u32 %v6169_v35, 16 }
0x1dd7   :  { %v6166_v49 = vrot.slane %v6138_v41, %v10156_v8  ;;  %v6238_v51 = vpack.i.b16 %v6237_v58, %v6237_v58  ;;  %v9356_v41 = vld [vmem:[%s11472_s8 + $0x5b0] sm:$0xff]  }
0x1dd8   :  { %8130 = vmatmul.mubr.msk.bf16.vlgmr.msra.gmra.mxu0 %vm64_vm0, %v10881_v28  ;;  %8131 = vmatmul.mubr.msk.bf16.vlgmr.msra.gmra.mxu1 %vm64_vm0, %v10881_v28 }
0x1dd9   :  { %6029 = vmatpush1.bf16.msra.mxu0 %v8122_v5  ;;  %6072 = vmatpush1.bf16.msra.mxu1 %v8124_v53  ;;  %v6230_v5 = vpack.i.b16 %v6229_v47, %v6229_v47  ;;  %v6246_v53 = vpack.i.b16 %v6245_v48, %v6245_v48  ;;  %v9358_v48 = vld [vmem:[%s11472_s8 + $0x5e8] sm:$0xff]  }
0x1dda   :  { %6030 = vmatprep.subr.bf16.mxu0 %v8107_v32  ;;  %6073 = vmatprep.subr.bf16.mxu1 %v8109_v59  ;;  %v6170_v32 = vcombine.high %v6166_v49, %v6166_v49 }
0x1ddb   :  { %6048 = vmatprep.mubr.bf16.mxu0 %v9591_v3  ;;  %6091 = vmatprep.mubr.bf16.mxu1 %v9591_v3 }
0x1ddd   :  { %6031 = vmatpush1.bf16.msra.mxu0 %v8106_v62  ;;  %6074 = vmatpush1.bf16.msra.mxu1 %v8108_v2 }
0x1dde   :  { %8785 = vmatprep.subr.bf16.mxu0 %v9316_v56  ;;  %8807 = vmatprep.subr.bf16.mxu1 %v9317_v61  ;;  %v6227_v56 = vrot.slane %v6222_v6, %v10169_v22  ;;  %v9359_v6 = vld [vmem:[%s11472_s8 + $0x528] sm:$0xff]  }
0x1de0   :  { %8132 = vmatmul.mubr.msk.bf16.vlgmr.msra.gmra.mxu0 %vm64_vm0, %v10881_v28  ;;  %8133 = vmatmul.mubr.msk.bf16.vlgmr.msra.gmra.mxu1 %vm64_vm0, %v10881_v28  ;;  %v9338_v28 = vld [vmem:[%s11472_s8 + $0x410] sm:$0xff]  }
0x1de1   :  { %8786 = vmatpush3.bf16.msra.mxu0 %v9318_v1  ;;  %8808 = vmatpush3.bf16.msra.mxu1 %v9319_v14  ;;  %v6243_v1 = vrot.slane %v6238_v51, %v10169_v22  ;;  %v6235_v14 = vrot.slane %v6230_v5, %v10169_v22  ;;  %v9360_v51 = vld [vmem:[%s11472_s8 + $0x5a8] sm:$0xff]   ;;  %v9361_v5 = vld [vmem:[%s11472_s8 + $0x560] sm:$0xff]  }
0x1de2   :  { %8787 = vmatprep.subr.bf16.mxu0 %v9320_v15  ;;  %8809 = vmatprep.subr.bf16.mxu1 %v9321_v4  ;;  %v6251_v15 = vrot.slane %v6246_v53, %v10169_v22  ;;  %v6152_v53 = vrot.slane %v11062_v60, %v10156_v8  ;;  %v9364_v60 = vld [vmem:[%s11472_s8 + $0x5a0] sm:$0xff]  }
0x1de5   :  { %8788 = vmatpush3.bf16.msra.mxu0 %v9322_v17  ;;  %8810 = vmatpush3.bf16.msra.mxu1 %v9323_v7  ;;  %v6261_v7 = vshrl.u32 %v6166_v49, 16 }
0x1de6   :  { %8789 = vmatprep.subr.bf16.mxu0 %v9324_v9  ;;  %8811 = vmatprep.subr.bf16.mxu1 %v9325_v44  ;;  %v6277_v9 = vshrl.u32 %v6170_v32, 16  ;;  %v9362_v32 = vld [vmem:[%s11472_s8 + $0x5e0] sm:$0xff]  }
0x1de9   :  { %8790 = vmatpush3.bf16.msra.mxu0 %v9326_v42  ;;  %8812 = vmatpush3.bf16.msra.mxu1 %v9327_v0 }
0x1dea   :  { %8791 = vmatprep.subr.bf16.mxu0 %v9328_v57  ;;  %8813 = vmatprep.subr.bf16.mxu1 %v9329_v13 }
0x1ded   :  { %8792 = vmatpush3.bf16.msra.mxu0 %v9330_v16  ;;  %8814 = vmatpush3.bf16.msra.mxu1 %v9331_v52 }
0x1dee   :  { %8793 = vmatprep.subr.bf16.mxu0 %v9332_v38  ;;  %8815 = vmatprep.subr.bf16.mxu1 %v9333_v63 }
0x1df1   :  { %8794 = vmatpush3.bf16.msra.mxu0 %v9334_v39  ;;  %8816 = vmatpush3.bf16.msra.mxu1 %v9335_v19  ;;  %v6262_v19 = vpack.i.b16 %v6261_v7, %v6261_v7  ;;  %v6253_v7 = vshrl.u32 %v6152_v53, 16 }
0x1df2   :  { %8795 = vmatprep.subr.bf16.mxu0 %v9336_v12  ;;  %8817 = vmatprep.subr.bf16.mxu1 %v9337_v24  ;;  %v6278_v12 = vpack.i.b16 %v6277_v9, %v6277_v9 }
0x1df4   :  { %v6283_v36 = vrot.slane %v6278_v12, %v10169_v22 }
0x1df5   :  { %8796 = vmatpush3.bf16.msra.mxu0 %v9338_v28  ;;  %8818 = vmatpush3.bf16.msra.mxu1 %v9339_v21 }
0x1df6   :  { %8797 = vmatprep.subr.bf16.mxu0 %v9340_v45  ;;  %8819 = vmatprep.subr.bf16.mxu1 %v9341_v23  ;;  %v9351_v23 = vld [vmem:[%s11472_s8 + $0x538] sm:$0xff]  }
0x1df9   :  { %8798 = vmatpush3.bf16.msra.mxu0 %v9342_v27  ;;  %8820 = vmatpush3.bf16.msra.mxu1 %v9343_v29 }
0x1dfa   :  { %8799 = vmatprep.subr.bf16.mxu0 %v9344_v30  ;;  %8821 = vmatprep.subr.bf16.mxu1 %v9345_v37 }
0x1dfd   :  { %8800 = vmatpush3.bf16.msra.mxu0 %v9346_v31  ;;  %8822 = vmatpush3.bf16.msra.mxu1 %v9347_v50  ;;  %v9352_v31 = vld [vmem:[%s11472_s8 + $0x5b8] sm:$0xff]   ;;  %v9353_v50 = vld [vmem:[%s11472_s8 + $0x570] sm:$0xff]  }
0x1dfe   :  { %8829 = vmatprep.subr.bf16.mxu0 %v9349_v26  ;;  %8851 = vmatprep.subr.bf16.mxu1 %v9350_v10  ;;  %v11095_v26 = vld [vmem:[%s11471_s7 + $0x8] sm:$0xff]  ;;  %v6267_v10 = vrot.slane %v6262_v19, %v10169_v22  ;;  %v6254_v19 = vpack.i.b16 %v6253_v7, %v6253_v7 }
0x1dff   :  { %v11107_v35 = vrot.slane %v11095_v26, %v10156_v8  ;;  %v9393_v7 = vld [vmem:[%s11472_s8 + $0x6a8] sm:$0xff]  }
0x1e88   :  { %v5792_v33 = vpop.f32.mrf.mxu0  ;;  %v5835_v18 = vpop.f32.mrf.mxu1 }
0x1e8a   :  { %v5794_v59 = vpop.f32.mrf.mxu0  ;;  %v5837_v62 = vpop.f32.mrf.mxu1 }
0x1e8c   :  { %v5796_v2 = vpop.f32.mrf.mxu0  ;;  %v5839_v61 = vpop.f32.mrf.mxu1 }
0x1e8d   :  { %v6102_v4 = vpack.c.bf16 %v5796_v2, %v5792_v33  ;;  %v6104_v17 = vpack.c.bf16 %v5839_v61, %v5835_v18  ;;  %v6186_v18 = vcombine.high %v11107_v35, %v11107_v35  ;;  %v9363_v2 = vld [vmem:[%s11472_s8 + $0x520] sm:$0xff]   ;;  %v9366_v61 = vld [vmem:[%s11472_s8 + $0x558] sm:$0xff]  }
0x1e8e   :  { %v5798_v44 = vpop.f32.mrf.mxu0  ;;  %v5841_v42 = vpop.f32.mrf.mxu1 }
0x1e8f   :  { %v6103_v0 = vpack.c.bf16 %v5798_v44, %v5794_v59  ;;  %v6105_v57 = vpack.c.bf16 %v5841_v42, %v5837_v62  ;;  %v6348_v13 = vadd.bf16 %v6227_v56, %v6102_v4  ;;  %v6350_v16 = vadd.bf16 %v6243_v1, %v6104_v17  ;;  %v9368_v17 = vld [vmem:[%s11472_s8 + $0x518] sm:$0xff]   ;;  %v9370_v42 = vld [vmem:[%s11472_s8 + $0x550] sm:$0xff]  }
0x1e90   :  { %v11071_v52 = vpop.f32.mrf.mxu0  ;;  %v11073_v38 = vpop.f32.mrf.mxu1  ;;  %v6208_v62 = vrot.slane %v6186_v18, %v10156_v8  ;;  %v6168_v1 = vcombine.high %v6152_v53, %v6152_v53  ;;  %v9369_v44 = vld [vmem:[%s11472_s8 + $0x598] sm:$0xff]   ;;  %v6171_v18 = vcombine.high %v11095_v26, %v11095_v26  ;;  %v9386_v26 = vld [vmem:[%s11472_s8 + $0x670] sm:$0xff]  }
0x1e91   :  { %v6349_v63 = vadd.bf16 %v6235_v14, %v6103_v0  ;;  %v6351_v39 = vadd.bf16 %v6251_v15, %v6105_v57  ;;  %v6364_v27 = vmax.bf16 %v9591_v3, %v6348_v13  ;;  %v6366_v29 = vmax.bf16 %v9591_v3, %v6350_v16  ;;  %v9367_v14 = vld [vmem:[%s11472_s8 + $0x5d8] sm:$0xff]   ;;  %v9371_v57 = vld [vmem:[%s11472_s8 + $0x5d0] sm:$0xff]  }
0x1e92   :  { %v5880_v24 = vpop.f32.mrf.mxu0  ;;  %v5923_v28 = vpop.f32.mrf.mxu1  ;;  %v6218_v4 = vcombine.high %v6208_v62, %v6208_v62  ;;  %v6269_v0 = vshrl.u32 %v6168_v1, 16  ;;  %v6293_v13 = vshrl.u32 %v6208_v62, 16  ;;  %v9387_v62 = vld [vmem:[%s11472_s8 + $0x6f0] sm:$0xff]  }
0x1e93   :  { %v6365_v21 = vmax.bf16 %v9591_v3, %v6349_v63  ;;  %v6367_v45 = vmax.bf16 %v9591_v3, %v6351_v39  ;;  %v9372_v39 = vld [vmem:[%s11472_s8 + $0x510] sm:$0xff]  }
0x1e94   :  { %v11082_v30 = vpop.f32.mrf.mxu0  ;;  %v11084_v37 = vpop.f32.mrf.mxu1  ;;  %v6309_v63 = vshrl.u32 %v6218_v4, 16  ;;  %v9389_v1 = vld [vmem:[%s11472_s8 + $0x6b0] sm:$0xff]  }
0x1e95   :  { %7441 = vmatprep.mubr.bf16.mxu0 %v6365_v21  ;;  %7482 = vmatprep.mubr.bf16.mxu1 %v6367_v45  ;;  %v6270_v21 = vpack.i.b16 %v6269_v0, %v6269_v0  ;;  %v9375_v45 = vld [vmem:[%s11472_s8 + $0x5c8] sm:$0xff]  }
0x1e96   :  { %v5884_v43 = vpop.f32.mrf.mxu0  ;;  %v5927_v54 = vpop.f32.mrf.mxu1  ;;  %7442 = vmatmul.mubr.bf16.vlgmr.msra.gmra.mxu0 %v6364_v27  ;;  %7483 = vmatmul.mubr.bf16.vlgmr.msra.gmra.mxu1 %v6366_v29  ;;  %v6310_v29 = vpack.i.b16 %v6309_v63, %v6309_v63 }
0x1e97   :  { %v6107_v55 = vpack.c.bf16 %v5884_v43, %v5880_v24  ;;  %v6109_v34 = vpack.c.bf16 %v5927_v54, %v5923_v28  ;;  %8830 = vmatpush3.bf16.msra.mxu0 %v9351_v23  ;;  %8852 = vmatpush3.bf16.msra.mxu1 %v9352_v31  ;;  %v9373_v24 = vld [vmem:[%s11472_s8 + $0x590] sm:$0xff]   ;;  %v9374_v28 = vld [vmem:[%s11472_s8 + $0x548] sm:$0xff]   ;;  %v6294_v23 = vpack.i.b16 %v6293_v13, %v6293_v13  ;;  %v9378_v43 = vld [vmem:[%s11472_s8 + $0x540] sm:$0xff]  }
0x1e98   :  { %8831 = vmatprep.subr.bf16.mxu0 %v9353_v50  ;;  %8853 = vmatprep.subr.bf16.mxu1 %v9354_v20  ;;  %v11136_v59 = vpop.f32.mrf.mxu0  ;;  %v11142_v56 = vpop.f32.mrf.mxu1  ;;  %v9376_v31 = vld [vmem:[%s11472_s8 + $0x508] sm:$0xff]   ;;  %v6106_v50 = vpack.c.bf16 %v11082_v30, %v11071_v52  ;;  %v6108_v54 = vpack.c.bf16 %v11084_v37, %v11073_v38  ;;  %v9379_v52 = vld [vmem:[%s11472_s8 + $0x5c0] sm:$0xff]   ;;  %v9382_v37 = vld [vmem:[%s11472_s8 + $0x678] sm:$0xff]  }
0x1e99   :  { %v6353_v58 = vadd.bf16 %v6267_v10, %v6107_v55  ;;  %v6355_v47 = vadd.bf16 %v6283_v36, %v6109_v34  ;;  %v6259_v10 = vrot.slane %v6254_v19, %v10169_v22  ;;  %v9377_v20 = vld [vmem:[%s11472_s8 + $0x588] sm:$0xff]   ;;  %v6275_v55 = vrot.slane %v6270_v21, %v10169_v22  ;;  %v9381_v38 = vld [vmem:[%s11472_s8 + $0x580] sm:$0xff]  }
0x1e9a   :  { %v5966_v15 = vpop.f32.mrf.mxu0  ;;  %v6009_v9 = vpop.f32.mrf.mxu1  ;;  %v6299_v34 = vrot.slane %v6294_v23, %v10169_v22  ;;  %v9396_v13 = vld [vmem:[%s11472_s8 + $0x620] sm:$0xff]  }
0x1e9b   :  { %8832 = vmatpush3.bf16.msra.mxu0 %v9355_v40  ;;  %v6369_v49 = vmax.bf16 %v9591_v3, %v6353_v58  ;;  %v6371_v33 = vmax.bf16 %v9591_v3, %v6355_v47  ;;  %8854 = vmatpush3.bf16.msra.mxu1 %v9356_v41  ;;  %v6315_v41 = vrot.slane %v6310_v29, %v10169_v22  ;;  %v9401_v29 = vld [vmem:[%s11472_s8 + $0x698] sm:$0xff]  }
0x1e9c   :  { %8833 = vmatprep.subr.bf16.mxu0 %v9357_v46  ;;  %8855 = vmatprep.subr.bf16.mxu1 %v9358_v48  ;;  %v11165_v16 = vpop.f32.mrf.mxu0  ;;  %v11170_v12 = vpop.f32.mrf.mxu1  ;;  %v9380_v46 = vld [vmem:[%s11472_s8 + $0x500] sm:$0xff]   ;;  %v6352_v58 = vadd.bf16 %v6259_v10, %v6106_v50  ;;  %v6354_v47 = vadd.bf16 %v6275_v55, %v6108_v54  ;;  %v9383_v48 = vld [vmem:[%s11472_s8 + $0x6f8] sm:$0xff]   ;;  %v9403_v10 = vld [vmem:[%s11472_s8 + $0x6d0] sm:$0xff]  }
0x1e9d   :  { %7523 = vmatprep.mubr.bf16.mxu0 %v6369_v49  ;;  %7564 = vmatprep.mubr.bf16.mxu1 %v6371_v33  ;;  %v9404_v54 = vld [vmem:[%s11472_s8 + $0x610] sm:$0xff]  }
0x1e9e   :  { %v5970_v27 = vpop.f32.mrf.mxu0  ;;  %v6013_v36 = vpop.f32.mrf.mxu1  ;;  %v6370_v53 = vmax.bf16 %v9591_v3, %v6354_v47  ;;  %v6110_v47 = vpack.c.bf16 %v11165_v16, %v11136_v59  ;;  %v9411_v59 = vld [vmem:[%s11472_s8 + $0x6c0] sm:$0xff]  }
0x1e9f   :  { %8834 = vmatpush3.bf16.msra.mxu0 %v9359_v6  ;;  %8856 = vmatpush3.bf16.msra.mxu1 %v9360_v51  ;;  %v6111_v30 = vpack.c.bf16 %v5970_v27, %v5966_v15  ;;  %v6113_v40 = vpack.c.bf16 %v6013_v36, %v6009_v9  ;;  %v9384_v6 = vld [vmem:[%s11472_s8 + $0x638] sm:$0xff]   ;;  %v6368_v51 = vmax.bf16 %v9591_v3, %v6352_v58  ;;  %v9391_v15 = vld [vmem:[%s11472_s8 + $0x6e8] sm:$0xff]   ;;  %v9394_v9 = vld [vmem:[%s11472_s8 + $0x660] sm:$0xff]  }
0x1ea0   :  { %8835 = vmatprep.subr.bf16.mxu0 %v9361_v5  ;;  %8857 = vmatprep.subr.bf16.mxu1 %v9362_v32  ;;  %v9385_v5 = vld [vmem:[%s11472_s8 + $0x6b8] sm:$0xff]   ;;  %v11262_v0 = vpop.f32.mrf.mxu0  ;;  %v11268_v63 = vpop.f32.mrf.mxu1 }
0x1ea1   :  { %v6357_v49 = vadd.bf16 %v6299_v34, %v6111_v30  ;;  %v6359_v33 = vadd.bf16 %v6315_v41, %v6113_v40  ;;  %v9405_v30 = vld [vmem:[%s11472_s8 + $0x690] sm:$0xff]   ;;  %v9406_v34 = vld [vmem:[%s11472_s8 + $0x648] sm:$0xff]  }
0x1ea2   :  { %v6095_v27 = vpop.f32.mrf.mxu1  ;;  %v9407_v41 = vld [vmem:[%s11472_s8 + $0x6c8] sm:$0xff]  }
0x1ea3   :  { %8836 = vmatpush3.bf16.msra.mxu0 %v9363_v2  ;;  %8858 = vmatpush3.bf16.msra.mxu1 %v9364_v60  ;;  %v6373_v32 = vmax.bf16 %v9591_v3, %v6357_v49  ;;  %v11231_v2 = vrot.slane %v6171_v18, %v10156_v8  ;;  %v6375_v60 = vmax.bf16 %v9591_v3, %v6359_v33  ;;  %v9409_v33 = vld [vmem:[%s11472_s8 + $0x688] sm:$0xff]   ;;  %v9410_v18 = vld [vmem:[%s11472_s8 + $0x640] sm:$0xff]  }
0x1ea4   :  { %8837 = vmatprep.subr.bf16.mxu0 %v9366_v61  ;;  %8859 = vmatprep.subr.bf16.mxu1 %v9367_v14  ;;  %v9388_v61 = vld [vmem:[%s11472_s8 + $0x630] sm:$0xff]   ;;  %v9390_v14 = vld [vmem:[%s11472_s8 + $0x668] sm:$0xff]  }
0x1ea5   :  { %v6187_v4 = vcombine.high %v11231_v2, %v11231_v2 }
0x1ea7   :  { %8838 = vmatpush3.bf16.msra.mxu0 %v9368_v17  ;;  %8860 = vmatpush3.bf16.msra.mxu1 %v9369_v44  ;;  %v9392_v17 = vld [vmem:[%s11472_s8 + $0x628] sm:$0xff]   ;;  %v6194_v44 = vrot.slane %v11107_v35, %v10156_v8  ;;  %v9397_v35 = vld [vmem:[%s11472_s8 + $0x6a0] sm:$0xff]  }
0x1ea8   :  { %8839 = vmatprep.subr.bf16.mxu0 %v9370_v42  ;;  %8861 = vmatprep.subr.bf16.mxu1 %v9371_v57  ;;  %v9395_v42 = vld [vmem:[%s11472_s8 + $0x6e0] sm:$0xff]   ;;  %v6215_v57 = vrot.slane %v6187_v4, %v10156_v8 }
0x1ea9   :  { %v6216_v19 = vcombine.high %v6194_v44, %v6194_v44  ;;  %v6285_v23 = vshrl.u32 %v6194_v44, 16 }
0x1eaa   :  { %v6219_v21 = vcombine.high %v6215_v57, %v6215_v57  ;;  %v6325_v36 = vshrl.u32 %v6215_v57, 16 }
0x1eab   :  { %8840 = vmatpush3.bf16.msra.mxu0 %v9372_v39  ;;  %8862 = vmatpush3.bf16.msra.mxu1 %v9373_v24  ;;  %v9398_v39 = vld [vmem:[%s11472_s8 + $0x658] sm:$0xff]   ;;  %v6301_v50 = vshrl.u32 %v6216_v19, 16  ;;  %v6286_v55 = vpack.i.b16 %v6285_v23, %v6285_v23  ;;  %v9423_v19 = vld [vmem:[%s11472_s8 + $0x7e8] sm:$0xff]   ;;  %v9427_v23 = vld [vmem:[%s11472_s8 + $0x7e0] sm:$0xff]  }
0x1eac   :  { %8841 = vmatprep.subr.bf16.mxu0 %v9374_v28  ;;  %8863 = vmatprep.subr.bf16.mxu1 %v9375_v45  ;;  %v9399_v24 = vld [vmem:[%s11472_s8 + $0x6d8] sm:$0xff]   ;;  %v6052_v28 = vpop.f32.mrf.mxu0 }
0x1ead   :  { %v9400_v45 = vld [vmem:[%s11472_s8 + $0x618] sm:$0xff]   ;;  %v6302_v40 = vpack.i.b16 %v6301_v50, %v6301_v50 }
0x1eae   :  { %v9432_v50 = vld [vmem:[%s11472_s8 + $0x718] sm:$0xff]  }
0x1eaf   :  { %8842 = vmatpush3.bf16.msra.mxu0 %v9376_v31  ;;  %8864 = vmatpush3.bf16.msra.mxu1 %v9377_v20  ;;  %v9402_v31 = vld [vmem:[%s11472_s8 + $0x650] sm:$0xff]   ;;  %v11291_v20 = vpop.f32.mrf.mxu0 }
0x1eb0   :  { %8843 = vmatprep.subr.bf16.mxu0 %v9378_v43  ;;  %8865 = vmatprep.subr.bf16.mxu1 %v9379_v52  ;;  %v6341_v43 = vshrl.u32 %v6219_v21, 16  ;;  %v11296_v52 = vpop.f32.mrf.mxu1  ;;  %v9426_v21 = vld [vmem:[%s11472_s8 + $0x760] sm:$0xff]  }
0x1eb1   :  { %v6056_v58 = vpop.f32.mrf.mxu0 }
0x1eb2   :  { %v6099_v49 = vpop.f32.mrf.mxu1  ;;  %v6115_v16 = vpack.c.bf16 %v6056_v58, %v6052_v28  ;;  %v9425_v28 = vld [vmem:[%s11472_s8 + $0x7a8] sm:$0xff]  }
0x1eb3   :  { %8844 = vmatpush3.bf16.msra.mxu0 %v9380_v46  ;;  %8866 = vmatpush3.bf16.msra.mxu1 %v9381_v38  ;;  %v6326_v46 = vpack.i.b16 %v6325_v36, %v6325_v36  ;;  %v6342_v38 = vpack.i.b16 %v6341_v43, %v6341_v43  ;;  %v9433_v36 = vld [vmem:[%s11472_s8 + $0x798] sm:$0xff]   ;;  %v9434_v43 = vld [vmem:[%s11472_s8 + $0x750] sm:$0xff]   ;;  %v9439_v58 = vld [vmem:[%s11472_s8 + $0x7c8] sm:$0xff]  }
0x1eb4   :  { %8873 = vmatprep.subr.bf16.mxu0 %v9382_v37  ;;  %8895 = vmatprep.subr.bf16.mxu1 %v9383_v48  ;;  %v9408_v37 = vld [vmem:[%s11472_s8 + $0x608] sm:$0xff]   ;;  %v6291_v48 = vrot.slane %v6286_v55, %v10169_v22  ;;  %v9435_v55 = vld [vmem:[%s11472_s8 + $0x7d0] sm:$0xff]  }
0x1eb6   :  { %7524 = vmatmul.mubr.bf16.vlgmr.msra.gmra.mxu0 %v6368_v51  ;;  %7565 = vmatmul.mubr.bf16.vlgmr.msra.gmra.mxu1 %v6370_v53  ;;  %v6307_v51 = vrot.slane %v6302_v40, %v10169_v22  ;;  %v6117_v53 = vpack.c.bf16 %v6099_v49, %v6095_v27  ;;  %v9428_v27 = vld [vmem:[%s11472_s8 + $0x720] sm:$0xff]   ;;  %v9437_v40 = vld [vmem:[%s11472_s8 + $0x790] sm:$0xff]  }
0x1eb7   :  { %8874 = vmatpush3.bf16.msra.mxu0 %v9384_v6  ;;  %7605 = vmatprep.mubr.bf16.mxu0 %v6373_v32  ;;  %v6112_v6 = vpack.c.bf16 %v11170_v12, %v11142_v56  ;;  %v9412_v32 = vld [vmem:[%s11472_s8 + $0x600] sm:$0xff]   ;;  %v9414_v12 = vld [vmem:[%s11472_s8 + $0x778] sm:$0xff]  }
0x1eb8   :  { %8896 = vmatpush3.bf16.msra.mxu1 %v9385_v5  ;;  %7646 = vmatprep.mubr.bf16.mxu1 %v6375_v60  ;;  %v6331_v5 = vrot.slane %v6326_v46, %v10169_v22  ;;  %v9413_v56 = vld [vmem:[%s11472_s8 + $0x680] sm:$0xff]  }
0x1eb9   :  { %8875 = vmatprep.subr.bf16.mxu0 %v9386_v26  ;;  %8897 = vmatprep.subr.bf16.mxu1 %v9387_v62  ;;  %v6347_v26 = vrot.slane %v6342_v38, %v10169_v22  ;;  %v6356_v62 = vadd.bf16 %v6291_v48, %v6110_v47  ;;  %v6358_v60 = vadd.bf16 %v6307_v51, %v6112_v6  ;;  %v9440_v38 = vld [vmem:[%s11472_s8 + $0x708] sm:$0xff]   ;;  %v9442_v49 = vld [vmem:[%s11472_s8 + $0x740] sm:$0xff]  }
0x1eba   :  { %v9441_v48 = vld [vmem:[%s11472_s8 + $0x788] sm:$0xff]   ;;  %v9445_v51 = vld [vmem:[%s11472_s8 + $0x780] sm:$0xff]  }
0x1ebb   :  { %8876 = vmatpush3.bf16.msra.mxu0 %v9388_v61  ;;  %v9415_v61 = vld [vmem:[%s11472_s8 + $0x7f8] sm:$0xff]   ;;  %v6372_v4 = vmax.bf16 %v9591_v3, %v6356_v62 }
0x1ebc   :  { %8898 = vmatpush3.bf16.msra.mxu1 %v9389_v1  ;;  %8877 = vmatprep.subr.bf16.mxu0 %v9390_v14  ;;  %v6361_v1 = vadd.bf16 %v6331_v5, %v6115_v16  ;;  %v6363_v14 = vadd.bf16 %v6347_v26, %v6117_v53 }
0x1ebd   :  { %8899 = vmatprep.subr.bf16.mxu1 %v9391_v15  ;;  %v9416_v15 = vld [vmem:[%s11472_s8 + $0x738] sm:$0xff]  }
0x1ebe   :  { %v6377_v44 = vmax.bf16 %v9591_v3, %v6361_v1  ;;  %v6379_v57 = vmax.bf16 %v9591_v3, %v6363_v14 }
0x1ebf   :  { %8878 = vmatpush3.bf16.msra.mxu0 %v9392_v17  ;;  %v9417_v17 = vld [vmem:[%s11472_s8 + $0x7b8] sm:$0xff]  }
0x1ec0   :  { %8900 = vmatpush3.bf16.msra.mxu1 %v9393_v7  ;;  %8879 = vmatprep.subr.bf16.mxu0 %v9394_v9  ;;  %v6374_v7 = vmax.bf16 %v9591_v3, %v6358_v60  ;;  %v9418_v9 = vld [vmem:[%s11472_s8 + $0x770] sm:$0xff]  }
0x1ec1   :  { %8901 = vmatprep.subr.bf16.mxu1 %v9395_v42  ;;  %v9419_v42 = vld [vmem:[%s11472_s8 + $0x7f0] sm:$0xff]  }
0x1ec3   :  { %8880 = vmatpush3.bf16.msra.mxu0 %v9396_v13  ;;  %v9420_v13 = vld [vmem:[%s11472_s8 + $0x730] sm:$0xff]  }
0x1ec4   :  { %8902 = vmatpush3.bf16.msra.mxu1 %v9397_v35  ;;  %8881 = vmatprep.subr.bf16.mxu0 %v9398_v39  ;;  %v9421_v35 = vld [vmem:[%s11472_s8 + $0x7b0] sm:$0xff]   ;;  %v9422_v39 = vld [vmem:[%s11472_s8 + $0x768] sm:$0xff]  }
0x1ec5   :  { %8903 = vmatprep.subr.bf16.mxu1 %v9399_v24  ;;  %v9424_v24 = vld [vmem:[%s11472_s8 + $0x728] sm:$0xff]  }
0x1ec7   :  { %8882 = vmatpush3.bf16.msra.mxu0 %v9400_v45  ;;  %v6201_v45 = vrot.slane %v11231_v2, %v10156_v8  ;;  %v9430_v8 = vld [vmem:[%s11472_s8 + $0x758] sm:$0xff]  }
0x1ec8   :  { %8904 = vmatpush3.bf16.msra.mxu1 %v9401_v29  ;;  %8883 = vmatprep.subr.bf16.mxu0 %v9402_v31  ;;  %v9429_v29 = vld [vmem:[%s11472_s8 + $0x7a0] sm:$0xff]   ;;  %v9431_v31 = vld [vmem:[%s11472_s8 + $0x7d8] sm:$0xff]  }
0x1ec9   :  { %8905 = vmatprep.subr.bf16.mxu1 %v9403_v10  ;;  %v6217_v2 = vcombine.high %v6201_v45, %v6201_v45  ;;  %v6317_v10 = vshrl.u32 %v6201_v45, 16 }
0x1ecb   :  { %8884 = vmatpush3.bf16.msra.mxu0 %v9404_v54  ;;  %v6333_v54 = vshrl.u32 %v6217_v2, 16 }
0x1ecc   :  { %8906 = vmatpush3.bf16.msra.mxu1 %v9405_v30  ;;  %8885 = vmatprep.subr.bf16.mxu0 %v9406_v34  ;;  %v9436_v30 = vld [vmem:[%s11472_s8 + $0x710] sm:$0xff]   ;;  %v6318_v34 = vpack.i.b16 %v6317_v10, %v6317_v10 }
0x1ecd   :  { %8907 = vmatprep.subr.bf16.mxu1 %v9407_v41  ;;  %v9438_v41 = vld [vmem:[%s11472_s8 + $0x748] sm:$0xff]   ;;  %v6334_v46 = vpack.i.b16 %v6333_v54, %v6333_v54 }
0x1ece   :  { %v6323_v47 = vrot.slane %v6318_v34, %v10169_v22 }
0x1ecf   :  { %8886 = vmatpush3.bf16.msra.mxu0 %v9408_v37  ;;  %v6114_v37 = vpack.c.bf16 %v11291_v20, %v11262_v0  ;;  %v9443_v0 = vld [vmem:[%s11472_s8 + $0x7c0] sm:$0xff]  }
0x1ed0   :  { %8908 = vmatpush3.bf16.msra.mxu1 %v9409_v33  ;;  %8887 = vmatprep.subr.bf16.mxu0 %v9410_v18  ;;  %v6116_v33 = vpack.c.bf16 %v11296_v52, %v11268_v63  ;;  %v6339_v18 = vrot.slane %v6334_v46, %v10169_v22  ;;  %v9444_v20 = vld [vmem:[%s11472_s8 + $0x700] sm:$0xff]  }
0x1ed1   :  { %8909 = vmatprep.subr.bf16.mxu1 %v9411_v59  ;;  %v6360_v6 = vadd.bf16 %v6323_v47, %v6114_v37 }
0x1ed2   :  { %v6362_v63 = vadd.bf16 %v6339_v18, %v6116_v33 }
0x1ed3   :  { %8888 = vmatpush3.bf16.msra.mxu0 %v9412_v32  ;;  %v6376_v22 = vmax.bf16 %v9591_v3, %v6360_v6 }
0x1ed4   :  { %8910 = vmatpush3.bf16.msra.mxu1 %v9413_v56  ;;  %8917 = vmatprep.subr.bf16.mxu0 %v9414_v12  ;;  %v6378_v52 = vmax.bf16 %v9591_v3, %v6362_v63  ;;  %v8390_v3 = vld [vmem:[%s11467_s3 + $0x11] ss:$0 sm:$0xff] }
0x1ed5   :  { %8939 = vmatprep.subr.bf16.mxu1 %v9415_v61 }
0x1ed6   :  { %7606 = vmatmul.mubr.bf16.vlgmr.msra.gmra.mxu0 %v6372_v4 }
0x1ed7   :  { %7647 = vmatmul.mubr.bf16.vlgmr.msra.gmra.mxu1 %v6374_v7  ;;  %8918 = vmatpush3.bf16.msra.mxu0 %v9416_v15 }
0x1ed8   :  { %7687 = vmatprep.mubr.bf16.mxu0 %v6377_v44  ;;  %8940 = vmatpush3.bf16.msra.mxu1 %v9417_v17 }
0x1ed9   :  { %7728 = vmatprep.mubr.bf16.mxu1 %v6379_v57  ;;  %8919 = vmatprep.subr.bf16.mxu0 %v9418_v9 }
0x1eda   :  { %8941 = vmatprep.subr.bf16.mxu1 %v9419_v42 }
0x1edb   :  { %8920 = vmatpush3.bf16.msra.mxu0 %v9420_v13 }
0x1edc   :  { %8942 = vmatpush3.bf16.msra.mxu1 %v9421_v35  ;;  %8921 = vmatprep.subr.bf16.mxu0 %v9422_v39 }
0x1edd   :  { %8943 = vmatprep.subr.bf16.mxu1 %v9423_v19 }
0x1edf   :  { %8922 = vmatpush3.bf16.msra.mxu0 %v9424_v24 }
0x1ee0   :  { %8944 = vmatpush3.bf16.msra.mxu1 %v9425_v28  ;;  %8923 = vmatprep.subr.bf16.mxu0 %v9426_v21 }
0x1ee1   :  { %8945 = vmatprep.subr.bf16.mxu1 %v9427_v23 }
0x1ee3   :  { %8924 = vmatpush3.bf16.msra.mxu0 %v9428_v27 }
0x1ee4   :  { %8946 = vmatpush3.bf16.msra.mxu1 %v9429_v29  ;;  %8925 = vmatprep.subr.bf16.mxu0 %v9430_v8 }
0x1ee5   :  { %8947 = vmatprep.subr.bf16.mxu1 %v9431_v31 }
0x1ee7   :  { %8926 = vmatpush3.bf16.msra.mxu0 %v9432_v50 }
0x1ee8   :  { %8948 = vmatpush3.bf16.msra.mxu1 %v9433_v36  ;;  %8927 = vmatprep.subr.bf16.mxu0 %v9434_v43 }
0x1ee9   :  { %8949 = vmatprep.subr.bf16.mxu1 %v9435_v55 }
0x1eeb   :  { %8928 = vmatpush3.bf16.msra.mxu0 %v9436_v30 }
0x1eec   :  { %8950 = vmatpush3.bf16.msra.mxu1 %v9437_v40  ;;  %8929 = vmatprep.subr.bf16.mxu0 %v9438_v41 }
0x1eed   :  { %8951 = vmatprep.subr.bf16.mxu1 %v9439_v58 }
0x1eef   :  { %8930 = vmatpush3.bf16.msra.mxu0 %v9440_v38 }
0x1ef0   :  { %8952 = vmatpush3.bf16.msra.mxu1 %v9441_v48  ;;  %8931 = vmatprep.subr.bf16.mxu0 %v9442_v49 }
0x1ef1   :  { %8953 = vmatprep.subr.bf16.mxu1 %v9443_v0 }
0x1ef3   :  { %8932 = vmatpush3.bf16.msra.mxu0 %v9444_v20 }
0x1ef4   :  { %8954 = vmatpush3.bf16.msra.mxu1 %v9445_v51 }
0x1ef6   :  { %7688 = vmatmul.mubr.bf16.vlgmr.msra.gmra.mxu0 %v6376_v22 }
0x1ef7   :  { %7729 = vmatmul.mubr.bf16.vlgmr.msra.gmra.mxu1 %v6378_v52 }
0x1f56   :  { %v8801_v59 = vpop.f32.mrf.mxu0  ;;  %v8823_v16 = vpop.f32.mrf.mxu1 }
0x1f58   :  { %v8802_v5 = vpop.f32.mrf.mxu0  ;;  %v8824_v53 = vpop.f32.mrf.mxu1 }
0x1f59   :  { %v8803_v17 = vadd.f32 %v8802_v5, %v8801_v59  ;;  %v8825_v35 = vadd.f32 %v8824_v53, %v8823_v16 }
0x1f5a   :  { %v8804_v26 = vpop.f32.mrf.mxu0  ;;  %v8826_v32 = vpop.f32.mrf.mxu1 }
0x1f5b   :  { %v7444_v44 = vadd.f32 %v8803_v17, %v8390_v3 }
0x1f5c   :  { %v8805_v62 = vpop.f32.mrf.mxu0  ;;  %v8827_v12 = vpop.f32.mrf.mxu1 }
0x1f5d   :  { %v8806_v42 = vadd.f32 %v8805_v62, %v8804_v26  ;;  %v7485_v19 = vadd.f32 %v8825_v35, %v7444_v44  ;;  %v8828_v45 = vadd.f32 %v8827_v12, %v8826_v32 }
0x1f5f   :  { %v7447_v24 = vadd.f32 %v8806_v42, %v8390_v3 }
0x1f61   :  { %v7488_v29 = vadd.f32 %v8828_v45, %v7447_v24 }
0x1f76   :  { %v8845_v56 = vpop.f32.mrf.mxu0  ;;  %v8867_v60 = vpop.f32.mrf.mxu1 }
0x1f78   :  { %v8846_v61 = vpop.f32.mrf.mxu0  ;;  %v8868_v1 = vpop.f32.mrf.mxu1 }
0x1f79   :  { %v8847_v39 = vadd.f32 %v8846_v61, %v8845_v56  ;;  %v8869_v8 = vadd.f32 %v8868_v1, %v8867_v60 }
0x1f7a   :  { %v8848_v14 = vpop.f32.mrf.mxu0  ;;  %v8870_v15 = vpop.f32.mrf.mxu1 }
0x1f7b   :  { %v7526_v23 = vadd.f32 %v8847_v39, %v7485_v19 }
0x1f7c   :  { %v8849_v4 = vpop.f32.mrf.mxu0  ;;  %v8871_v9 = vpop.f32.mrf.mxu1 }
0x1f7d   :  { %v8850_v27 = vadd.f32 %v8849_v4, %v8848_v14  ;;  %v7567_v10 = vadd.f32 %v8869_v8, %v7526_v23  ;;  %v8872_v43 = vadd.f32 %v8871_v9, %v8870_v15 }
0x1f7f   :  { %v7529_v36 = vadd.f32 %v8850_v27, %v7488_v29  ;;  %v8519_v27 = vld [vmem:[%s11467_s3 + $0x12] ss:$0 sm:$0xff] }
0x1f81   :  { %v7570_v40 = vadd.f32 %v8872_v43, %v7529_v36 }
0x1f96   :  { %v8889_v7 = vpop.f32.mrf.mxu0 }
0x1f97   :  { %v8911_v57 = vpop.f32.mrf.mxu1 }
0x1f98   :  { %v8890_v13 = vpop.f32.mrf.mxu0 }
0x1f99   :  { %v8912_v28 = vpop.f32.mrf.mxu1  ;;  %v8891_v2 = vadd.f32 %v8890_v13, %v8889_v7 }
0x1f9a   :  { %v8892_v21 = vpop.f32.mrf.mxu0  ;;  %v8913_v41 = vadd.f32 %v8912_v28, %v8911_v57 }
0x1f9b   :  { %v8914_v31 = vpop.f32.mrf.mxu1  ;;  %v7608_v54 = vadd.f32 %v8891_v2, %v7567_v10  ;;  %v8520_v2 = vld [vmem:[%s11467_s3 + $0x13] ss:$0 sm:$0xff] }
0x1f9c   :  { %v8893_v50 = vpop.f32.mrf.mxu0 }
0x1f9d   :  { %v8894_v55 = vadd.f32 %v8893_v50, %v8892_v21  ;;  %v8915_v30 = vpop.f32.mrf.mxu1  ;;  %v7649_v38 = vadd.f32 %v8913_v41, %v7608_v54 }
0x1f9e   :  { %v8916_v33 = vadd.f32 %v8915_v30, %v8914_v31 }
0x1f9f   :  { %v7611_v37 = vadd.f32 %v8894_v55, %v7570_v40 }
0x1fa1   :  { %v7652_v51 = vadd.f32 %v8916_v33, %v7611_v37 }
0x1fb6   :  { %v8933_v34 = vpop.f32.mrf.mxu0 }
0x1fb7   :  { %v8955_v46 = vpop.f32.mrf.mxu1 }
0x1fb8   :  { %v8934_v58 = vpop.f32.mrf.mxu0 }
0x1fb9   :  { %v8935_v47 = vadd.f32 %v8934_v58, %v8933_v34  ;;  %v8956_v48 = vpop.f32.mrf.mxu1 }
0x1fba   :  { %v8936_v49 = vpop.f32.mrf.mxu0  ;;  %v8957_v0 = vadd.f32 %v8956_v48, %v8955_v46 }
0x1fbb   :  { %v7690_v18 = vadd.f32 %v8935_v47, %v7649_v38  ;;  %v8958_v20 = vpop.f32.mrf.mxu1 }
0x1fbc   :  { %v8937_v6 = vpop.f32.mrf.mxu0 }
0x1fbd   :  { %v7731_v63 = vadd.f32 %v8957_v0, %v7690_v18  ;;  %v8938_v22 = vadd.f32 %v8937_v6, %v8936_v49  ;;  %v8959_v52 = vpop.f32.mrf.mxu1 }
0x1fbe   :  { %v8960_v16 = vadd.f32 %v8959_v52, %v8958_v20 }
0x1fbf   :  { %v7693_v59 = vadd.f32 %v8938_v22, %v7652_v51  ;;  %v7737_v5 = vadd.f32 %v7731_v63, %v10807_v25 }
0x1fc1   :  { %v7734_v53 = vadd.f32 %v8960_v16, %v7693_v59  ;;  %v7741_v26 = vsel %vm64_vm0, %v7737_v5, 0.0 }
0x1fc2   :  { %7742 = vadd.xlane.f32.xlu0 %v7741_v26 }
0x1fc3   :  { %v7738_v32 = vadd.f32 %v7734_v53, %v10804_v11 }
0x1fc5   :  { %v7744_v62 = vsel %vm64_vm0, %v7738_v32, 0.0 }
0x1fc6   :  { %7745 = vadd.xlane.f32.xlu1 %v7744_v62 }
0x204b   :  { %v7743_v56 = vpop.xlane.xlu0 %7742 }
0x204c   :  { %v7747_v12 = vmul.f32 0.03125, %v7743_v56 }
0x204e   :  { %v7749_v60 = vsub.f32 %v7737_v5, %v7747_v12 }
0x204f   :  { %v7746_v61 = vpop.xlane.xlu1 %7745 }
0x2050   :  { %v7748_v1 = vmul.f32 0.03125, %v7746_v61  ;;  %v7751_v14 = vmul.f32 %v7749_v60, %v7749_v60  ;;  %v7779_v29 = vmul.f32 %v8519_v27, %v7749_v60 }
0x2052   :  { %v7750_v15 = vsub.f32 %v7738_v32, %v7748_v1  ;;  %v7753_v4 = vsel %vm64_vm0, %v7751_v14, 0.0 }
0x2053   :  { %7754 = vadd.xlane.f32.xlu0 %v7753_v4 }
0x2054   :  { %v7752_v25 = vmul.f32 %v7750_v15, %v7750_v15  ;;  %v7780_v50 = vmul.f32 %v8519_v27, %v7750_v15 }
0x2056   :  { %v7756_v17 = vsel %vm64_vm0, %v7752_v25, 0.0 }
0x2057   :  { %7757 = vadd.xlane.f32.xlu1 %v7756_v17 }
0x20dc   :  { %v7755_v3 = vpop.xlane.xlu0 %7754 }
0x20dd   :  { %v7759_v7 = vmul.f32 0.032258064, %v7755_v3 }
0x20df   :  { %9542 = vrsqrt.f32 %v7759_v7  ;;  %vm7763_vm6 = vcmp.eq.f32.partialorder %v7759_v7, inf  ;;  %v7766_v57 = vand.u32 2147483648, %v7759_v7  ;;  %vm7765_vm7 = vcmp.eq.f32.partialorder %v7759_v7, 0.0 }
0x20e0   :  { %v7758_v11 = vpop.xlane.xlu1 %7757 }
0x20e1   :  { %v7760_v9 = vmul.f32 0.032258064, %v7758_v11 }
0x20e3   :  { %9544 = vrsqrt.f32 %v7760_v9  ;;  %vm7770_vm8 = vcmp.eq.f32.partialorder %v7760_v9, inf  ;;  %v7773_v28 = vand.u32 2147483648, %v7760_v9  ;;  %vm7772_vm9 = vcmp.eq.f32.partialorder %v7760_v9, 0.0 }
0x20ec   :  { %v9543_v44 = vpop.eup %9542 }
0x20ed   :  { %v7762_v42 = vmul.f32 %v9543_v44, %v7759_v7 }
0x20ef   :  { %v7764_v13 = vsel %vm7763_vm6, %v7759_v7, %v7762_v42 }
0x20f0   :  { %v9545_v35 = vpop.eup %9544  ;;  %v7767_v39 = vsel %vm7765_vm7, %v7766_v57, %v7764_v13 }
0x20f1   :  { %v7781_v19 = vadd.f32 1e-06, %v7767_v39  ;;  %v7769_v24 = vmul.f32 %v9545_v35, %v7760_v9 }
0x20f3   :  { %9546 = vrcp.f32 %v7781_v19  ;;  %v7771_v21 = vsel %vm7770_vm8, %v7760_v9, %v7769_v24 }
0x20f4   :  { %v7774_v45 = vsel %vm7772_vm9, %v7773_v28, %v7771_v21 }
0x20f5   :  { %v7782_v23 = vadd.f32 1e-06, %v7774_v45 }
0x20f7   :  { %9548 = vrcp.f32 %v7782_v23 }
0x2100   :  { %v9547_v8 = vpop.eup %9546 }
0x2101   :  { %v7784_v31 = vmul.f32 %v9547_v8, %v7779_v29 }
0x2103   :  { %v7791_v10 = vadd.f32 %v8520_v2, %v7784_v31 }
0x2104   :  { %v9549_v36 = vpop.eup %9548 }
0x2105   :  { %v7786_v43 = vmul.f32 %v9549_v36, %v7780_v50  ;;  %7793 = vst.msk [vmem:[#allocation2] sm:$0xff] %vm64_vm0, %v7791_v10 }
0x2107   :  { %v7792_v54 = vadd.f32 %v8520_v2, %v7786_v43 }
0x2109   :  { %7794 = vst.msk [vmem:[#allocation2 + $0x8] sm:$0xff] %vm64_vm0, %v7792_v54 }
0x210a   :  { %9563 = shalt.err (!%p9560_p4)
}
0x210b   :  { %s9594_s3 = smov 128  }
0x210c   :  { %7806 = dma.vmem_to_hbm [thread:$0]  %s7801_s17, 256, %s11473_s9, [#allocation3], %s9594_s3, %s9594_s3, %s9588_s25  }
0x210d   :  { %9572 = dma.done.wait [#allocation3], 256  }
0x210e   :  { %9573 = vsyncadd [#allocation3], 4294967040 }
0x210f   :  { %7810 = vsyncpa [#allocation3], 1 }

</bundles_post_ra>
